<compile_context>
chip_gen: v7x
topology: tpu7x:2x2x1
jax: 0.10.0
libtpu: 0.0.40
codegen_flags: <defaults>
</compile_context>

<pallas_src>
import jax
import jax.numpy as jnp
import numpy as np
from jax import lax
from jax.experimental import pallas as pl
from jax.experimental.pallas import tpu as pltpu

DIM = 32
NUM_SCALES = 2
NUM_HEADS = 4
HEAD_DIM = 16
INNER = NUM_HEADS * HEAD_DIM          # 64
SCALE = HEAD_DIM ** -0.5
EPS = 1e-5                            # torch.nn.LayerNorm default


# ----------------------------- fused Pallas kernel ---------------------------

def _fused_kernel(f0_ref, f1_ref,
                  wp_ref, bp_ref, gp_ref, betap_ref,
                  wqkv_ref, wo_ref, bo_ref,
                  wc1_ref, bc1_ref, gc_ref, betac_ref,
                  wc2_ref, bc2_ref,
                  wf1_ref, bf1_ref, gf_ref, betaf_ref,
                  wf2_ref, bf2_ref,
                  o_ref):
    """One batch per grid step.  All weights resident in VMEM across steps."""

    def mm(a, b):
        # a @ b, contracting (last dim of a, first dim of b), f32 accumulation.
        return lax.dot_general(a, b, (((1,), (0,)), ((), ())),
                               preferred_element_type=jnp.float32)

    def ln(y, g, b):
        mu = jnp.mean(y, axis=-1, keepdims=True)
        var = jnp.mean(jnp.square(y - mu), axis=-1, keepdims=True)
        return (y - mu) * lax.rsqrt(var + EPS) * g + b

    x0 = f0_ref[0]                                    # [N, D]
    x1 = f1_ref[0]                                    # [N, D]

    # --- per-scale projections: Linear -> LayerNorm -> ReLU ------------------
    def proj(x, s):
        y = mm(x, wp_ref[s]) + bp_ref[s]
        return jnp.maximum(ln(y, gp_ref[s], betap_ref[s]), 0.0)

    p0 = proj(x0, 0)
    p1 = proj(x1, 1)

    # --- fused Q|K|V projection (lane-dense 192-wide output) -----------------
    qkv0 = mm(p0, wqkv_ref[...])                      # [N, 3*INNER]
    qkv1 = mm(p1, wqkv_ref[...])

    # --- multi-head attention + to_out, fused per head -----------------------
    def attend_project(qkv_q, qkv_kv):
        # q comes from qkv_q[:, :INNER]; k/v from qkv_kv[:, INNER:]/[2*INNER:].
        # Head merge + output projection folded into per-head partial matmuls.
        acc = None
        for h in range(NUM_HEADS):
            lo = h * HEAD_DIM
            qh = qkv_q[:, lo:lo + HEAD_DIM]                               # [N, dh]
            kh = qkv_kv[:, INNER + lo:INNER + lo + HEAD_DIM]              # [N, dh]
            vh = qkv_kv[:, 2 * INNER + lo:2 * INNER + lo + HEAD_DIM]      # [N, dh]
            # q @ k^T without materializing a transpose of k.
            dots = lax.dot_general(qh, kh, (((1,), (1,)), ((), ())),
                                   preferred_element_type=jnp.float32) * SCALE
            m = jnp.max(dots, axis=-1, keepdims=True)
            e = jnp.exp(dots - m)
            inv = pl.reciprocal(jnp.sum(e, axis=-1, keepdims=True), approx=True)
            oh = mm(e * inv, vh)                                          # [N, dh]
            part = mm(oh, wo_ref[lo:lo + HEAD_DIM, :])                    # [N, D]
            acc = part if acc is None else acc + part
        return acc + bo_ref[...]                                          # [N, D]

    o0 = attend_project(qkv0, qkv1)   # scale 0: q from p0, k/v from ctx=p1
    o1 = attend_project(qkv1, qkv0)   # scale 1: q from p1, k/v from ctx=p0

    # --- to_context(ctx): Linear -> LayerNorm -> ReLU -> Linear --------------
    def to_ctx(p):
        c = jnp.maximum(ln(mm(p, wc1_ref[...]) + bc1_ref[...],
                           gc_ref[...], betac_ref[...]), 0.0)
        return mm(c, wc2_ref[...]) + bc2_ref[...]

    c0 = to_ctx(p0)
    c1 = to_ctx(p1)

    att0 = o0 + c1                    # ctx for scale 0 is p1
    att1 = o1 + c0                    # ctx for scale 1 is p0

    # --- fusion: Linear(2D -> D) as per-scale weight split (no lane concat) --
    h = mm(att0, wf1_ref[0]) + mm(att1, wf1_ref[1]) + bf1_ref[...]
    h = jnp.maximum(ln(h, gf_ref[...], betaf_ref[...]), 0.0)
    o_ref[0] = mm(h, wf2_ref[...]) + bf2_ref[...]     # Dropout p=0 -> identity


# --------------------------------- wrapper -----------------------------------

def cross_scale_attention(features, params):
    assert len(features) == NUM_SCALES
    f0, f1 = features
    B, N, D = f0.shape
    assert D == DIM and f1.shape == (B, N, D)

    pp, pa, pf = params['proj'], params['attn'], params['fusion']

    # Pack weights in matmul-friendly [Din, Dout] layout; biases / LN params as
    # [1, D] rows so they broadcast directly inside the kernel.
    wp = jnp.stack([pp[s]['W'].T for s in range(NUM_SCALES)])               # [2,D,D]
    bp = jnp.stack([pp[s]['b'].reshape(1, D) for s in range(NUM_SCALES)])   # [2,1,D]
    gp = jnp.stack([pp[s]['g'].reshape(1, D) for s in range(NUM_SCALES)])
    betap = jnp.stack([pp[s]['beta'].reshape(1, D) for s in range(NUM_SCALES)])

    wqkv = jnp.concatenate([pa['Wq'].T, pa['Wk'].T, pa['Wv'].T], axis=1)    # [D, 3*INNER]
    wo = pa['Wo'].T                                                          # [INNER, D]
    bo = pa['bo'].reshape(1, D)
    wc1 = pa['Wc1'].T
    bc1 = pa['bc1'].reshape(1, D)
    gc = pa['gc'].reshape(1, D)
    betac = pa['betac'].reshape(1, D)
    wc2 = pa['Wc2'].T
    bc2 = pa['bc2'].reshape(1, D)

    wf1 = pf['W1'].T.reshape(NUM_SCALES, D, D)                               # [2,D,D]
    bf1 = pf['b1'].reshape(1, D)
    gf = pf['g'].reshape(1, D)
    betaf = pf['beta'].reshape(1, D)
    wf2 = pf['W2'].T
    bf2 = pf['b2'].reshape(1, D)

    args = (f0, f1, wp, bp, gp, betap, wqkv, wo, bo,
            wc1, bc1, gc, betac, wc2, bc2,
            wf1, bf1, gf, betaf, wf2, bf2)

    feat_spec = pl.BlockSpec((1, N, D), lambda b: (b, 0, 0))

    def w_spec(a):
        nd = a.ndim
        return pl.BlockSpec(a.shape, lambda b, n=nd: (0,) * n)   # resident across grid

    in_specs = [feat_spec, feat_spec] + [w_spec(a) for a in args[2:]]

    return pl.pallas_call(
        _fused_kernel,
        out_shape=jax.ShapeDtypeStruct((B, N, D), jnp.float32),
        grid=(B,),
        in_specs=in_specs,
        out_specs=pl.BlockSpec((1, N, D), lambda b: (b, 0, 0)),
        compiler_params=pltpu.CompilerParams(
            dimension_semantics=("parallel",)),   # v7x: batch split across 2 TCs
    )(*args)


# ------------------------------- init params ---------------------------------

def _init_linear(key, out_dim, in_dim, bias=True):
    kw, kb = jax.random.split(key)
    w = jax.random.normal(kw, (out_dim, in_dim), jnp.float32) * 0.1   # torch [out, in]
    b = jax.random.normal(kb, (out_dim,), jnp.float32) * 0.1 if bias else None
    return w, b


def init_params(key):
    keys = jax.random.split(key, 12)
    params = {'proj': []}
    for i in range(NUM_SCALES):
        w, b = _init_linear(keys[i], DIM, DIM)
        params['proj'].append(dict(W=w, b=b, g=jnp.ones(DIM), beta=jnp.zeros(DIM)))
    wq, _ = _init_linear(keys[4], INNER, DIM, bias=False)
    wk, _ = _init_linear(keys[5], INNER, DIM, bias=False)
    wv, _ = _init_linear(keys[6], INNER, DIM, bias=False)
    wc1, bc1 = _init_linear(keys[7], DIM, DIM)
    wc2, bc2 = _init_linear(keys[8], DIM, DIM)
    wo, bo = _init_linear(keys[9], DIM, INNER)
    params['attn'] = dict(Wq=wq, Wk=wk, Wv=wv, Wo=wo, bo=bo,
                          Wc1=wc1, bc1=bc1, gc=jnp.ones(DIM), betac=jnp.zeros(DIM),
                          Wc2=wc2, bc2=bc2)
    wf1, bf1 = _init_linear(keys[10], DIM, DIM * NUM_SCALES)
    wf2, bf2 = _init_linear(keys[11], DIM, DIM)
    params['fusion'] = dict(W1=wf1, b1=bf1, g=jnp.ones(DIM), beta=jnp.zeros(DIM),
                            W2=wf2, b2=bf2)
    return params


# --------------------------- pure-JAX reference ------------------------------

def _ref_ln(x, g, b):
    m = jnp.mean(x, -1, keepdims=True)
    v = jnp.mean(jnp.square(x - m), -1, keepdims=True)
    return (x - m) / jnp.sqrt(v + EPS) * g + b


def ref_forward(features, params):
    projected = []
    for feat, p in zip(features, params['proj']):
        projected.append(jnp.maximum(_ref_ln(feat @ p['W'].T + p['b'], p['g'], p['beta']), 0.0))
    pa = params['attn']
    attended = []
    for i in range(NUM_SCALES):
        x = projected[i]
        ctx = jnp.concatenate([projected[j] for j in range(NUM_SCALES) if j != i], axis=1)
        b, nq, d = x.shape
        nk = ctx.shape[1]
        q = (x @ pa['Wq'].T).reshape(b, nq, NUM_HEADS, HEAD_DIM).transpose(0, 2, 1, 3)
        k = (ctx @ pa['Wk'].T).reshape(b, nk, NUM_HEADS, HEAD_DIM).transpose(0, 2, 1, 3)
        v = (ctx @ pa['Wv'].T).reshape(b, nk, NUM_HEADS, HEAD_DIM).transpose(0, 2, 1, 3)
        dots = jnp.einsum('bhqd,bhkd->bhqk', q, k) * SCALE
        attn = jax.nn.softmax(dots, axis=-1)
        o = jnp.einsum('bhqk,bhkd->bhqd', attn, v).transpose(0, 2, 1, 3).reshape(b, nq, INNER)
        o = o @ pa['Wo'].T + pa['bo']
        c = jnp.maximum(_ref_ln(ctx @ pa['Wc1'].T + pa['bc1'], pa['gc'], pa['betac']), 0.0)
        c = c @ pa['Wc2'].T + pa['bc2']
        attended.append(o + c)
    fused = jnp.concatenate(attended, -1)
    pf = params['fusion']
    h = jnp.maximum(_ref_ln(fused @ pf['W1'].T + pf['b1'], pf['g'], pf['beta']), 0.0)
    return h @ pf['W2'].T + pf['b2']


# --------------------------------- main --------------------------------------

if __name__ == "__main__":
    key = jax.random.PRNGKey(0)
    kp, kf0, kf1 = jax.random.split(key, 3)
    params = init_params(kp)

    B, N = 2, 64
    features = [jax.random.normal(kf0, (B, N, DIM), jnp.float32),
                jax.random.normal(kf1, (B, N, DIM), jnp.float32)]

    out = cross_scale_attention(features, params)
    out = jax.block_until_ready(out)
    assert out.shape == (B, N, DIM)

    ref = ref_forward(features, params)
    np.testing.assert_allclose(np.asarray(out), np.asarray(ref), rtol=2e-3, atol=2e-3)

    print("KERNEL_OK")
</pallas_src>

<mosaic_0001>
module attributes {stable_mosaic.version = 11 : i64} {
  func.func @_fused_kernel(%arg0: i32, %arg1: memref<1x64x32xf32, #tpu.memory_space<vmem>>, %arg2: memref<1x64x32xf32, #tpu.memory_space<vmem>>, %arg3: memref<2x32x32xf32, #tpu.memory_space<vmem>>, %arg4: memref<2x1x32xf32, #tpu.memory_space<vmem>>, %arg5: memref<2x1x32xf32, #tpu.memory_space<vmem>>, %arg6: memref<2x1x32xf32, #tpu.memory_space<vmem>>, %arg7: memref<32x192xf32, #tpu.memory_space<vmem>>, %arg8: memref<64x32xf32, #tpu.memory_space<vmem>>, %arg9: memref<1x32xf32, #tpu.memory_space<vmem>>, %arg10: memref<32x32xf32, #tpu.memory_space<vmem>>, %arg11: memref<1x32xf32, #tpu.memory_space<vmem>>, %arg12: memref<1x32xf32, #tpu.memory_space<vmem>>, %arg13: memref<1x32xf32, #tpu.memory_space<vmem>>, %arg14: memref<32x32xf32, #tpu.memory_space<vmem>>, %arg15: memref<1x32xf32, #tpu.memory_space<vmem>>, %arg16: memref<2x32x32xf32, #tpu.memory_space<vmem>>, %arg17: memref<1x32xf32, #tpu.memory_space<vmem>>, %arg18: memref<1x32xf32, #tpu.memory_space<vmem>>, %arg19: memref<1x32xf32, #tpu.memory_space<vmem>>, %arg20: memref<32x32xf32, #tpu.memory_space<vmem>>, %arg21: memref<1x32xf32, #tpu.memory_space<vmem>>, %arg22: memref<1x64x32xf32, #tpu.memory_space<vmem>>) attributes {dimension_semantics = [#tpu.dimension_semantics<parallel>], iteration_bounds = array<i64: 2>, scalar_prefetch = 0 : i64, scratch_operands = 0 : i64, tpu.core_type = #tpu.core_type<tc>, window_params = [{transform_indices = @transform_0, window_bounds = array<i64: 1, 64, 32>}, {transform_indices = @transform_1, window_bounds = array<i64: 1, 64, 32>}, {pipeline_mode = #tpu.pipeline_mode<synchronous>, transform_indices = @transform_2, window_bounds = array<i64: 2, 32, 32>}, {pipeline_mode = #tpu.pipeline_mode<synchronous>, transform_indices = @transform_3, window_bounds = array<i64: 2, 1, 32>}, {pipeline_mode = #tpu.pipeline_mode<synchronous>, transform_indices = @transform_4, window_bounds = array<i64: 2, 1, 32>}, {pipeline_mode = #tpu.pipeline_mode<synchronous>, transform_indices = @transform_5, window_bounds = array<i64: 2, 1, 32>}, {pipeline_mode = #tpu.pipeline_mode<synchronous>, transform_indices = @transform_6, window_bounds = array<i64: 32, 192>}, {pipeline_mode = #tpu.pipeline_mode<synchronous>, transform_indices = @transform_7, window_bounds = array<i64: 64, 32>}, {pipeline_mode = #tpu.pipeline_mode<synchronous>, transform_indices = @transform_8, window_bounds = array<i64: 1, 32>}, {pipeline_mode = #tpu.pipeline_mode<synchronous>, transform_indices = @transform_9, window_bounds = array<i64: 32, 32>}, {pipeline_mode = #tpu.pipeline_mode<synchronous>, transform_indices = @transform_10, window_bounds = array<i64: 1, 32>}, {pipeline_mode = #tpu.pipeline_mode<synchronous>, transform_indices = @transform_11, window_bounds = array<i64: 1, 32>}, {pipeline_mode = #tpu.pipeline_mode<synchronous>, transform_indices = @transform_12, window_bounds = array<i64: 1, 32>}, {pipeline_mode = #tpu.pipeline_mode<synchronous>, transform_indices = @transform_13, window_bounds = array<i64: 32, 32>}, {pipeline_mode = #tpu.pipeline_mode<synchronous>, transform_indices = @transform_14, window_bounds = array<i64: 1, 32>}, {pipeline_mode = #tpu.pipeline_mode<synchronous>, transform_indices = @transform_15, window_bounds = array<i64: 2, 32, 32>}, {pipeline_mode = #tpu.pipeline_mode<synchronous>, transform_indices = @transform_16, window_bounds = array<i64: 1, 32>}, {pipeline_mode = #tpu.pipeline_mode<synchronous>, transform_indices = @transform_17, window_bounds = array<i64: 1, 32>}, {pipeline_mode = #tpu.pipeline_mode<synchronous>, transform_indices = @transform_18, window_bounds = array<i64: 1, 32>}, {pipeline_mode = #tpu.pipeline_mode<synchronous>, transform_indices = @transform_19, window_bounds = array<i64: 32, 32>}, {pipeline_mode = #tpu.pipeline_mode<synchronous>, transform_indices = @transform_20, window_bounds = array<i64: 1, 32>}, {transform_indices = @transform_21, window_bounds = array<i64: 1, 64, 32>}]} {
    %c0 = arith.constant 0 : index
    %c0_0 = arith.constant 0 : index
    %c0_1 = arith.constant 0 : index
    %0 = vector.load %arg1[%c0, %c0_0, %c0_1] : memref<1x64x32xf32, #tpu.memory_space<vmem>>, vector<1x64x32xf32>
    %1 = vector.shape_cast %0 : vector<1x64x32xf32> to vector<64x32xf32>
    %c0_2 = arith.constant 0 : index
    %c0_3 = arith.constant 0 : index
    %c0_4 = arith.constant 0 : index
    %2 = vector.load %arg2[%c0_2, %c0_3, %c0_4] : memref<1x64x32xf32, #tpu.memory_space<vmem>>, vector<1x64x32xf32>
    %3 = vector.shape_cast %2 : vector<1x64x32xf32> to vector<64x32xf32>
    %c0_5 = arith.constant 0 : index
    %c0_6 = arith.constant 0 : index
    %c0_7 = arith.constant 0 : index
    %4 = vector.load %arg3[%c0_5, %c0_6, %c0_7] : memref<2x32x32xf32, #tpu.memory_space<vmem>>, vector<1x32x32xf32>
    %5 = vector.shape_cast %4 : vector<1x32x32xf32> to vector<32x32xf32>
    %cst = arith.constant dense<0.000000e+00> : vector<64x32xf32>
    %6 = tpu.matmul %1, %5, %cst {dimension_numbers = #tpu.dot_dimension_numbers<[1], [0], [0], [1], [0, 0, 1, 1], [], []>} : vector<64x32xf32>, vector<32x32xf32>, vector<64x32xf32> -> vector<64x32xf32>
    %c0_8 = arith.constant 0 : index
    %c0_9 = arith.constant 0 : index
    %c0_10 = arith.constant 0 : index
    %7 = vector.load %arg4[%c0_8, %c0_9, %c0_10] : memref<2x1x32xf32, #tpu.memory_space<vmem>>, vector<1x1x32xf32>
    %8 = vector.shape_cast %7 : vector<1x1x32xf32> to vector<1x32xf32>
    %9 = vector.broadcast %8 : vector<1x32xf32> to vector<64x32xf32>
    %10 = arith.addf %6, %9 : vector<64x32xf32>
    %c0_11 = arith.constant 0 : index
    %c0_12 = arith.constant 0 : index
    %c0_13 = arith.constant 0 : index
    %11 = vector.load %arg5[%c0_11, %c0_12, %c0_13] : memref<2x1x32xf32, #tpu.memory_space<vmem>>, vector<1x1x32xf32>
    %12 = vector.shape_cast %11 : vector<1x1x32xf32> to vector<1x32xf32>
    %c0_14 = arith.constant 0 : index
    %c0_15 = arith.constant 0 : index
    %c0_16 = arith.constant 0 : index
    %13 = vector.load %arg6[%c0_14, %c0_15, %c0_16] : memref<2x1x32xf32, #tpu.memory_space<vmem>>, vector<1x1x32xf32>
    %14 = vector.shape_cast %13 : vector<1x1x32xf32> to vector<1x32xf32>
    %cst_17 = arith.constant dense<0.000000e+00> : vector<64xf32>
    %15 = vector.multi_reduction <add>, %10, %cst_17 [1] : vector<64x32xf32> to vector<64xf32>
    %16 = vector.shape_cast %15 : vector<64xf32> to vector<64x1xf32>
    %cst_18 = arith.constant 3.200000e+01 : f32
    %17 = vector.broadcast %cst_18 : f32 to vector<64x1xf32>
    %18 = arith.divf %16, %17 : vector<64x1xf32>
    %19 = vector.broadcast %18 : vector<64x1xf32> to vector<64x32xf32>
    %20 = arith.subf %10, %19 : vector<64x32xf32>
    %21 = arith.mulf %20, %20 : vector<64x32xf32>
    %cst_19 = arith.constant dense<0.000000e+00> : vector<64xf32>
    %22 = vector.multi_reduction <add>, %21, %cst_19 [1] : vector<64x32xf32> to vector<64xf32>
    %23 = vector.shape_cast %22 : vector<64xf32> to vector<64x1xf32>
    %cst_20 = arith.constant 3.200000e+01 : f32
    %24 = vector.broadcast %cst_20 : f32 to vector<64x1xf32>
    %25 = arith.divf %23, %24 : vector<64x1xf32>
    %26 = vector.broadcast %18 : vector<64x1xf32> to vector<64x32xf32>
    %27 = arith.subf %10, %26 : vector<64x32xf32>
    %cst_21 = arith.constant 9.99999974E-6 : f32
    %28 = vector.broadcast %cst_21 : f32 to vector<64x1xf32>
    %29 = arith.addf %25, %28 : vector<64x1xf32>
    %30 = math.rsqrt %29 : vector<64x1xf32>
    %31 = vector.broadcast %30 : vector<64x1xf32> to vector<64x32xf32>
    %32 = arith.mulf %27, %31 : vector<64x32xf32>
    %33 = vector.broadcast %12 : vector<1x32xf32> to vector<64x32xf32>
    %34 = arith.mulf %32, %33 : vector<64x32xf32>
    %35 = vector.broadcast %14 : vector<1x32xf32> to vector<64x32xf32>
    %36 = arith.addf %34, %35 : vector<64x32xf32>
    %cst_22 = arith.constant 0.000000e+00 : f32
    %37 = vector.broadcast %cst_22 : f32 to vector<64x32xf32>
    %38 = arith.maximumf %36, %37 : vector<64x32xf32>
    %c1 = arith.constant 1 : index
    %c0_23 = arith.constant 0 : index
    %c0_24 = arith.constant 0 : index
    %39 = vector.load %arg3[%c1, %c0_23, %c0_24] : memref<2x32x32xf32, #tpu.memory_space<vmem>>, vector<1x32x32xf32>
    %40 = vector.shape_cast %39 : vector<1x32x32xf32> to vector<32x32xf32>
    %cst_25 = arith.constant dense<0.000000e+00> : vector<64x32xf32>
    %41 = tpu.matmul %3, %40, %cst_25 {dimension_numbers = #tpu.dot_dimension_numbers<[1], [0], [0], [1], [0, 0, 1, 1], [], []>} : vector<64x32xf32>, vector<32x32xf32>, vector<64x32xf32> -> vector<64x32xf32>
    %c1_26 = arith.constant 1 : index
    %c0_27 = arith.constant 0 : index
    %c0_28 = arith.constant 0 : index
    %42 = vector.load %arg4[%c1_26, %c0_27, %c0_28] : memref<2x1x32xf32, #tpu.memory_space<vmem>>, vector<1x1x32xf32>
    %43 = vector.shape_cast %42 : vector<1x1x32xf32> to vector<1x32xf32>
    %44 = vector.broadcast %43 : vector<1x32xf32> to vector<64x32xf32>
    %45 = arith.addf %41, %44 : vector<64x32xf32>
    %c1_29 = arith.constant 1 : index
    %c0_30 = arith.constant 0 : index
    %c0_31 = arith.constant 0 : index
    %46 = vector.load %arg5[%c1_29, %c0_30, %c0_31] : memref<2x1x32xf32, #tpu.memory_space<vmem>>, vector<1x1x32xf32>
    %47 = vector.shape_cast %46 : vector<1x1x32xf32> to vector<1x32xf32>
    %c1_32 = arith.constant 1 : index
    %c0_33 = arith.constant 0 : index
    %c0_34 = arith.constant 0 : index
    %48 = vector.load %arg6[%c1_32, %c0_33, %c0_34] : memref<2x1x32xf32, #tpu.memory_space<vmem>>, vector<1x1x32xf32>
    %49 = vector.shape_cast %48 : vector<1x1x32xf32> to vector<1x32xf32>
    %cst_35 = arith.constant dense<0.000000e+00> : vector<64xf32>
    %50 = vector.multi_reduction <add>, %45, %cst_35 [1] : vector<64x32xf32> to vector<64xf32>
    %51 = vector.shape_cast %50 : vector<64xf32> to vector<64x1xf32>
    %cst_36 = arith.constant 3.200000e+01 : f32
    %52 = vector.broadcast %cst_36 : f32 to vector<64x1xf32>
    %53 = arith.divf %51, %52 : vector<64x1xf32>
    %54 = vector.broadcast %53 : vector<64x1xf32> to vector<64x32xf32>
    %55 = arith.subf %45, %54 : vector<64x32xf32>
    %56 = arith.mulf %55, %55 : vector<64x32xf32>
    %cst_37 = arith.constant dense<0.000000e+00> : vector<64xf32>
    %57 = vector.multi_reduction <add>, %56, %cst_37 [1] : vector<64x32xf32> to vector<64xf32>
    %58 = vector.shape_cast %57 : vector<64xf32> to vector<64x1xf32>
    %cst_38 = arith.constant 3.200000e+01 : f32
    %59 = vector.broadcast %cst_38 : f32 to vector<64x1xf32>
    %60 = arith.divf %58, %59 : vector<64x1xf32>
    %61 = vector.broadcast %53 : vector<64x1xf32> to vector<64x32xf32>
    %62 = arith.subf %45, %61 : vector<64x32xf32>
    %cst_39 = arith.constant 9.99999974E-6 : f32
    %63 = vector.broadcast %cst_39 : f32 to vector<64x1xf32>
    %64 = arith.addf %60, %63 : vector<64x1xf32>
    %65 = math.rsqrt %64 : vector<64x1xf32>
    %66 = vector.broadcast %65 : vector<64x1xf32> to vector<64x32xf32>
    %67 = arith.mulf %62, %66 : vector<64x32xf32>
    %68 = vector.broadcast %47 : vector<1x32xf32> to vector<64x32xf32>
    %69 = arith.mulf %67, %68 : vector<64x32xf32>
    %70 = vector.broadcast %49 : vector<1x32xf32> to vector<64x32xf32>
    %71 = arith.addf %69, %70 : vector<64x32xf32>
    %cst_40 = arith.constant 0.000000e+00 : f32
    %72 = vector.broadcast %cst_40 : f32 to vector<64x32xf32>
    %73 = arith.maximumf %71, %72 : vector<64x32xf32>
    %c0_41 = arith.constant 0 : index
    %c0_42 = arith.constant 0 : index
    %74 = vector.load %arg7[%c0_41, %c0_42] : memref<32x192xf32, #tpu.memory_space<vmem>>, vector<32x192xf32>
    %cst_43 = arith.constant dense<0.000000e+00> : vector<64x192xf32>
    %75 = tpu.matmul %38, %74, %cst_43 {dimension_numbers = #tpu.dot_dimension_numbers<[1], [0], [0], [1], [0, 0, 1, 1], [], []>} : vector<64x32xf32>, vector<32x192xf32>, vector<64x192xf32> -> vector<64x192xf32>
    %c0_44 = arith.constant 0 : index
    %c0_45 = arith.constant 0 : index
    %76 = vector.load %arg7[%c0_44, %c0_45] : memref<32x192xf32, #tpu.memory_space<vmem>>, vector<32x192xf32>
    %cst_46 = arith.constant dense<0.000000e+00> : vector<64x192xf32>
    %77 = tpu.matmul %73, %76, %cst_46 {dimension_numbers = #tpu.dot_dimension_numbers<[1], [0], [0], [1], [0, 0, 1, 1], [], []>} : vector<64x32xf32>, vector<32x192xf32>, vector<64x192xf32> -> vector<64x192xf32>
    %78 = vector.extract_strided_slice %75 {offsets = [0, 0], sizes = [64, 16], strides = [1, 1]} : vector<64x192xf32> to vector<64x16xf32>
    %79 = vector.extract_strided_slice %77 {offsets = [0, 64], sizes = [64, 16], strides = [1, 1]} : vector<64x192xf32> to vector<64x16xf32>
    %80 = vector.extract_strided_slice %77 {offsets = [0, 128], sizes = [64, 16], strides = [1, 1]} : vector<64x192xf32> to vector<64x16xf32>
    %cst_47 = arith.constant dense<0.000000e+00> : vector<64x64xf32>
    %81 = tpu.matmul %78, %79, %cst_47 {dimension_numbers = #tpu.dot_dimension_numbers<[1], [1], [0], [0], [0, 0, 1, 0], [], []>} : vector<64x16xf32>, vector<64x16xf32>, vector<64x64xf32> -> vector<64x64xf32>
    %cst_48 = arith.constant 2.500000e-01 : f32
    %82 = vector.broadcast %cst_48 : f32 to vector<64x64xf32>
    %83 = arith.mulf %81, %82 : vector<64x64xf32>
    %cst_49 = arith.constant dense<0xFF800000> : vector<64xf32>
    %84 = vector.multi_reduction <maximumf>, %83, %cst_49 [1] : vector<64x64xf32> to vector<64xf32>
    %85 = vector.shape_cast %84 : vector<64xf32> to vector<64x1xf32>
    %86 = vector.broadcast %85 : vector<64x1xf32> to vector<64x64xf32>
    %87 = arith.subf %83, %86 : vector<64x64xf32>
    %88 = math.exp %87 : vector<64x64xf32>
    %cst_50 = arith.constant dense<0.000000e+00> : vector<64xf32>
    %89 = vector.multi_reduction <add>, %88, %cst_50 [1] : vector<64x64xf32> to vector<64xf32>
    %90 = vector.shape_cast %89 : vector<64xf32> to vector<64x1xf32>
    %91 = tpu.reciprocal %90 {approx = true} : vector<64x1xf32> -> vector<64x1xf32>
    %92 = vector.broadcast %91 : vector<64x1xf32> to vector<64x64xf32>
    %93 = arith.mulf %88, %92 : vector<64x64xf32>
    %cst_51 = arith.constant dense<0.000000e+00> : vector<64x16xf32>
    %94 = tpu.matmul %93, %80, %cst_51 {dimension_numbers = #tpu.dot_dimension_numbers<[1], [0], [0], [1], [0, 0, 1, 1], [], []>} : vector<64x64xf32>, vector<64x16xf32>, vector<64x16xf32> -> vector<64x16xf32>
    %c0_52 = arith.constant 0 : index
    %c0_53 = arith.constant 0 : index
    %95 = vector.load %arg8[%c0_52, %c0_53] : memref<64x32xf32, #tpu.memory_space<vmem>>, vector<16x32xf32>
    %cst_54 = arith.constant dense<0.000000e+00> : vector<64x32xf32>
    %96 = tpu.matmul %94, %95, %cst_54 {dimension_numbers = #tpu.dot_dimension_numbers<[1], [0], [0], [1], [0, 0, 1, 1], [], []>} : vector<64x16xf32>, vector<16x32xf32>, vector<64x32xf32> -> vector<64x32xf32>
    %97 = vector.extract_strided_slice %75 {offsets = [0, 16], sizes = [64, 16], strides = [1, 1]} : vector<64x192xf32> to vector<64x16xf32>
    %98 = vector.extract_strided_slice %77 {offsets = [0, 80], sizes = [64, 16], strides = [1, 1]} : vector<64x192xf32> to vector<64x16xf32>
    %99 = vector.extract_strided_slice %77 {offsets = [0, 144], sizes = [64, 16], strides = [1, 1]} : vector<64x192xf32> to vector<64x16xf32>
    %cst_55 = arith.constant dense<0.000000e+00> : vector<64x64xf32>
    %100 = tpu.matmul %97, %98, %cst_55 {dimension_numbers = #tpu.dot_dimension_numbers<[1], [1], [0], [0], [0, 0, 1, 0], [], []>} : vector<64x16xf32>, vector<64x16xf32>, vector<64x64xf32> -> vector<64x64xf32>
    %cst_56 = arith.constant 2.500000e-01 : f32
    %101 = vector.broadcast %cst_56 : f32 to vector<64x64xf32>
    %102 = arith.mulf %100, %101 : vector<64x64xf32>
    %cst_57 = arith.constant dense<0xFF800000> : vector<64xf32>
    %103 = vector.multi_reduction <maximumf>, %102, %cst_57 [1] : vector<64x64xf32> to vector<64xf32>
    %104 = vector.shape_cast %103 : vector<64xf32> to vector<64x1xf32>
    %105 = vector.broadcast %104 : vector<64x1xf32> to vector<64x64xf32>
    %106 = arith.subf %102, %105 : vector<64x64xf32>
    %107 = math.exp %106 : vector<64x64xf32>
    %cst_58 = arith.constant dense<0.000000e+00> : vector<64xf32>
    %108 = vector.multi_reduction <add>, %107, %cst_58 [1] : vector<64x64xf32> to vector<64xf32>
    %109 = vector.shape_cast %108 : vector<64xf32> to vector<64x1xf32>
    %110 = tpu.reciprocal %109 {approx = true} : vector<64x1xf32> -> vector<64x1xf32>
    %111 = vector.broadcast %110 : vector<64x1xf32> to vector<64x64xf32>
    %112 = arith.mulf %107, %111 : vector<64x64xf32>
    %cst_59 = arith.constant dense<0.000000e+00> : vector<64x16xf32>
    %113 = tpu.matmul %112, %99, %cst_59 {dimension_numbers = #tpu.dot_dimension_numbers<[1], [0], [0], [1], [0, 0, 1, 1], [], []>} : vector<64x64xf32>, vector<64x16xf32>, vector<64x16xf32> -> vector<64x16xf32>
    %c16 = arith.constant 16 : index
    %c0_60 = arith.constant 0 : index
    %114 = vector.load %arg8[%c16, %c0_60] : memref<64x32xf32, #tpu.memory_space<vmem>>, vector<16x32xf32>
    %cst_61 = arith.constant dense<0.000000e+00> : vector<64x32xf32>
    %115 = tpu.matmul %113, %114, %cst_61 {dimension_numbers = #tpu.dot_dimension_numbers<[1], [0], [0], [1], [0, 0, 1, 1], [], []>} : vector<64x16xf32>, vector<16x32xf32>, vector<64x32xf32> -> vector<64x32xf32>
    %116 = arith.addf %96, %115 : vector<64x32xf32>
    %117 = vector.extract_strided_slice %75 {offsets = [0, 32], sizes = [64, 16], strides = [1, 1]} : vector<64x192xf32> to vector<64x16xf32>
    %118 = vector.extract_strided_slice %77 {offsets = [0, 96], sizes = [64, 16], strides = [1, 1]} : vector<64x192xf32> to vector<64x16xf32>
    %119 = vector.extract_strided_slice %77 {offsets = [0, 160], sizes = [64, 16], strides = [1, 1]} : vector<64x192xf32> to vector<64x16xf32>
    %cst_62 = arith.constant dense<0.000000e+00> : vector<64x64xf32>
    %120 = tpu.matmul %117, %118, %cst_62 {dimension_numbers = #tpu.dot_dimension_numbers<[1], [1], [0], [0], [0, 0, 1, 0], [], []>} : vector<64x16xf32>, vector<64x16xf32>, vector<64x64xf32> -> vector<64x64xf32>
    %cst_63 = arith.constant 2.500000e-01 : f32
    %121 = vector.broadcast %cst_63 : f32 to vector<64x64xf32>
    %122 = arith.mulf %120, %121 : vector<64x64xf32>
    %cst_64 = arith.constant dense<0xFF800000> : vector<64xf32>
    %123 = vector.multi_reduction <maximumf>, %122, %cst_64 [1] : vector<64x64xf32> to vector<64xf32>
    %124 = vector.shape_cast %123 : vector<64xf32> to vector<64x1xf32>
    %125 = vector.broadcast %124 : vector<64x1xf32> to vector<64x64xf32>
    %126 = arith.subf %122, %125 : vector<64x64xf32>
    %127 = math.exp %126 : vector<64x64xf32>
    %cst_65 = arith.constant dense<0.000000e+00> : vector<64xf32>
    %128 = vector.multi_reduction <add>, %127, %cst_65 [1] : vector<64x64xf32> to vector<64xf32>
    %129 = vector.shape_cast %128 : vector<64xf32> to vector<64x1xf32>
    %130 = tpu.reciprocal %129 {approx = true} : vector<64x1xf32> -> vector<64x1xf32>
    %131 = vector.broadcast %130 : vector<64x1xf32> to vector<64x64xf32>
    %132 = arith.mulf %127, %131 : vector<64x64xf32>
    %cst_66 = arith.constant dense<0.000000e+00> : vector<64x16xf32>
    %133 = tpu.matmul %132, %119, %cst_66 {dimension_numbers = #tpu.dot_dimension_numbers<[1], [0], [0], [1], [0, 0, 1, 1], [], []>} : vector<64x64xf32>, vector<64x16xf32>, vector<64x16xf32> -> vector<64x16xf32>
    %c32 = arith.constant 32 : index
    %c0_67 = arith.constant 0 : index
    %134 = vector.load %arg8[%c32, %c0_67] : memref<64x32xf32, #tpu.memory_space<vmem>>, vector<16x32xf32>
    %cst_68 = arith.constant dense<0.000000e+00> : vector<64x32xf32>
    %135 = tpu.matmul %133, %134, %cst_68 {dimension_numbers = #tpu.dot_dimension_numbers<[1], [0], [0], [1], [0, 0, 1, 1], [], []>} : vector<64x16xf32>, vector<16x32xf32>, vector<64x32xf32> -> vector<64x32xf32>
    %136 = arith.addf %116, %135 : vector<64x32xf32>
    %137 = vector.extract_strided_slice %75 {offsets = [0, 48], sizes = [64, 16], strides = [1, 1]} : vector<64x192xf32> to vector<64x16xf32>
    %138 = vector.extract_strided_slice %77 {offsets = [0, 112], sizes = [64, 16], strides = [1, 1]} : vector<64x192xf32> to vector<64x16xf32>
    %139 = vector.extract_strided_slice %77 {offsets = [0, 176], sizes = [64, 16], strides = [1, 1]} : vector<64x192xf32> to vector<64x16xf32>
    %cst_69 = arith.constant dense<0.000000e+00> : vector<64x64xf32>
    %140 = tpu.matmul %137, %138, %cst_69 {dimension_numbers = #tpu.dot_dimension_numbers<[1], [1], [0], [0], [0, 0, 1, 0], [], []>} : vector<64x16xf32>, vector<64x16xf32>, vector<64x64xf32> -> vector<64x64xf32>
    %cst_70 = arith.constant 2.500000e-01 : f32
    %141 = vector.broadcast %cst_70 : f32 to vector<64x64xf32>
    %142 = arith.mulf %140, %141 : vector<64x64xf32>
    %cst_71 = arith.constant dense<0xFF800000> : vector<64xf32>
    %143 = vector.multi_reduction <maximumf>, %142, %cst_71 [1] : vector<64x64xf32> to vector<64xf32>
    %144 = vector.shape_cast %143 : vector<64xf32> to vector<64x1xf32>
    %145 = vector.broadcast %144 : vector<64x1xf32> to vector<64x64xf32>
    %146 = arith.subf %142, %145 : vector<64x64xf32>
    %147 = math.exp %146 : vector<64x64xf32>
    %cst_72 = arith.constant dense<0.000000e+00> : vector<64xf32>
    %148 = vector.multi_reduction <add>, %147, %cst_72 [1] : vector<64x64xf32> to vector<64xf32>
    %149 = vector.shape_cast %148 : vector<64xf32> to vector<64x1xf32>
    %150 = tpu.reciprocal %149 {approx = true} : vector<64x1xf32> -> vector<64x1xf32>
    %151 = vector.broadcast %150 : vector<64x1xf32> to vector<64x64xf32>
    %152 = arith.mulf %147, %151 : vector<64x64xf32>
    %cst_73 = arith.constant dense<0.000000e+00> : vector<64x16xf32>
    %153 = tpu.matmul %152, %139, %cst_73 {dimension_numbers = #tpu.dot_dimension_numbers<[1], [0], [0], [1], [0, 0, 1, 1], [], []>} : vector<64x64xf32>, vector<64x16xf32>, vector<64x16xf32> -> vector<64x16xf32>
    %c48 = arith.constant 48 : index
    %c0_74 = arith.constant 0 : index
    %154 = vector.load %arg8[%c48, %c0_74] : memref<64x32xf32, #tpu.memory_space<vmem>>, vector<16x32xf32>
    %cst_75 = arith.constant dense<0.000000e+00> : vector<64x32xf32>
    %155 = tpu.matmul %153, %154, %cst_75 {dimension_numbers = #tpu.dot_dimension_numbers<[1], [0], [0], [1], [0, 0, 1, 1], [], []>} : vector<64x16xf32>, vector<16x32xf32>, vector<64x32xf32> -> vector<64x32xf32>
    %156 = arith.addf %136, %155 : vector<64x32xf32>
    %c0_76 = arith.constant 0 : index
    %c0_77 = arith.constant 0 : index
    %157 = vector.load %arg9[%c0_76, %c0_77] : memref<1x32xf32, #tpu.memory_space<vmem>>, vector<1x32xf32>
    %158 = vector.broadcast %157 : vector<1x32xf32> to vector<64x32xf32>
    %159 = arith.addf %156, %158 : vector<64x32xf32>
    %160 = vector.extract_strided_slice %77 {offsets = [0, 0], sizes = [64, 16], strides = [1, 1]} : vector<64x192xf32> to vector<64x16xf32>
    %161 = vector.extract_strided_slice %75 {offsets = [0, 64], sizes = [64, 16], strides = [1, 1]} : vector<64x192xf32> to vector<64x16xf32>
    %162 = vector.extract_strided_slice %75 {offsets = [0, 128], sizes = [64, 16], strides = [1, 1]} : vector<64x192xf32> to vector<64x16xf32>
    %cst_78 = arith.constant dense<0.000000e+00> : vector<64x64xf32>
    %163 = tpu.matmul %160, %161, %cst_78 {dimension_numbers = #tpu.dot_dimension_numbers<[1], [1], [0], [0], [0, 0, 1, 0], [], []>} : vector<64x16xf32>, vector<64x16xf32>, vector<64x64xf32> -> vector<64x64xf32>
    %cst_79 = arith.constant 2.500000e-01 : f32
    %164 = vector.broadcast %cst_79 : f32 to vector<64x64xf32>
    %165 = arith.mulf %163, %164 : vector<64x64xf32>
    %cst_80 = arith.constant dense<0xFF800000> : vector<64xf32>
    %166 = vector.multi_reduction <maximumf>, %165, %cst_80 [1] : vector<64x64xf32> to vector<64xf32>
    %167 = vector.shape_cast %166 : vector<64xf32> to vector<64x1xf32>
    %168 = vector.broadcast %167 : vector<64x1xf32> to vector<64x64xf32>
    %169 = arith.subf %165, %168 : vector<64x64xf32>
    %170 = math.exp %169 : vector<64x64xf32>
    %cst_81 = arith.constant dense<0.000000e+00> : vector<64xf32>
    %171 = vector.multi_reduction <add>, %170, %cst_81 [1] : vector<64x64xf32> to vector<64xf32>
    %172 = vector.shape_cast %171 : vector<64xf32> to vector<64x1xf32>
    %173 = tpu.reciprocal %172 {approx = true} : vector<64x1xf32> -> vector<64x1xf32>
    %174 = vector.broadcast %173 : vector<64x1xf32> to vector<64x64xf32>
    %175 = arith.mulf %170, %174 : vector<64x64xf32>
    %cst_82 = arith.constant dense<0.000000e+00> : vector<64x16xf32>
    %176 = tpu.matmul %175, %162, %cst_82 {dimension_numbers = #tpu.dot_dimension_numbers<[1], [0], [0], [1], [0, 0, 1, 1], [], []>} : vector<64x64xf32>, vector<64x16xf32>, vector<64x16xf32> -> vector<64x16xf32>
    %c0_83 = arith.constant 0 : index
    %c0_84 = arith.constant 0 : index
    %177 = vector.load %arg8[%c0_83, %c0_84] : memref<64x32xf32, #tpu.memory_space<vmem>>, vector<16x32xf32>
    %cst_85 = arith.constant dense<0.000000e+00> : vector<64x32xf32>
    %178 = tpu.matmul %176, %177, %cst_85 {dimension_numbers = #tpu.dot_dimension_numbers<[1], [0], [0], [1], [0, 0, 1, 1], [], []>} : vector<64x16xf32>, vector<16x32xf32>, vector<64x32xf32> -> vector<64x32xf32>
    %179 = vector.extract_strided_slice %77 {offsets = [0, 16], sizes = [64, 16], strides = [1, 1]} : vector<64x192xf32> to vector<64x16xf32>
    %180 = vector.extract_strided_slice %75 {offsets = [0, 80], sizes = [64, 16], strides = [1, 1]} : vector<64x192xf32> to vector<64x16xf32>
    %181 = vector.extract_strided_slice %75 {offsets = [0, 144], sizes = [64, 16], strides = [1, 1]} : vector<64x192xf32> to vector<64x16xf32>
    %cst_86 = arith.constant dense<0.000000e+00> : vector<64x64xf32>
    %182 = tpu.matmul %179, %180, %cst_86 {dimension_numbers = #tpu.dot_dimension_numbers<[1], [1], [0], [0], [0, 0, 1, 0], [], []>} : vector<64x16xf32>, vector<64x16xf32>, vector<64x64xf32> -> vector<64x64xf32>
    %cst_87 = arith.constant 2.500000e-01 : f32
    %183 = vector.broadcast %cst_87 : f32 to vector<64x64xf32>
    %184 = arith.mulf %182, %183 : vector<64x64xf32>
    %cst_88 = arith.constant dense<0xFF800000> : vector<64xf32>
    %185 = vector.multi_reduction <maximumf>, %184, %cst_88 [1] : vector<64x64xf32> to vector<64xf32>
    %186 = vector.shape_cast %185 : vector<64xf32> to vector<64x1xf32>
    %187 = vector.broadcast %186 : vector<64x1xf32> to vector<64x64xf32>
    %188 = arith.subf %184, %187 : vector<64x64xf32>
    %189 = math.exp %188 : vector<64x64xf32>
    %cst_89 = arith.constant dense<0.000000e+00> : vector<64xf32>
    %190 = vector.multi_reduction <add>, %189, %cst_89 [1] : vector<64x64xf32> to vector<64xf32>
    %191 = vector.shape_cast %190 : vector<64xf32> to vector<64x1xf32>
    %192 = tpu.reciprocal %191 {approx = true} : vector<64x1xf32> -> vector<64x1xf32>
    %193 = vector.broadcast %192 : vector<64x1xf32> to vector<64x64xf32>
    %194 = arith.mulf %189, %193 : vector<64x64xf32>
    %cst_90 = arith.constant dense<0.000000e+00> : vector<64x16xf32>
    %195 = tpu.matmul %194, %181, %cst_90 {dimension_numbers = #tpu.dot_dimension_numbers<[1], [0], [0], [1], [0, 0, 1, 1], [], []>} : vector<64x64xf32>, vector<64x16xf32>, vector<64x16xf32> -> vector<64x16xf32>
    %c16_91 = arith.constant 16 : index
    %c0_92 = arith.constant 0 : index
    %196 = vector.load %arg8[%c16_91, %c0_92] : memref<64x32xf32, #tpu.memory_space<vmem>>, vector<16x32xf32>
    %cst_93 = arith.constant dense<0.000000e+00> : vector<64x32xf32>
    %197 = tpu.matmul %195, %196, %cst_93 {dimension_numbers = #tpu.dot_dimension_numbers<[1], [0], [0], [1], [0, 0, 1, 1], [], []>} : vector<64x16xf32>, vector<16x32xf32>, vector<64x32xf32> -> vector<64x32xf32>
    %198 = arith.addf %178, %197 : vector<64x32xf32>
    %199 = vector.extract_strided_slice %77 {offsets = [0, 32], sizes = [64, 16], strides = [1, 1]} : vector<64x192xf32> to vector<64x16xf32>
    %200 = vector.extract_strided_slice %75 {offsets = [0, 96], sizes = [64, 16], strides = [1, 1]} : vector<64x192xf32> to vector<64x16xf32>
    %201 = vector.extract_strided_slice %75 {offsets = [0, 160], sizes = [64, 16], strides = [1, 1]} : vector<64x192xf32> to vector<64x16xf32>
    %cst_94 = arith.constant dense<0.000000e+00> : vector<64x64xf32>
    %202 = tpu.matmul %199, %200, %cst_94 {dimension_numbers = #tpu.dot_dimension_numbers<[1], [1], [0], [0], [0, 0, 1, 0], [], []>} : vector<64x16xf32>, vector<64x16xf32>, vector<64x64xf32> -> vector<64x64xf32>
    %cst_95 = arith.constant 2.500000e-01 : f32
    %203 = vector.broadcast %cst_95 : f32 to vector<64x64xf32>
    %204 = arith.mulf %202, %203 : vector<64x64xf32>
    %cst_96 = arith.constant dense<0xFF800000> : vector<64xf32>
    %205 = vector.multi_reduction <maximumf>, %204, %cst_96 [1] : vector<64x64xf32> to vector<64xf32>
    %206 = vector.shape_cast %205 : vector<64xf32> to vector<64x1xf32>
    %207 = vector.broadcast %206 : vector<64x1xf32> to vector<64x64xf32>
    %208 = arith.subf %204, %207 : vector<64x64xf32>
    %209 = math.exp %208 : vector<64x64xf32>
    %cst_97 = arith.constant dense<0.000000e+00> : vector<64xf32>
    %210 = vector.multi_reduction <add>, %209, %cst_97 [1] : vector<64x64xf32> to vector<64xf32>
    %211 = vector.shape_cast %210 : vector<64xf32> to vector<64x1xf32>
    %212 = tpu.reciprocal %211 {approx = true} : vector<64x1xf32> -> vector<64x1xf32>
    %213 = vector.broadcast %212 : vector<64x1xf32> to vector<64x64xf32>
    %214 = arith.mulf %209, %213 : vector<64x64xf32>
    %cst_98 = arith.constant dense<0.000000e+00> : vector<64x16xf32>
    %215 = tpu.matmul %214, %201, %cst_98 {dimension_numbers = #tpu.dot_dimension_numbers<[1], [0], [0], [1], [0, 0, 1, 1], [], []>} : vector<64x64xf32>, vector<64x16xf32>, vector<64x16xf32> -> vector<64x16xf32>
    %c32_99 = arith.constant 32 : index
    %c0_100 = arith.constant 0 : index
    %216 = vector.load %arg8[%c32_99, %c0_100] : memref<64x32xf32, #tpu.memory_space<vmem>>, vector<16x32xf32>
    %cst_101 = arith.constant dense<0.000000e+00> : vector<64x32xf32>
    %217 = tpu.matmul %215, %216, %cst_101 {dimension_numbers = #tpu.dot_dimension_numbers<[1], [0], [0], [1], [0, 0, 1, 1], [], []>} : vector<64x16xf32>, vector<16x32xf32>, vector<64x32xf32> -> vector<64x32xf32>
    %218 = arith.addf %198, %217 : vector<64x32xf32>
    %219 = vector.extract_strided_slice %77 {offsets = [0, 48], sizes = [64, 16], strides = [1, 1]} : vector<64x192xf32> to vector<64x16xf32>
    %220 = vector.extract_strided_slice %75 {offsets = [0, 112], sizes = [64, 16], strides = [1, 1]} : vector<64x192xf32> to vector<64x16xf32>
    %221 = vector.extract_strided_slice %75 {offsets = [0, 176], sizes = [64, 16], strides = [1, 1]} : vector<64x192xf32> to vector<64x16xf32>
    %cst_102 = arith.constant dense<0.000000e+00> : vector<64x64xf32>
    %222 = tpu.matmul %219, %220, %cst_102 {dimension_numbers = #tpu.dot_dimension_numbers<[1], [1], [0], [0], [0, 0, 1, 0], [], []>} : vector<64x16xf32>, vector<64x16xf32>, vector<64x64xf32> -> vector<64x64xf32>
    %cst_103 = arith.constant 2.500000e-01 : f32
    %223 = vector.broadcast %cst_103 : f32 to vector<64x64xf32>
    %224 = arith.mulf %222, %223 : vector<64x64xf32>
    %cst_104 = arith.constant dense<0xFF800000> : vector<64xf32>
    %225 = vector.multi_reduction <maximumf>, %224, %cst_104 [1] : vector<64x64xf32> to vector<64xf32>
    %226 = vector.shape_cast %225 : vector<64xf32> to vector<64x1xf32>
    %227 = vector.broadcast %226 : vector<64x1xf32> to vector<64x64xf32>
    %228 = arith.subf %224, %227 : vector<64x64xf32>
    %229 = math.exp %228 : vector<64x64xf32>
    %cst_105 = arith.constant dense<0.000000e+00> : vector<64xf32>
    %230 = vector.multi_reduction <add>, %229, %cst_105 [1] : vector<64x64xf32> to vector<64xf32>
    %231 = vector.shape_cast %230 : vector<64xf32> to vector<64x1xf32>
    %232 = tpu.reciprocal %231 {approx = true} : vector<64x1xf32> -> vector<64x1xf32>
    %233 = vector.broadcast %232 : vector<64x1xf32> to vector<64x64xf32>
    %234 = arith.mulf %229, %233 : vector<64x64xf32>
    %cst_106 = arith.constant dense<0.000000e+00> : vector<64x16xf32>
    %235 = tpu.matmul %234, %221, %cst_106 {dimension_numbers = #tpu.dot_dimension_numbers<[1], [0], [0], [1], [0, 0, 1, 1], [], []>} : vector<64x64xf32>, vector<64x16xf32>, vector<64x16xf32> -> vector<64x16xf32>
    %c48_107 = arith.constant 48 : index
    %c0_108 = arith.constant 0 : index
    %236 = vector.load %arg8[%c48_107, %c0_108] : memref<64x32xf32, #tpu.memory_space<vmem>>, vector<16x32xf32>
    %cst_109 = arith.constant dense<0.000000e+00> : vector<64x32xf32>
    %237 = tpu.matmul %235, %236, %cst_109 {dimension_numbers = #tpu.dot_dimension_numbers<[1], [0], [0], [1], [0, 0, 1, 1], [], []>} : vector<64x16xf32>, vector<16x32xf32>, vector<64x32xf32> -> vector<64x32xf32>
    %238 = arith.addf %218, %237 : vector<64x32xf32>
    %c0_110 = arith.constant 0 : index
    %c0_111 = arith.constant 0 : index
    %239 = vector.load %arg9[%c0_110, %c0_111] : memref<1x32xf32, #tpu.memory_space<vmem>>, vector<1x32xf32>
    %240 = vector.broadcast %239 : vector<1x32xf32> to vector<64x32xf32>
    %241 = arith.addf %238, %240 : vector<64x32xf32>
    %c0_112 = arith.constant 0 : index
    %c0_113 = arith.constant 0 : index
    %242 = vector.load %arg10[%c0_112, %c0_113] : memref<32x32xf32, #tpu.memory_space<vmem>>, vector<32x32xf32>
    %cst_114 = arith.constant dense<0.000000e+00> : vector<64x32xf32>
    %243 = tpu.matmul %38, %242, %cst_114 {dimension_numbers = #tpu.dot_dimension_numbers<[1], [0], [0], [1], [0, 0, 1, 1], [], []>} : vector<64x32xf32>, vector<32x32xf32>, vector<64x32xf32> -> vector<64x32xf32>
    %c0_115 = arith.constant 0 : index
    %c0_116 = arith.constant 0 : index
    %244 = vector.load %arg11[%c0_115, %c0_116] : memref<1x32xf32, #tpu.memory_space<vmem>>, vector<1x32xf32>
    %245 = vector.broadcast %244 : vector<1x32xf32> to vector<64x32xf32>
    %246 = arith.addf %243, %245 : vector<64x32xf32>
    %c0_117 = arith.constant 0 : index
    %c0_118 = arith.constant 0 : index
    %247 = vector.load %arg12[%c0_117, %c0_118] : memref<1x32xf32, #tpu.memory_space<vmem>>, vector<1x32xf32>
    %c0_119 = arith.constant 0 : index
    %c0_120 = arith.constant 0 : index
    %248 = vector.load %arg13[%c0_119, %c0_120] : memref<1x32xf32, #tpu.memory_space<vmem>>, vector<1x32xf32>
    %cst_121 = arith.constant dense<0.000000e+00> : vector<64xf32>
    %249 = vector.multi_reduction <add>, %246, %cst_121 [1] : vector<64x32xf32> to vector<64xf32>
    %250 = vector.shape_cast %249 : vector<64xf32> to vector<64x1xf32>
    %cst_122 = arith.constant 3.200000e+01 : f32
    %251 = vector.broadcast %cst_122 : f32 to vector<64x1xf32>
    %252 = arith.divf %250, %251 : vector<64x1xf32>
    %253 = vector.broadcast %252 : vector<64x1xf32> to vector<64x32xf32>
    %254 = arith.subf %246, %253 : vector<64x32xf32>
    %255 = arith.mulf %254, %254 : vector<64x32xf32>
    %cst_123 = arith.constant dense<0.000000e+00> : vector<64xf32>
    %256 = vector.multi_reduction <add>, %255, %cst_123 [1] : vector<64x32xf32> to vector<64xf32>
    %257 = vector.shape_cast %256 : vector<64xf32> to vector<64x1xf32>
    %cst_124 = arith.constant 3.200000e+01 : f32
    %258 = vector.broadcast %cst_124 : f32 to vector<64x1xf32>
    %259 = arith.divf %257, %258 : vector<64x1xf32>
    %260 = vector.broadcast %252 : vector<64x1xf32> to vector<64x32xf32>
    %261 = arith.subf %246, %260 : vector<64x32xf32>
    %cst_125 = arith.constant 9.99999974E-6 : f32
    %262 = vector.broadcast %cst_125 : f32 to vector<64x1xf32>
    %263 = arith.addf %259, %262 : vector<64x1xf32>
    %264 = math.rsqrt %263 : vector<64x1xf32>
    %265 = vector.broadcast %264 : vector<64x1xf32> to vector<64x32xf32>
    %266 = arith.mulf %261, %265 : vector<64x32xf32>
    %267 = vector.broadcast %247 : vector<1x32xf32> to vector<64x32xf32>
    %268 = arith.mulf %266, %267 : vector<64x32xf32>
    %269 = vector.broadcast %248 : vector<1x32xf32> to vector<64x32xf32>
    %270 = arith.addf %268, %269 : vector<64x32xf32>
    %cst_126 = arith.constant 0.000000e+00 : f32
    %271 = vector.broadcast %cst_126 : f32 to vector<64x32xf32>
    %272 = arith.maximumf %270, %271 : vector<64x32xf32>
    %c0_127 = arith.constant 0 : index
    %c0_128 = arith.constant 0 : index
    %273 = vector.load %arg14[%c0_127, %c0_128] : memref<32x32xf32, #tpu.memory_space<vmem>>, vector<32x32xf32>
    %cst_129 = arith.constant dense<0.000000e+00> : vector<64x32xf32>
    %274 = tpu.matmul %272, %273, %cst_129 {dimension_numbers = #tpu.dot_dimension_numbers<[1], [0], [0], [1], [0, 0, 1, 1], [], []>} : vector<64x32xf32>, vector<32x32xf32>, vector<64x32xf32> -> vector<64x32xf32>
    %c0_130 = arith.constant 0 : index
    %c0_131 = arith.constant 0 : index
    %275 = vector.load %arg15[%c0_130, %c0_131] : memref<1x32xf32, #tpu.memory_space<vmem>>, vector<1x32xf32>
    %276 = vector.broadcast %275 : vector<1x32xf32> to vector<64x32xf32>
    %277 = arith.addf %274, %276 : vector<64x32xf32>
    %c0_132 = arith.constant 0 : index
    %c0_133 = arith.constant 0 : index
    %278 = vector.load %arg10[%c0_132, %c0_133] : memref<32x32xf32, #tpu.memory_space<vmem>>, vector<32x32xf32>
    %cst_134 = arith.constant dense<0.000000e+00> : vector<64x32xf32>
    %279 = tpu.matmul %73, %278, %cst_134 {dimension_numbers = #tpu.dot_dimension_numbers<[1], [0], [0], [1], [0, 0, 1, 1], [], []>} : vector<64x32xf32>, vector<32x32xf32>, vector<64x32xf32> -> vector<64x32xf32>
    %c0_135 = arith.constant 0 : index
    %c0_136 = arith.constant 0 : index
    %280 = vector.load %arg11[%c0_135, %c0_136] : memref<1x32xf32, #tpu.memory_space<vmem>>, vector<1x32xf32>
    %281 = vector.broadcast %280 : vector<1x32xf32> to vector<64x32xf32>
    %282 = arith.addf %279, %281 : vector<64x32xf32>
    %c0_137 = arith.constant 0 : index
    %c0_138 = arith.constant 0 : index
    %283 = vector.load %arg12[%c0_137, %c0_138] : memref<1x32xf32, #tpu.memory_space<vmem>>, vector<1x32xf32>
    %c0_139 = arith.constant 0 : index
    %c0_140 = arith.constant 0 : index
    %284 = vector.load %arg13[%c0_139, %c0_140] : memref<1x32xf32, #tpu.memory_space<vmem>>, vector<1x32xf32>
    %cst_141 = arith.constant dense<0.000000e+00> : vector<64xf32>
    %285 = vector.multi_reduction <add>, %282, %cst_141 [1] : vector<64x32xf32> to vector<64xf32>
    %286 = vector.shape_cast %285 : vector<64xf32> to vector<64x1xf32>
    %cst_142 = arith.constant 3.200000e+01 : f32
    %287 = vector.broadcast %cst_142 : f32 to vector<64x1xf32>
    %288 = arith.divf %286, %287 : vector<64x1xf32>
    %289 = vector.broadcast %288 : vector<64x1xf32> to vector<64x32xf32>
    %290 = arith.subf %282, %289 : vector<64x32xf32>
    %291 = arith.mulf %290, %290 : vector<64x32xf32>
    %cst_143 = arith.constant dense<0.000000e+00> : vector<64xf32>
    %292 = vector.multi_reduction <add>, %291, %cst_143 [1] : vector<64x32xf32> to vector<64xf32>
    %293 = vector.shape_cast %292 : vector<64xf32> to vector<64x1xf32>
    %cst_144 = arith.constant 3.200000e+01 : f32
    %294 = vector.broadcast %cst_144 : f32 to vector<64x1xf32>
    %295 = arith.divf %293, %294 : vector<64x1xf32>
    %296 = vector.broadcast %288 : vector<64x1xf32> to vector<64x32xf32>
    %297 = arith.subf %282, %296 : vector<64x32xf32>
    %cst_145 = arith.constant 9.99999974E-6 : f32
    %298 = vector.broadcast %cst_145 : f32 to vector<64x1xf32>
    %299 = arith.addf %295, %298 : vector<64x1xf32>
    %300 = math.rsqrt %299 : vector<64x1xf32>
    %301 = vector.broadcast %300 : vector<64x1xf32> to vector<64x32xf32>
    %302 = arith.mulf %297, %301 : vector<64x32xf32>
    %303 = vector.broadcast %283 : vector<1x32xf32> to vector<64x32xf32>
    %304 = arith.mulf %302, %303 : vector<64x32xf32>
    %305 = vector.broadcast %284 : vector<1x32xf32> to vector<64x32xf32>
    %306 = arith.addf %304, %305 : vector<64x32xf32>
    %cst_146 = arith.constant 0.000000e+00 : f32
    %307 = vector.broadcast %cst_146 : f32 to vector<64x32xf32>
    %308 = arith.maximumf %306, %307 : vector<64x32xf32>
    %c0_147 = arith.constant 0 : index
    %c0_148 = arith.constant 0 : index
    %309 = vector.load %arg14[%c0_147, %c0_148] : memref<32x32xf32, #tpu.memory_space<vmem>>, vector<32x32xf32>
    %cst_149 = arith.constant dense<0.000000e+00> : vector<64x32xf32>
    %310 = tpu.matmul %308, %309, %cst_149 {dimension_numbers = #tpu.dot_dimension_numbers<[1], [0], [0], [1], [0, 0, 1, 1], [], []>} : vector<64x32xf32>, vector<32x32xf32>, vector<64x32xf32> -> vector<64x32xf32>
    %c0_150 = arith.constant 0 : index
    %c0_151 = arith.constant 0 : index
    %311 = vector.load %arg15[%c0_150, %c0_151] : memref<1x32xf32, #tpu.memory_space<vmem>>, vector<1x32xf32>
    %312 = vector.broadcast %311 : vector<1x32xf32> to vector<64x32xf32>
    %313 = arith.addf %310, %312 : vector<64x32xf32>
    %314 = arith.addf %159, %313 : vector<64x32xf32>
    %315 = arith.addf %241, %277 : vector<64x32xf32>
    %c0_152 = arith.constant 0 : index
    %c0_153 = arith.constant 0 : index
    %c0_154 = arith.constant 0 : index
    %316 = vector.load %arg16[%c0_152, %c0_153, %c0_154] : memref<2x32x32xf32, #tpu.memory_space<vmem>>, vector<1x32x32xf32>
    %317 = vector.shape_cast %316 : vector<1x32x32xf32> to vector<32x32xf32>
    %cst_155 = arith.constant dense<0.000000e+00> : vector<64x32xf32>
    %318 = tpu.matmul %314, %317, %cst_155 {dimension_numbers = #tpu.dot_dimension_numbers<[1], [0], [0], [1], [0, 0, 1, 1], [], []>} : vector<64x32xf32>, vector<32x32xf32>, vector<64x32xf32> -> vector<64x32xf32>
    %c1_156 = arith.constant 1 : index
    %c0_157 = arith.constant 0 : index
    %c0_158 = arith.constant 0 : index
    %319 = vector.load %arg16[%c1_156, %c0_157, %c0_158] : memref<2x32x32xf32, #tpu.memory_space<vmem>>, vector<1x32x32xf32>
    %320 = vector.shape_cast %319 : vector<1x32x32xf32> to vector<32x32xf32>
    %cst_159 = arith.constant dense<0.000000e+00> : vector<64x32xf32>
    %321 = tpu.matmul %315, %320, %cst_159 {dimension_numbers = #tpu.dot_dimension_numbers<[1], [0], [0], [1], [0, 0, 1, 1], [], []>} : vector<64x32xf32>, vector<32x32xf32>, vector<64x32xf32> -> vector<64x32xf32>
    %322 = arith.addf %318, %321 : vector<64x32xf32>
    %c0_160 = arith.constant 0 : index
    %c0_161 = arith.constant 0 : index
    %323 = vector.load %arg17[%c0_160, %c0_161] : memref<1x32xf32, #tpu.memory_space<vmem>>, vector<1x32xf32>
    %324 = vector.broadcast %323 : vector<1x32xf32> to vector<64x32xf32>
    %325 = arith.addf %322, %324 : vector<64x32xf32>
    %c0_162 = arith.constant 0 : index
    %c0_163 = arith.constant 0 : index
    %326 = vector.load %arg18[%c0_162, %c0_163] : memref<1x32xf32, #tpu.memory_space<vmem>>, vector<1x32xf32>
    %c0_164 = arith.constant 0 : index
    %c0_165 = arith.constant 0 : index
    %327 = vector.load %arg19[%c0_164, %c0_165] : memref<1x32xf32, #tpu.memory_space<vmem>>, vector<1x32xf32>
    %cst_166 = arith.constant dense<0.000000e+00> : vector<64xf32>
    %328 = vector.multi_reduction <add>, %325, %cst_166 [1] : vector<64x32xf32> to vector<64xf32>
    %329 = vector.shape_cast %328 : vector<64xf32> to vector<64x1xf32>
    %cst_167 = arith.constant 3.200000e+01 : f32
    %330 = vector.broadcast %cst_167 : f32 to vector<64x1xf32>
    %331 = arith.divf %329, %330 : vector<64x1xf32>
    %332 = vector.broadcast %331 : vector<64x1xf32> to vector<64x32xf32>
    %333 = arith.subf %325, %332 : vector<64x32xf32>
    %334 = arith.mulf %333, %333 : vector<64x32xf32>
    %cst_168 = arith.constant dense<0.000000e+00> : vector<64xf32>
    %335 = vector.multi_reduction <add>, %334, %cst_168 [1] : vector<64x32xf32> to vector<64xf32>
    %336 = vector.shape_cast %335 : vector<64xf32> to vector<64x1xf32>
    %cst_169 = arith.constant 3.200000e+01 : f32
    %337 = vector.broadcast %cst_169 : f32 to vector<64x1xf32>
    %338 = arith.divf %336, %337 : vector<64x1xf32>
    %339 = vector.broadcast %331 : vector<64x1xf32> to vector<64x32xf32>
    %340 = arith.subf %325, %339 : vector<64x32xf32>
    %cst_170 = arith.constant 9.99999974E-6 : f32
    %341 = vector.broadcast %cst_170 : f32 to vector<64x1xf32>
    %342 = arith.addf %338, %341 : vector<64x1xf32>
    %343 = math.rsqrt %342 : vector<64x1xf32>
    %344 = vector.broadcast %343 : vector<64x1xf32> to vector<64x32xf32>
    %345 = arith.mulf %340, %344 : vector<64x32xf32>
    %346 = vector.broadcast %326 : vector<1x32xf32> to vector<64x32xf32>
    %347 = arith.mulf %345, %346 : vector<64x32xf32>
    %348 = vector.broadcast %327 : vector<1x32xf32> to vector<64x32xf32>
    %349 = arith.addf %347, %348 : vector<64x32xf32>
    %cst_171 = arith.constant 0.000000e+00 : f32
    %350 = vector.broadcast %cst_171 : f32 to vector<64x32xf32>
    %351 = arith.maximumf %349, %350 : vector<64x32xf32>
    %c0_172 = arith.constant 0 : index
    %c0_173 = arith.constant 0 : index
    %352 = vector.load %arg20[%c0_172, %c0_173] : memref<32x32xf32, #tpu.memory_space<vmem>>, vector<32x32xf32>
    %cst_174 = arith.constant dense<0.000000e+00> : vector<64x32xf32>
    %353 = tpu.matmul %351, %352, %cst_174 {dimension_numbers = #tpu.dot_dimension_numbers<[1], [0], [0], [1], [0, 0, 1, 1], [], []>} : vector<64x32xf32>, vector<32x32xf32>, vector<64x32xf32> -> vector<64x32xf32>
    %c0_175 = arith.constant 0 : index
    %c0_176 = arith.constant 0 : index
    %354 = vector.load %arg21[%c0_175, %c0_176] : memref<1x32xf32, #tpu.memory_space<vmem>>, vector<1x32xf32>
    %355 = vector.broadcast %354 : vector<1x32xf32> to vector<64x32xf32>
    %356 = arith.addf %353, %355 : vector<64x32xf32>
    %c0_177 = arith.constant 0 : index
    %c0_178 = arith.constant 0 : index
    %c0_179 = arith.constant 0 : index
    %357 = vector.load %arg22[%c0_177, %c0_178, %c0_179] : memref<1x64x32xf32, #tpu.memory_space<vmem>>, vector<1x64x32xf32>
    %358 = vector.shape_cast %357 : vector<1x64x32xf32> to vector<64x32xf32>
    %359 = vector.shape_cast %356 : vector<64x32xf32> to vector<1x64x32xf32>
    tpu.vector_store %arg22[%c0_177, %c0_178, %c0_179], %359 {strides = array<i32>} : memref<1x64x32xf32, #tpu.memory_space<vmem>>, vector<1x64x32xf32>,
    return
  }
  func.func @transform_0(%arg0: i32) -> (i32, i32, i32) {
    %c0_i32 = arith.constant 0 : i32
    %c0_i32_0 = arith.constant 0 : i32
    %c0_i32_1 = arith.constant 0 : i32
    return %arg0, %c0_i32, %c0_i32_0 : i32, i32, i32
  }
  func.func @transform_1(%arg0: i32) -> (i32, i32, i32) {
    %c0_i32 = arith.constant 0 : i32
    %c0_i32_0 = arith.constant 0 : i32
    %c0_i32_1 = arith.constant 0 : i32
    return %arg0, %c0_i32, %c0_i32_0 : i32, i32, i32
  }
  func.func @transform_2(%arg0: i32) -> (i32, i32, i32) {
    %c0_i32 = arith.constant 0 : i32
    %c0_i32_0 = arith.constant 0 : i32
    %c0_i32_1 = arith.constant 0 : i32
    %c0_i32_2 = arith.constant 0 : i32
    return %c0_i32, %c0_i32_0, %c0_i32_1 : i32, i32, i32
  }
  func.func @transform_3(%arg0: i32) -> (i32, i32, i32) {
    %c0_i32 = arith.constant 0 : i32
    %c0_i32_0 = arith.constant 0 : i32
    %c0_i32_1 = arith.constant 0 : i32
    %c0_i32_2 = arith.constant 0 : i32
    return %c0_i32, %c0_i32_0, %c0_i32_1 : i32, i32, i32
  }
  func.func @transform_4(%arg0: i32) -> (i32, i32, i32) {
    %c0_i32 = arith.constant 0 : i32
    %c0_i32_0 = arith.constant 0 : i32
    %c0_i32_1 = arith.constant 0 : i32
    %c0_i32_2 = arith.constant 0 : i32
    return %c0_i32, %c0_i32_0, %c0_i32_1 : i32, i32, i32
  }
  func.func @transform_5(%arg0: i32) -> (i32, i32, i32) {
    %c0_i32 = arith.constant 0 : i32
    %c0_i32_0 = arith.constant 0 : i32
    %c0_i32_1 = arith.constant 0 : i32
    %c0_i32_2 = arith.constant 0 : i32
    return %c0_i32, %c0_i32_0, %c0_i32_1 : i32, i32, i32
  }
  func.func @transform_6(%arg0: i32) -> (i32, i32) {
    %c0_i32 = arith.constant 0 : i32
    %c0_i32_0 = arith.constant 0 : i32
    %c0_i32_1 = arith.constant 0 : i32
    return %c0_i32, %c0_i32_0 : i32, i32
  }
  func.func @transform_7(%arg0: i32) -> (i32, i32) {
    %c0_i32 = arith.constant 0 : i32
    %c0_i32_0 = arith.constant 0 : i32
    %c0_i32_1 = arith.constant 0 : i32
    return %c0_i32, %c0_i32_0 : i32, i32
  }
  func.func @transform_8(%arg0: i32) -> (i32, i32) {
    %c0_i32 = arith.constant 0 : i32
    %c0_i32_0 = arith.constant 0 : i32
    %c0_i32_1 = arith.constant 0 : i32
    return %c0_i32, %c0_i32_0 : i32, i32
  }
  func.func @transform_9(%arg0: i32) -> (i32, i32) {
    %c0_i32 = arith.constant 0 : i32
    %c0_i32_0 = arith.constant 0 : i32
    %c0_i32_1 = arith.constant 0 : i32
    return %c0_i32, %c0_i32_0 : i32, i32
  }
  func.func @transform_10(%arg0: i32) -> (i32, i32) {
    %c0_i32 = arith.constant 0 : i32
    %c0_i32_0 = arith.constant 0 : i32
    %c0_i32_1 = arith.constant 0 : i32
    return %c0_i32, %c0_i32_0 : i32, i32
  }
  func.func @transform_11(%arg0: i32) -> (i32, i32) {
    %c0_i32 = arith.constant 0 : i32
    %c0_i32_0 = arith.constant 0 : i32
    %c0_i32_1 = arith.constant 0 : i32
    return %c0_i32, %c0_i32_0 : i32, i32
  }
  func.func @transform_12(%arg0: i32) -> (i32, i32) {
    %c0_i32 = arith.constant 0 : i32
    %c0_i32_0 = arith.constant 0 : i32
    %c0_i32_1 = arith.constant 0 : i32
    return %c0_i32, %c0_i32_0 : i32, i32
  }
  func.func @transform_13(%arg0: i32) -> (i32, i32) {
    %c0_i32 = arith.constant 0 : i32
    %c0_i32_0 = arith.constant 0 : i32
    %c0_i32_1 = arith.constant 0 : i32
    return %c0_i32, %c0_i32_0 : i32, i32
  }
  func.func @transform_14(%arg0: i32) -> (i32, i32) {
    %c0_i32 = arith.constant 0 : i32
    %c0_i32_0 = arith.constant 0 : i32
    %c0_i32_1 = arith.constant 0 : i32
    return %c0_i32, %c0_i32_0 : i32, i32
  }
  func.func @transform_15(%arg0: i32) -> (i32, i32, i32) {
    %c0_i32 = arith.constant 0 : i32
    %c0_i32_0 = arith.constant 0 : i32
    %c0_i32_1 = arith.constant 0 : i32
    %c0_i32_2 = arith.constant 0 : i32
    return %c0_i32, %c0_i32_0, %c0_i32_1 : i32, i32, i32
  }
  func.func @transform_16(%arg0: i32) -> (i32, i32) {
    %c0_i32 = arith.constant 0 : i32
    %c0_i32_0 = arith.constant 0 : i32
    %c0_i32_1 = arith.constant 0 : i32
    return %c0_i32, %c0_i32_0 : i32, i32
  }
  func.func @transform_17(%arg0: i32) -> (i32, i32) {
    %c0_i32 = arith.constant 0 : i32
    %c0_i32_0 = arith.constant 0 : i32
    %c0_i32_1 = arith.constant 0 : i32
    return %c0_i32, %c0_i32_0 : i32, i32
  }
  func.func @transform_18(%arg0: i32) -> (i32, i32) {
    %c0_i32 = arith.constant 0 : i32
    %c0_i32_0 = arith.constant 0 : i32
    %c0_i32_1 = arith.constant 0 : i32
    return %c0_i32, %c0_i32_0 : i32, i32
  }
  func.func @transform_19(%arg0: i32) -> (i32, i32) {
    %c0_i32 = arith.constant 0 : i32
    %c0_i32_0 = arith.constant 0 : i32
    %c0_i32_1 = arith.constant 0 : i32
    return %c0_i32, %c0_i32_0 : i32, i32
  }
  func.func @transform_20(%arg0: i32) -> (i32, i32) {
    %c0_i32 = arith.constant 0 : i32
    %c0_i32_0 = arith.constant 0 : i32
    %c0_i32_1 = arith.constant 0 : i32
    return %c0_i32, %c0_i32_0 : i32, i32
  }
  func.func @transform_21(%arg0: i32) -> (i32, i32, i32) {
    %c0_i32 = arith.constant 0 : i32
    %c0_i32_0 = arith.constant 0 : i32
    %c0_i32_1 = arith.constant 0 : i32
    return %arg0, %c0_i32, %c0_i32_0 : i32, i32, i32
  }
}

</mosaic_0001>

<bundles_post_ra>
// kernel: tpu_custom_call.1
= control target key start
LH: loop header
LB: loop body
LE: loop exit
PB: predicated region body
PF: predicated region fallthrough
CT: control target
= control target key end

     0   :  { %s12571_s0 = inlined_call_operand.vmem [shape: f32[2,64,32], index: 0, kind: input, shape index: {}]   ;;  %s12572_s1 = inlined_call_operand.vmem [shape: f32[2,64,32], index: 1, kind: input, shape index: {}]   ;;  %s12573_s2 = inlined_call_operand.vmem [shape: f32[2,32,32], index: 2, kind: input, shape index: {}]   ;;  %s12574_s3 = inlined_call_operand.vmem [shape: f32[2,1,32], index: 3, kind: input, shape index: {}]   ;;  %s12575_s4 = inlined_call_operand.vmem [shape: f32[2,1,32], index: 4, kind: input, shape index: {}]   ;;  %s12576_s5 = inlined_call_operand.vmem [shape: f32[2,1,32], index: 5, kind: input, shape index: {}]   ;;  %s12577_s6 = inlined_call_operand.vmem [shape: f32[32,192], index: 6, kind: input, shape index: {}]   ;;  %s12578_s7 = inlined_call_operand.vmem [shape: f32[64,32], index: 7, kind: input, shape index: {}]   ;;  %s12579_s8 = inlined_call_operand.vmem [shape: f32[1,32], index: 8, kind: input, shape index: {}]   ;;  %s12580_s9 = inlined_call_operand.vmem [shape: f32[32,32], index: 9, kind: input, shape index: {}]   ;;  %s12581_s10 = inlined_call_operand.vmem [shape: f32[1,32], index: 10, kind: input, shape index: {}]   ;;  %s12582_s11 = inlined_call_operand.vmem [shape: f32[1,32], index: 11, kind: input, shape index: {}]   ;;  %s12583_s12 = inlined_call_operand.vmem [shape: f32[1,32], index: 12, kind: input, shape index: {}]   ;;  %s12584_s13 = inlined_call_operand.vmem [shape: f32[32,32], index: 13, kind: input, shape index: {}]   ;;  %s12585_s14 = inlined_call_operand.vmem [shape: f32[1,32], index: 14, kind: input, shape index: {}]   ;;  %s12586_s15 = inlined_call_operand.vmem [shape: f32[2,32,32], index: 15, kind: input, shape index: {}]   ;;  %s12587_s16 = inlined_call_operand.vmem [shape: f32[1,32], index: 16, kind: input, shape index: {}]   ;;  %s12588_s17 = inlined_call_operand.vmem [shape: f32[1,32], index: 17, kind: input, shape index: {}]   ;;  %s12589_s18 = inlined_call_operand.vmem [shape: f32[1,32], index: 18, kind: input, shape index: {}]   ;;  %s12590_s19 = inlined_call_operand.vmem [shape: f32[32,32], index: 19, kind: input, shape index: {}]   ;;  %s12591_s20 = inlined_call_operand.vmem [shape: f32[1,32], index: 20, kind: input, shape index: {}]   ;;  %s12592_s21 = inlined_call_operand.vmem [shape: f32[2,64,32], index: 21, kind: output, shape index: {}]  }
   0x1   :  { %12650 = sst [smem:[#allocation29_spill]] %s12571_s0 }
   0x2   :  { %12651 = sst [smem:[#allocation30_spill]] %s12572_s1 }
   0x3   :  { %12652 = sst [smem:[#allocation31_spill]] %s12573_s2  ;;  %s10241_s2 = smov 0  }
   0x4   :  { %12653 = sst [smem:[#allocation32_spill]] %s12574_s3 }
   0x5   :  { %12654 = sst [smem:[#allocation33_spill]] %s12575_s4 }
   0x6   :  { %12655 = sst [smem:[#allocation34_spill]] %s12576_s5 }
   0x7 LB: > { %s7353_s25 = sadd.s32 4294967295, %s10121_s2   ;;  %p7357_p0 = scmp.ge.s32.totalorder %s10121_s2, 1  ;;  %s10121_s2 = sphi %s10241_s2, %s31_s2  }
   0x8   : > { %p597_p1 = scmp.lt.s32.totalorder %s10121_s2, 3 }
   0xa   : > { %p598_p2 = pnand %p7357_p0, %p597_p1 }
   0xc   : > { %601 = sbr.rel (%p598_p2) target bundleno = 4156 (0x103c), region = 104 }
  0x13   : > { %s12656_s3 = sld [smem:[#allocation31_spill]]  ;;  %p662_p3 = scmp.lt.s32.totalorder %s7353_s25, 1  ;;  %vm704_vm0 = vcmask 261120   ;;  %vm1569_vm1 = vcmask 130048   ;;  %vm1723_vm3 = vcmask 523264  }
  0x14   : > { %s12657_s5 = sld [smem:[#allocation30_spill]]  ;;  %s12658_s24 = sld [smem:[#allocation29_spill]]  ;;  %vm10829_vm2 = vmpackc.low %vm1569_vm1, %vm1569_vm1 }
  0x15   : > { %s12738_s25 = smov (!%p662_p3, %s7353_s25), 1  ;;  %s12659_s28 = sld [smem:[#allocation32_spill]] }
  0x16   : > { %s10273_s0 = sshll.u32 %s12738_s25, 6  ;;  %s12660_s26 = sld [smem:[#allocation33_spill]] }
  0x17   : > { %s12661_s4 = sld [smem:[#allocation34_spill]]  ;;  %s10124_s1 = smov 64  }
  0x18   : > { %s12645_s27 = smov 32   ;;  %s10128_s29 = smov 96  }
  0x19   : > { %v7375_v0 = vld [vmem:[%s12656_s3 + $0x20] sm:$0xff]  ;;  %v7376_v1 = vld [vmem:[%s12656_s3 + $0x28] sm:$0xff]  ;;  %v7377_v2 = vld [vmem:[%s12656_s3 + $0x30] sm:$0xff]  ;;  %s12643_s30 = smov 16  }
  0x1a   : > { %v8947_v3 = vpack.c.bf16 %v7376_v1, %v7375_v0  ;;  %v7378_v4 = vld [vmem:[%s12656_s3 + $0x38] sm:$0xff]  ;;  %v693_v5 = vld [vmem:[%s12656_s3] sm:$0xff]  ;;  %v694_v6 = vld [vmem:[%s12656_s3 + $0x8] sm:$0xff]  ;;  %s10279_s22 = scalar_lea.vmem %s12657_s5, %s10273_s0  ;;  %s10285_s25 = scalar_lea.vmem %s12658_s24, %s10273_s0 }
  0x1b   : > { %v8951_v7 = vpack.c.bf16 %v7378_v4, %v7377_v2  ;;  %v8939_v8 = vpack.c.bf16 %v694_v6, %v693_v5  ;;  %v695_v9 = vld [vmem:[%s12656_s3 + $0x10] sm:$0xff]  ;;  %v696_v10 = vld [vmem:[%s12656_s3 + $0x18] sm:$0xff]  ;;  %v685_v12 = vld [vmem:[%s10279_s22] sm:$0xff]  ;;  %s10125_s24 = smov 48   ;;  %s12647_s5 = smov 80  }
  0x1c   : > { %8948 = vmatprep.subr.bf16.mxu1 %v8947_v3  ;;  %v8943_v11 = vpack.c.bf16 %v696_v10, %v695_v9  ;;  %8211 = vmatprep.mubr.msk.f32.mxu1 %vm704_vm0, %v685_v12  ;;  %v686_v13 = vld [vmem:[%s10279_s22 + $0x8] sm:$0xff]  ;;  %v677_v14 = vld [vmem:[%s10285_s25] sm:$0xff]  ;;  %v687_v15 = vld [vmem:[%s10279_s22 + $0x10] sm:$0xff] }
  0x1d   : > { %8950 = vmatpush3.bf16.msra.mxu1 %v8947_v3  ;;  %8940 = vmatprep.subr.bf16.mxu0 %v8939_v8  ;;  %v678_v16 = vld [vmem:[%s10285_s25 + $0x8] sm:$0xff]  ;;  %v679_v17 = vld [vmem:[%s10285_s25 + $0x10] sm:$0xff]  ;;  %v688_v18 = vld [vmem:[%s10279_s22 + $0x18] sm:$0xff] }
  0x1e   : > { %8952 = vmatprep.subr.bf16.mxu1 %v8951_v7  ;;  %8942 = vmatpush3.bf16.msra.mxu0 %v8939_v8  ;;  %v689_v19 = vld [vmem:[%s10279_s22 + $0x20] sm:$0xff]  ;;  %v680_v20 = vld [vmem:[%s10285_s25 + $0x18] sm:$0xff]  ;;  %v690_v22 = vld [vmem:[%s10279_s22 + $0x28] sm:$0xff] }
  0x1f   : > { %8944 = vmatprep.subr.bf16.mxu0 %v8943_v11  ;;  %8191 = vmatprep.mubr.msk.f32.mxu0 %vm704_vm0, %v677_v14  ;;  %v681_v21 = vld [vmem:[%s10285_s25 + $0x20] sm:$0xff]  ;;  %v691_v23 = vld [vmem:[%s10279_s22 + $0x30] sm:$0xff]  ;;  %v682_v24 = vld [vmem:[%s10285_s25 + $0x28] sm:$0xff] }
  0x20   : > { %v683_v25 = vld [vmem:[%s10285_s25 + $0x30] sm:$0xff]  ;;  %v692_v26 = vld [vmem:[%s10279_s22 + $0x38] sm:$0xff]  ;;  %v7380_v28 = vld [vmem:[%s12659_s28 + $0x1] ss:$0 sm:$0xff]  ;;  %s12694_s22 = smov 32  }
  0x21   : > { %8954 = vmatpush3.bf16.msra.mxu1 %v8951_v7  ;;  %v684_v27 = vld [vmem:[%s10285_s25 + $0x38] sm:$0xff]  ;;  %v7364_v51 = vld [vmem:[%s12659_s28] ss:$0 sm:$0xff]  ;;  %s10126_s25 = smov 112  }
  0x22   : > { %8946 = vmatpush3.bf16.msra.mxu0 %v8943_v11 }
  0x24   : > { %8212 = vmatmul.mubr.msk.f32.vlgmr.msra.gmra.mrb[0].mxu1 %vm704_vm0, %v686_v13 }
  0x25   : > { %8214 = vmatprep.mubr.msk.f32.mxu1 %vm704_vm0, %v687_v15  ;;  %8192 = vmatmul.mubr.msk.f32.vlgmr.msra.gmra.mrb[0].mxu0 %vm704_vm0, %v678_v16 }
  0x26   : > { %8194 = vmatprep.mubr.msk.f32.mxu0 %vm704_vm0, %v679_v17 }
  0x28   : > { %8215 = vmatmul.mubr.msk.f32.gmra.mrb[2].mxu1 %vm704_vm0, %v688_v18 }
  0x29   : > { %8217 = vmatprep.mubr.msk.f32.mxu1 %vm704_vm0, %v689_v19  ;;  %8195 = vmatmul.mubr.msk.f32.gmra.mrb[2].mxu0 %vm704_vm0, %v680_v20 }
  0x2a   : > { %8197 = vmatprep.mubr.msk.f32.mxu0 %vm704_vm0, %v681_v21 }
  0x2c   : > { %8218 = vmatmul.mubr.msk.f32.gmra.mrb[4].mxu1 %vm704_vm0, %v690_v22 }
  0x2d   : > { %8220 = vmatprep.mubr.msk.f32.mxu1 %vm704_vm0, %v691_v23  ;;  %8198 = vmatmul.mubr.msk.f32.gmra.mrb[4].mxu0 %vm704_vm0, %v682_v24 }
  0x2e   : > { %8200 = vmatprep.mubr.msk.f32.mxu0 %vm704_vm0, %v683_v25 }
  0x30   : > { %8221 = vmatmul.mubr.msk.f32.gmra.mrb[6].mxu1 %vm704_vm0, %v692_v26 }
  0x31   : > { %8201 = vmatmul.mubr.msk.f32.gmra.mrb[6].mxu0 %vm704_vm0, %v684_v27 }
  0xf7   : > { %v8213_v29 = vpop.f32.mrb[0].mxu1 }
  0xf8   : > { %v1080_v30 = vpop.f32.mrb[1].mxu1  ;;  %v8193_v31 = vpop.f32.mrb[0].mxu0  ;;  %v10324_v34 = vadd.f32 %v8213_v29, %v7380_v28 }
  0xf9   : > { %v10322_v32 = vadd.f32 %v7380_v28, %v1080_v30  ;;  %v795_v33 = vpop.f32.mrb[1].mxu0  ;;  %v10351_v62 = vadd.f32 %v8193_v31, %v7364_v51 }
  0xfa   : > { %v1126_v44 = vsel %vm704_vm0, %v10324_v34, 0.0  ;;  %v10347_v59 = vadd.f32 %v7364_v51, %v795_v33 }
  0xfb   : > { %v8216_v35 = vpop.f32.mrb[2].mxu1  ;;  %v1123_v36 = vsel %vm704_vm0, %v10322_v32, 0.0  ;;  %v839_v3 = vsel %vm704_vm0, %v10351_v62, 0.0 }
  0xfc   : > { %v1090_v37 = vpop.f32.mrb[3].mxu1  ;;  %1124 = vadd.xlane.f32.xlu0 %v1123_v36  ;;  %v8196_v38 = vpop.f32.mrb[2].mxu0  ;;  %v10328_v39 = vadd.f32 %v8216_v35, %v7380_v28  ;;  %v836_v1 = vsel %vm704_vm0, %v10347_v59, 0.0 }
  0xfd   : > { %v1091_v40 = vadd.f32 %v7380_v28, %v1090_v37  ;;  %v805_v41 = vpop.f32.mrb[3].mxu0  ;;  %v10359_v2 = vadd.f32 %v8196_v38, %v7364_v51 }
  0xfe   : > { %v1132_v49 = vsel %vm704_vm0, %v10328_v39, 0.0  ;;  %v10355_v0 = vadd.f32 %v7364_v51, %v805_v41 }
  0xff   : > { %v8219_v42 = vpop.f32.mrb[4].mxu1  ;;  %v1129_v43 = vsel %vm704_vm0, %v1091_v40, 0.0  ;;  %v845_v7 = vsel %vm704_vm0, %v10359_v2, 0.0 }
 0x100   : > { %v1100_v45 = vpop.f32.mrb[5].mxu1  ;;  %1130 = vadd.xlane.f32.xlu1 %v1129_v43  ;;  %1127 = vadd.xlane.f32.xlu0 %v1126_v44  ;;  %v8199_v46 = vpop.f32.mrb[4].mxu0  ;;  %v10333_v47 = vadd.f32 %v8219_v42, %v7380_v28  ;;  %v842_v5 = vsel %vm704_vm0, %v10355_v0, 0.0 }
 0x101   : > { %v1101_v48 = vadd.f32 %v7380_v28, %v1100_v45  ;;  %v815_v50 = vpop.f32.mrb[5].mxu0  ;;  %v10367_v6 = vadd.f32 %v8199_v46, %v7364_v51 }
 0x102   : > { %v1138_v58 = vsel %vm704_vm0, %v10333_v47, 0.0  ;;  %v10363_v4 = vadd.f32 %v7364_v51, %v815_v50 }
 0x103   : > { %v8222_v52 = vpop.f32.mrb[6].mxu1  ;;  %v1135_v53 = vsel %vm704_vm0, %v1101_v48, 0.0  ;;  %v851_v11 = vsel %vm704_vm0, %v10367_v6, 0.0 }
 0x104   : > { %v1110_v54 = vpop.f32.mrb[7].mxu1  ;;  %1133 = vadd.xlane.f32.xlu1 %v1132_v49  ;;  %1136 = vadd.xlane.f32.xlu0 %v1135_v53  ;;  %v8202_v55 = vpop.f32.mrb[6].mxu0  ;;  %v10341_v56 = vadd.f32 %v8222_v52, %v7380_v28  ;;  %v848_v9 = vsel %vm704_vm0, %v10363_v4, 0.0 }
 0x105   : > { %v10343_v57 = vadd.f32 %v7380_v28, %v1110_v54  ;;  %v825_v60 = vpop.f32.mrb[7].mxu0  ;;  %v10375_v10 = vadd.f32 %v8202_v55, %v7364_v51 }
 0x106   : > { %v1144_v63 = vsel %vm704_vm0, %v10341_v56, 0.0  ;;  %v10371_v8 = vadd.f32 %v7364_v51, %v825_v60 }
 0x107   : > { %v1141_v61 = vsel %vm704_vm0, %v10343_v57, 0.0  ;;  %v857_v13 = vsel %vm704_vm0, %v10375_v10, 0.0 }
 0x108   : > { %1139 = vadd.xlane.f32.xlu1 %v1138_v58  ;;  %1142 = vadd.xlane.f32.xlu0 %v1141_v61  ;;  %v854_v12 = vsel %vm704_vm0, %v10371_v8, 0.0 }
 0x10c   : > { %1145 = vadd.xlane.f32.xlu1 %v1144_v63  ;;  %837 = vadd.xlane.f32.xlu0 %v836_v1 }
 0x110   : > { %840 = vadd.xlane.f32.xlu1 %v839_v3  ;;  %843 = vadd.xlane.f32.xlu0 %v842_v5 }
 0x114   : > { %846 = vadd.xlane.f32.xlu1 %v845_v7  ;;  %849 = vadd.xlane.f32.xlu0 %v848_v9 }
 0x118   : > { %852 = vadd.xlane.f32.xlu1 %v851_v11  ;;  %855 = vadd.xlane.f32.xlu0 %v854_v12 }
 0x11c   : > { %858 = vadd.xlane.f32.xlu0 %v857_v13 }
 0x189   : > { %v1125_v14 = vpop.xlane.xlu0 %1124 }
 0x18a   : > { %v1147_v15 = vmul.f32 0.03125, %v1125_v14 }
 0x18c   : > { %v10384_v16 = vsub.f32 %v10322_v32, %v1147_v15 }
 0x18d   : > { %v1131_v17 = vpop.xlane.xlu1 %1130  ;;  %v1128_v18 = vpop.xlane.xlu0 %1127 }
 0x18e   : > { %v1149_v19 = vmul.f32 0.03125, %v1131_v17  ;;  %v1148_v20 = vmul.f32 0.03125, %v1128_v18  ;;  %v1163_v21 = vmul.f32 %v10384_v16, %v10384_v16 }
 0x190   : > { %v10388_v22 = vsub.f32 %v1091_v40, %v1149_v19  ;;  %v10391_v23 = vsub.f32 %v10324_v34, %v1148_v20  ;;  %v1171_v24 = vsel %vm704_vm0, %v1163_v21, 0.0 }
 0x191   : > { %v1134_v25 = vpop.xlane.xlu1 %1133  ;;  %v1137_v26 = vpop.xlane.xlu0 %1136  ;;  %1172 = vadd.xlane.f32.xlu1 %v1171_v24 }
 0x192   : > { %v1150_v27 = vmul.f32 0.03125, %v1134_v25  ;;  %v1151_v28 = vmul.f32 0.03125, %v1137_v26  ;;  %v1164_v29 = vmul.f32 %v10391_v23, %v10391_v23  ;;  %v1165_v30 = vmul.f32 %v10388_v22, %v10388_v22 }
 0x194   : > { %v10399_v31 = vsub.f32 %v10328_v39, %v1150_v27  ;;  %v10401_v32 = vsub.f32 %v1101_v48, %v1151_v28  ;;  %v1174_v33 = vsel %vm704_vm0, %v1164_v29, 0.0  ;;  %v1177_v34 = vsel %vm704_vm0, %v1165_v30, 0.0 }
 0x195   : > { %v1140_v35 = vpop.xlane.xlu1 %1139  ;;  %v1143_v36 = vpop.xlane.xlu0 %1142  ;;  %1175 = vadd.xlane.f32.xlu1 %v1174_v33  ;;  %1178 = vadd.xlane.f32.xlu0 %v1177_v34  ;;  %v1264_v34 = vld [vmem:[%s12577_s6 + $0x8] sm:$0xff] }
 0x196   : > { %v1152_v37 = vmul.f32 0.03125, %v1140_v35  ;;  %v1153_v38 = vmul.f32 0.03125, %v1143_v36  ;;  %v1166_v40 = vmul.f32 %v10399_v31, %v10399_v31  ;;  %v1167_v41 = vmul.f32 %v10401_v32, %v10401_v32  ;;  %v1266_v35 = vld [vmem:[%s12577_s6 + $0x18] sm:$0xff] }
 0x197   : > { %v8955_v36 = vpack.c.bf16 %v1266_v35, %v1264_v34 }
 0x198   : > { %v10410_v39 = vsub.f32 %v10333_v47, %v1152_v37  ;;  %v10413_v42 = vsub.f32 %v10343_v57, %v1153_v38  ;;  %v1180_v43 = vsel %vm704_vm0, %v1166_v40, 0.0  ;;  %v1183_v44 = vsel %vm704_vm0, %v1167_v41, 0.0  ;;  %v1265_v37 = vld [vmem:[%s12577_s6 + $0x10] sm:$0xff] }
 0x199   : > { %v1146_v45 = vpop.xlane.xlu1 %1145  ;;  %1181 = vadd.xlane.f32.xlu1 %v1180_v43  ;;  %1184 = vadd.xlane.f32.xlu0 %v1183_v44  ;;  %v838_v46 = vpop.xlane.xlu0 %837  ;;  %v1268_v43 = vld [vmem:[%s12577_s6 + $0x28] sm:$0xff]  ;;  %v1270_v44 = vld [vmem:[%s12577_s6 + $0x38] sm:$0xff] }
 0x19a   : > { %v1154_v48 = vmul.f32 0.03125, %v1146_v45  ;;  %v861_v49 = vmul.f32 0.03125, %v838_v46  ;;  %v1168_v50 = vmul.f32 %v10410_v39, %v10410_v39  ;;  %v1169_v47 = vmul.f32 %v10413_v42, %v10413_v42  ;;  %8964 = vmatprep.subr.bf16.mxu1 %v8955_v36  ;;  %8956 = vmatprep.subr.bf16.mxu0 %v8955_v36  ;;  %v1267_v46 = vld [vmem:[%s12577_s6 + $0x20] sm:$0xff] }
 0x19b   : > { %v8959_v45 = vpack.c.bf16 %v1270_v44, %v1268_v43 }
 0x19c   : > { %v10422_v51 = vsub.f32 %v10341_v56, %v1154_v48  ;;  %v10425_v52 = vsub.f32 %v10347_v59, %v861_v49  ;;  %v1186_v53 = vsel %vm704_vm0, %v1168_v50, 0.0  ;;  %v1189_v54 = vsel %vm704_vm0, %v1169_v47, 0.0  ;;  %v1269_v48 = vld [vmem:[%s12577_s6 + $0x30] sm:$0xff] }
 0x19d   : > { %v841_v55 = vpop.xlane.xlu1 %840  ;;  %1187 = vadd.xlane.f32.xlu1 %v1186_v53  ;;  %1190 = vadd.xlane.f32.xlu0 %v1189_v54  ;;  %v844_v57 = vpop.xlane.xlu0 %843  ;;  %v8961_v49 = vpack.c.bf16 %v1269_v48, %v1267_v46  ;;  %v10123_v50 = vmov 0.0  }
 0x19e   : > { %v862_v58 = vmul.f32 0.03125, %v841_v55  ;;  %v863_v60 = vmul.f32 0.03125, %v844_v57  ;;  %v1170_v61 = vmul.f32 %v10422_v51, %v10422_v51  ;;  %v877_v56 = vmul.f32 %v10425_v52, %v10425_v52  ;;  %1496 = vmatprep.mubr.f32.mxu1 %v10123_v50  ;;  %1359 = vmatprep.mubr.f32.mxu0 %v10123_v50 }
 0x1a0   : > { %v10434_v63 = vsub.f32 %v10351_v62, %v862_v58  ;;  %v10437_v59 = vsub.f32 %v10355_v0, %v863_v60  ;;  %v1192_v1 = vsel %vm704_vm0, %v1170_v61, 0.0  ;;  %v885_v3 = vsel %vm704_vm0, %v877_v56, 0.0 }
 0x1a1   : > { %v847_v5 = vpop.xlane.xlu1 %846  ;;  %1193 = vadd.xlane.f32.xlu1 %v1192_v1  ;;  %886 = vadd.xlane.f32.xlu0 %v885_v3  ;;  %v850_v7 = vpop.xlane.xlu0 %849 }
 0x1a2   : > { %v864_v9 = vmul.f32 0.03125, %v847_v5  ;;  %v865_v11 = vmul.f32 0.03125, %v850_v7  ;;  %v878_v12 = vmul.f32 %v10434_v63, %v10434_v63  ;;  %v879_v62 = vmul.f32 %v10437_v59, %v10437_v59 }
 0x1a4   : > { %v10446_v13 = vsub.f32 %v10359_v2, %v864_v9  ;;  %v10449_v0 = vsub.f32 %v10363_v4, %v865_v11  ;;  %v888_v14 = vsel %vm704_vm0, %v878_v12, 0.0  ;;  %v891_v15 = vsel %vm704_vm0, %v879_v62, 0.0 }
 0x1a5   : > { %889 = vadd.xlane.f32.xlu1 %v888_v14  ;;  %v853_v17 = vpop.xlane.xlu1 %852  ;;  %892 = vadd.xlane.f32.xlu0 %v891_v15  ;;  %v856_v18 = vpop.xlane.xlu0 %855 }
 0x1a6   : > { %v866_v19 = vmul.f32 0.03125, %v853_v17  ;;  %v867_v20 = vmul.f32 0.03125, %v856_v18  ;;  %v880_v21 = vmul.f32 %v10446_v13, %v10446_v13  ;;  %v881_v2 = vmul.f32 %v10449_v0, %v10449_v0  ;;  %v10506_v18 = vld [vmem:[%s12660_s26 + $0x1] ss:$0 sm:$0xff] }
 0x1a8   : > { %v10458_v24 = vsub.f32 %v10367_v6, %v866_v19  ;;  %v10461_v4 = vsub.f32 %v10371_v8, %v867_v20  ;;  %v894_v25 = vsel %vm704_vm0, %v880_v21, 0.0  ;;  %v897_v26 = vsel %vm704_vm0, %v881_v2, 0.0 }
 0x1a9   : > { %895 = vadd.xlane.f32.xlu1 %v894_v25  ;;  %898 = vadd.xlane.f32.xlu0 %v897_v26  ;;  %v859_v27 = vpop.xlane.xlu0 %858  ;;  %v10512_v26 = vld [vmem:[%s12661_s4 + $0x1] ss:$0 sm:$0xff] }
 0x1aa   : > { %v868_v28 = vmul.f32 0.03125, %v859_v27  ;;  %v882_v29 = vmul.f32 %v10458_v24, %v10458_v24  ;;  %v883_v30 = vmul.f32 %v10461_v4, %v10461_v4 }
 0x1ac   : > { %v10470_v6 = vsub.f32 %v10375_v10, %v868_v28  ;;  %v900_v8 = vsel %vm704_vm0, %v882_v29, 0.0  ;;  %v903_v33 = vsel %vm704_vm0, %v883_v30, 0.0  ;;  %v1263_v10 = vld [vmem:[%s12577_s6] sm:$0xff] }
 0x1ad   : > { %901 = vadd.xlane.f32.xlu1 %v900_v8  ;;  %904 = vadd.xlane.f32.xlu0 %v903_v33  ;;  %v8957_v40 = vpack.c.bf16 %v1265_v37, %v1263_v10 }
 0x1ae   : > { %v884_v38 = vmul.f32 %v10470_v6, %v10470_v6 }
 0x1af   : > { %8966 = vmatpush1.bf16.msra.mxu1 %v8957_v40  ;;  %8958 = vmatpush1.bf16.msra.mxu0 %v8957_v40 }
 0x1b0   : > { %v906_v41 = vsel %vm704_vm0, %v884_v38, 0.0  ;;  %8968 = vmatprep.subr.bf16.mxu1 %v8959_v45  ;;  %8960 = vmatprep.subr.bf16.mxu0 %v8959_v45 }
 0x1b1   : > { %907 = vadd.xlane.f32.xlu1 %v906_v41 }
 0x1b3   : > { %8970 = vmatpush1.bf16.msra.mxu1 %v8961_v49  ;;  %8962 = vmatpush1.bf16.msra.mxu0 %v8961_v49 }
 0x21e   : > { %v1173_v47 = vpop.xlane.xlu1 %1172 }
 0x21f   : > { %v1195_v53 = vmul.f32 0.03125, %v1173_v47 }
 0x221   : > { %v1203_v54 = vadd.f32 1e-05, %v1195_v53 }
 0x222   : > { %v1176_v55 = vpop.xlane.xlu1 %1175  ;;  %v1179_v57 = vpop.xlane.xlu0 %1178 }
 0x223   : > { %9779 = vrsqrt.f32 %v1203_v54  ;;  %v1196_v58 = vmul.f32 0.03125, %v1176_v55  ;;  %v1197_v60 = vmul.f32 0.03125, %v1179_v57 }
 0x225   : > { %v1204_v61 = vadd.f32 1e-05, %v1196_v58  ;;  %v1205_v56 = vadd.f32 1e-05, %v1197_v60 }
 0x226   : > { %v1182_v1 = vpop.xlane.xlu1 %1181  ;;  %v1185_v3 = vpop.xlane.xlu0 %1184 }
 0x227   : > { %9781 = vrsqrt.f32 %v1204_v61  ;;  %v1198_v5 = vmul.f32 0.03125, %v1182_v1  ;;  %v1199_v7 = vmul.f32 0.03125, %v1185_v3 }
 0x228   : > { %9783 = vrsqrt.f32 %v1205_v56 }
 0x229   : > { %v1206_v9 = vadd.f32 1e-05, %v1198_v5  ;;  %v1207_v11 = vadd.f32 1e-05, %v1199_v7 }
 0x22a   : > { %v1188_v12 = vpop.xlane.xlu1 %1187  ;;  %v1191_v62 = vpop.xlane.xlu0 %1190 }
 0x22b   : > { %9785 = vrsqrt.f32 %v1206_v9  ;;  %v1200_v14 = vmul.f32 0.03125, %v1188_v12  ;;  %v1201_v15 = vmul.f32 0.03125, %v1191_v62 }
 0x22c   : > { %9787 = vrsqrt.f32 %v1207_v11 }
 0x22d   : > { %v9780_v17 = vpop.eup %9779  ;;  %v1208_v19 = vadd.f32 1e-05, %v1200_v14  ;;  %v1209_v20 = vadd.f32 1e-05, %v1201_v15 }
 0x22e   : > { %v1219_v21 = vmul.f32 %v9780_v17, %v10384_v16  ;;  %v1194_v2 = vpop.xlane.xlu1 %1193  ;;  %v887_v25 = vpop.xlane.xlu0 %886 }
 0x22f   : > { %9789 = vrsqrt.f32 %v1208_v19  ;;  %v1202_v27 = vmul.f32 0.03125, %v1194_v2  ;;  %v909_v28 = vmul.f32 0.03125, %v887_v25  ;;  %v10550_v19 = vld [vmem:[%s12660_s26] ss:$0 sm:$0xff] }
 0x230   : > { %v1233_v29 = vmul.f32 %v10506_v18, %v1219_v21  ;;  %9791 = vrsqrt.f32 %v1209_v20 }
 0x231   : > { %v9782_v30 = vpop.eup %9781  ;;  %v917_v8 = vadd.f32 1e-05, %v909_v28  ;;  %v1210_v16 = vadd.f32 1e-05, %v1202_v27  ;;  %v10565_v28 = vld [vmem:[%s12661_s4] ss:$0 sm:$0xff] }
 0x232   : > { %v9784_v33 = vpop.eup %9783  ;;  %v10516_v34 = vadd.f32 %v10512_v26, %v1233_v29  ;;  %v890_v35 = vpop.xlane.xlu1 %889  ;;  %v1220_v10 = vmul.f32 %v9782_v30, %v10391_v23 }
 0x233   : > { %v893_v36 = vpop.xlane.xlu0 %892  ;;  %v910_v37 = vmul.f32 0.03125, %v890_v35  ;;  %v1221_v40 = vmul.f32 %v9784_v33, %v10388_v22  ;;  %9793 = vrsqrt.f32 %v917_v8 }
 0x234   : > { %12662 = vst [vmem:[#allocation2_spill] sm:$0xff] %v10516_v34  ;;  %v911_v38 = vmul.f32 0.03125, %v893_v36  ;;  %v12604_v41 = vmax.f32 %v10516_v34, 0.0  ;;  %v1234_v43 = vmul.f32 %v10506_v18, %v1220_v10  ;;  %9795 = vrsqrt.f32 %v1210_v16 }
 0x235   : > { %v9786_v44 = vpop.eup %9785  ;;  %v918_v45 = vadd.f32 1e-05, %v910_v37  ;;  %v1235_v48 = vmul.f32 %v10506_v18, %v1221_v40 }
 0x236   : > { %v919_v46 = vadd.f32 1e-05, %v911_v38  ;;  %v9788_v49 = vpop.eup %9787  ;;  %7401 = vmatmul.mubr.msk.f32.vlgmr.msra.gmra.mrb[8].mxu1 %vm704_vm0, %v12604_v41  ;;  %v896_v23 = vpop.xlane.xlu1 %895  ;;  %v10527_v22 = vadd.f32 %v10512_v26, %v1234_v43  ;;  %v1222_v53 = vmul.f32 %v9786_v44, %v10399_v31 }
 0x237   : > { %v899_v47 = vpop.xlane.xlu0 %898  ;;  %9797 = vrsqrt.f32 %v918_v45  ;;  %v912_v54 = vmul.f32 0.03125, %v896_v23  ;;  %1502 = vmatprep.mubr.f32.mxu1 %v10123_v50  ;;  %v10532_v57 = vadd.f32 %v10512_v26, %v1235_v48  ;;  %v1223_v61 = vmul.f32 %v9788_v49, %v10401_v32 }
 0x238   : > { %12663 = vst [vmem:[#allocation3_spill] sm:$0xff] %v10527_v22  ;;  %v913_v55 = vmul.f32 0.03125, %v899_v47  ;;  %9799 = vrsqrt.f32 %v919_v46  ;;  %v12603_v58 = vmax.f32 %v10527_v22, 0.0  ;;  %v1236_v60 = vmul.f32 %v10506_v18, %v1222_v53 }
 0x239   : > { %12664 = vst [vmem:[#allocation4_spill] sm:$0xff] %v10532_v57  ;;  %v9790_v56 = vpop.eup %9789  ;;  %v920_v1 = vadd.f32 1e-05, %v912_v54  ;;  %v1237_v11 = vmul.f32 %v10506_v18, %v1223_v61  ;;  %v12602_v62 = vmax.f32 %v10532_v57, 0.0 }
 0x23a   : > { %v921_v3 = vadd.f32 1e-05, %v913_v55  ;;  %7402 = vmatmul.mubr.msk.f32.gmra.mrb[10].mxu1 %vm704_vm0, %v12603_v58  ;;  %v902_v31 = vpop.xlane.xlu1 %901  ;;  %v9792_v7 = vpop.eup %9791  ;;  %v1224_v12 = vmul.f32 %v9790_v56, %v10410_v39  ;;  %v10545_v14 = vadd.f32 %v10512_v26, %v1236_v60 }
 0x23b   : > { %v905_v5 = vpop.xlane.xlu0 %904  ;;  %9801 = vrsqrt.f32 %v920_v1  ;;  %v914_v9 = vmul.f32 0.03125, %v902_v31  ;;  %1508 = vmatprep.mubr.f32.mxu1 %v10123_v50  ;;  %v1225_v39 = vmul.f32 %v9792_v7, %v10413_v42  ;;  %v10559_v2 = vadd.f32 %v10512_v26, %v1237_v11 }
 0x23c   : > { %9803 = vrsqrt.f32 %v921_v3  ;;  %v915_v32 = vmul.f32 0.03125, %v905_v5  ;;  %12665 = vst [vmem:[#allocation5_spill] sm:$0xff] %v10545_v14  ;;  %v1238_v25 = vmul.f32 %v10506_v18, %v1224_v12  ;;  %v12601_v42 = vmax.f32 %v10545_v14, 0.0 }
 0x23d   : > { %v922_v15 = vadd.f32 1e-05, %v914_v9  ;;  %v9794_v17 = vpop.eup %9793  ;;  %12666 = vst [vmem:[#allocation6_spill] sm:$0xff] %v10559_v2  ;;  %v1239_v35 = vmul.f32 %v10506_v18, %v1225_v39  ;;  %v12600_v10 = vmax.f32 %v10559_v2, 0.0 }
 0x23e   : > { %v908_v20 = vpop.xlane.xlu1 %907  ;;  %7403 = vmatmul.mubr.msk.f32.gmra.mrb[12].mxu1 %vm704_vm0, %v12602_v62  ;;  %v933_v21 = vmul.f32 %v9794_v17, %v10425_v52  ;;  %v9796_v27 = vpop.eup %9795  ;;  %v923_v29 = vadd.f32 1e-05, %v915_v32  ;;  %v10580_v37 = vadd.f32 %v10512_v26, %v1238_v25 }
 0x23f   : > { %1514 = vmatprep.mubr.f32.mxu1 %v10123_v50  ;;  %9805 = vrsqrt.f32 %v922_v15  ;;  %v916_v30 = vmul.f32 0.03125, %v908_v20 }
 0x240   : > { %v947_v52 = vmul.f32 %v10550_v19, %v933_v21  ;;  %12668 = vst [vmem:[#allocation8_spill] sm:$0xff] %v10580_v37  ;;  %9807 = vrsqrt.f32 %v923_v29  ;;  %v12599_v47 = vmax.f32 %v10580_v37, 0.0 }
 0x241   : > { %v9798_v8 = vpop.eup %9797  ;;  %v924_v40 = vadd.f32 1e-05, %v916_v30 }
 0x242   : > { %v9800_v33 = vpop.eup %9799  ;;  %7404 = vmatmul.mubr.msk.f32.gmra.mrb[14].mxu1 %vm704_vm0, %v12601_v42  ;;  %v934_v16 = vmul.f32 %v9798_v8, %v10434_v63  ;;  %v10575_v36 = vadd.f32 %v10565_v28, %v947_v52  ;;  %v1226_v63 = vmul.f32 %v9796_v27, %v10422_v51  ;;  %v10599_v51 = vadd.f32 %v10512_v26, %v1239_v35 }
 0x243   : > { %1520 = vmatprep.mubr.f32.mxu1 %v10123_v50  ;;  %v935_v38 = vmul.f32 %v9800_v33, %v10437_v59  ;;  %9809 = vrsqrt.f32 %v924_v40 }
 0x244   : > { %12667 = vst [vmem:[#allocation7_spill] sm:$0xff] %v10575_v36  ;;  %v948_v43 = vmul.f32 %v10550_v19, %v934_v16  ;;  %v12612_v45 = vmax.f32 %v10575_v36, 0.0  ;;  %12670 = vst [vmem:[#allocation10_spill] sm:$0xff] %v10599_v51  ;;  %v1240_v53 = vmul.f32 %v10506_v18, %v1226_v63  ;;  %v12598_v18 = vmax.f32 %v10599_v51, 0.0 }
 0x245   : > { %v9802_v44 = vpop.eup %9801  ;;  %v949_v46 = vmul.f32 %v10550_v19, %v935_v38 }
 0x246   : > { %v9804_v48 = vpop.eup %9803  ;;  %7405 = vmatmul.mubr.msk.f32.gmra.mrb[16].mxu1 %vm704_vm0, %v12600_v10  ;;  %v10591_v49 = vadd.f32 %v10565_v28, %v948_v43  ;;  %v936_v59 = vmul.f32 %v9802_v44, %v10446_v13  ;;  %7393 = vmatmul.mubr.msk.f32.vlgmr.msra.gmra.mrb[8].mxu0 %vm704_vm0, %v12612_v45  ;;  %v10620_v61 = vadd.f32 %v10512_v26, %v1240_v53 }
 0x247   : > { %1526 = vmatprep.mubr.f32.mxu1 %v10123_v50  ;;  %1365 = vmatprep.mubr.f32.mxu0 %v10123_v50  ;;  %v10606_v13 = vadd.f32 %v10565_v28, %v949_v46  ;;  %v937_v55 = vmul.f32 %v9804_v48, %v10449_v0 }
 0x248   : > { %12669 = vst [vmem:[#allocation9_spill] sm:$0xff] %v10591_v49  ;;  %v12611_v23 = vmax.f32 %v10591_v49, 0.0  ;;  %v950_v54 = vmul.f32 %v10550_v19, %v936_v59  ;;  %12672 = vst [vmem:[#allocation12_spill] sm:$0xff] %v10620_v61  ;;  %v12597_v26 = vmax.f32 %v10620_v61, 0.0 }
 0x249   : > { %12671 = vst [vmem:[#allocation11_spill] sm:$0xff] %v10606_v13  ;;  %v9806_v60 = vpop.eup %9805  ;;  %v12610_v0 = vmax.f32 %v10606_v13, 0.0  ;;  %v951_v1 = vmul.f32 %v10550_v19, %v937_v55 }
 0x24a   : > { %7406 = vmatmul.mubr.msk.f32.gmra.mrb[18].mxu1 %vm704_vm0, %v12599_v47  ;;  %7394 = vmatmul.mubr.msk.f32.gmra.mrb[10].mxu0 %vm704_vm0, %v12611_v23  ;;  %v10624_v56 = vadd.f32 %v10565_v28, %v950_v54  ;;  %v938_v3 = vmul.f32 %v9806_v60, %v10458_v24  ;;  %v9808_v31 = vpop.eup %9807 }
 0x24b   : > { %1532 = vmatprep.mubr.f32.mxu1 %v10123_v50  ;;  %1371 = vmatprep.mubr.f32.mxu0 %v10123_v50  ;;  %v10639_v7 = vadd.f32 %v10565_v28, %v951_v1  ;;  %v939_v9 = vmul.f32 %v9808_v31, %v10461_v4 }
 0x24c   : > { %12673 = vst [vmem:[#allocation13_spill] sm:$0xff] %v10624_v56  ;;  %v12609_v5 = vmax.f32 %v10624_v56, 0.0  ;;  %v952_v24 = vmul.f32 %v10550_v19, %v938_v3 }
 0x24d   : > { %12674 = vst [vmem:[#allocation14_spill] sm:$0xff] %v10639_v7  ;;  %v9810_v11 = vpop.eup %9809  ;;  %v12608_v12 = vmax.f32 %v10639_v7, 0.0  ;;  %v953_v15 = vmul.f32 %v10550_v19, %v939_v9 }
 0x24e   : > { %7407 = vmatmul.mubr.msk.f32.gmra.mrb[20].mxu1 %vm704_vm0, %v12598_v18  ;;  %7395 = vmatmul.mubr.msk.f32.gmra.mrb[12].mxu0 %vm704_vm0, %v12610_v0  ;;  %v10652_v32 = vadd.f32 %v10565_v28, %v952_v24  ;;  %v940_v4 = vmul.f32 %v9810_v11, %v10470_v6 }
 0x24f   : > { %1538 = vmatprep.mubr.f32.mxu1 %v10123_v50  ;;  %1377 = vmatprep.mubr.f32.mxu0 %v10123_v50  ;;  %v10662_v20 = vadd.f32 %v10565_v28, %v953_v15 }
 0x250   : > { %12675 = vst [vmem:[#allocation15_spill] sm:$0xff] %v10652_v32  ;;  %v12607_v17 = vmax.f32 %v10652_v32, 0.0  ;;  %v954_v39 = vmul.f32 %v10550_v19, %v940_v4 }
 0x251   : > { %12676 = vst [vmem:[#allocation16_spill] sm:$0xff] %v10662_v20  ;;  %v12606_v6 = vmax.f32 %v10662_v20, 0.0 }
 0x252   : > { %7408 = vmatmul.mubr.msk.f32.gmra.mrb[22].mxu1 %vm704_vm0, %v12597_v26  ;;  %7396 = vmatmul.mubr.msk.f32.gmra.mrb[14].mxu0 %vm704_vm0, %v12609_v5  ;;  %v10671_v21 = vadd.f32 %v10565_v28, %v954_v39 }
 0x253   : > { %1383 = vmatprep.mubr.f32.mxu0 %v10123_v50 }
 0x254   : > { %12677 = vst [vmem:[#allocation17_spill] sm:$0xff] %v10671_v21  ;;  %v12605_v25 = vmax.f32 %v10671_v21, 0.0 }
 0x256   : > { %7397 = vmatmul.mubr.msk.f32.gmra.mrb[16].mxu0 %vm704_vm0, %v12608_v12 }
 0x257   : > { %1389 = vmatprep.mubr.f32.mxu0 %v10123_v50 }
 0x25a   : > { %7398 = vmatmul.mubr.msk.f32.gmra.mrb[18].mxu0 %vm704_vm0, %v12607_v17 }
 0x25b   : > { %1395 = vmatprep.mubr.f32.mxu0 %v10123_v50 }
 0x25e   : > { %7399 = vmatmul.mubr.msk.f32.gmra.mrb[20].mxu0 %vm704_vm0, %v12606_v6 }
 0x25f   : > { %1401 = vmatprep.mubr.f32.mxu0 %v10123_v50 }
 0x262   : > { %7400 = vmatmul.mubr.msk.f32.gmra.mrb[22].mxu0 %vm704_vm0, %v12605_v25 }
 0x309   : > { %v10681_v19 = vpop.f32.mrb[8].mxu1 }
 0x30a   : > { %v1500_v27 = vpop.f32.mrb[9].mxu1 }
 0x30d   : > { %v10683_v29 = vpop.f32.mrb[10].mxu1 }
 0x30e   : > { %v1506_v30 = vpop.f32.mrb[11].mxu1  ;;  %v10687_v28 = vpack.i.bf16 %v10683_v29, %v10681_v19 }
 0x30f   : > { %v10689_v8 = vpack.i.bf16 %v1506_v30, %v1500_v27  ;;  %v8995_v52 = vpack.c.bf16 %v1506_v30, %v1500_v27 }
 0x310   : > { %9500 = vrot.lane.b32.xlu0 %v10687_v28, %s10124_s1 }
 0x311   : > { %v10693_v50 = vpop.f32.mrb[12].mxu1  ;;  %8996 = vmatprep.subr.bf16.mxu1 %v8995_v52 }
 0x312   : > { %v1512_v33 = vpop.f32.mrb[13].mxu1  ;;  %8998 = vmatpush3.bf16.msra.mxu1 %v8995_v52 }
 0x314   : > { %9520 = vrot.lane.b32.xlu0 %v10687_v28, %s10125_s24 }
 0x315   : > { %v10697_v16 = vpop.f32.mrb[14].mxu1 }
 0x316   : > { %v1518_v35 = vpop.f32.mrb[15].mxu1  ;;  %v10701_v38 = vpack.i.bf16 %v10697_v16, %v10693_v50 }
 0x317   : > { %v10703_v40 = vpack.i.bf16 %v1518_v35, %v1512_v33  ;;  %v8999_v43 = vpack.c.bf16 %v1518_v35, %v1512_v33 }
 0x318   : > { %9505 = vrot.lane.b32.xlu1 %v10701_v38, %s10124_s1 }
 0x319   : > { %v10707_v63 = vpop.f32.mrb[16].mxu1  ;;  %9000 = vmatprep.subr.bf16.mxu1 %v8999_v43  ;;  %v10709_v44 = vpop.f32.mrb[8].mxu0 }
 0x31a   : > { %v1524_v46 = vpop.f32.mrb[17].mxu1  ;;  %9002 = vmatpush3.bf16.msra.mxu1 %v8999_v43  ;;  %v1363_v48 = vpop.f32.mrb[9].mxu0  ;;  %8239 = vmatprep.mubr.msk.f32.mxu0 %vm1569_vm1, %v10709_v44 }
 0x31d   : > { %v10713_v59 = vpop.f32.mrb[18].mxu1  ;;  %v10715_v53 = vpop.f32.mrb[10].mxu0 }
 0x31e   : > { %12678 = vst [vmem:[#allocation18_spill] sm:$0xff] %v10713_v59  ;;  %v1530_v54 = vpop.f32.mrb[19].mxu1  ;;  %v10719_v55 = vpack.i.bf16 %v10713_v59, %v10707_v63  ;;  %v1369_v60 = vpop.f32.mrb[11].mxu0  ;;  %v10733_v9 = vpack.i.bf16 %v10715_v53, %v10709_v44 }
 0x31f   : > { %v10721_v1 = vpack.i.bf16 %v1530_v54, %v1524_v46  ;;  %v9003_v3 = vpack.c.bf16 %v1530_v54, %v1524_v46  ;;  %v10723_v31 = vpack.i.bf16 %v1369_v60, %v1363_v48  ;;  %v10735_v11 = vpack.c.bf16 %v1369_v60, %v1363_v48 }
 0x320   : > { %9530 = vrot.lane.b32.xlu0 %v10719_v55, %s10125_s24  ;;  %9510 = vrot.lane.b32.xlu1 %v10719_v55, %s10124_s1 }
 0x321   : > { %12679 = vst [vmem:[#allocation19_spill] sm:$0xff] %v10723_v31  ;;  %v10729_v24 = vpop.f32.mrb[20].mxu1  ;;  %9004 = vmatprep.subr.bf16.mxu1 %v9003_v3  ;;  %12681 = vst [vmem:[#allocation21_spill] sm:$0xff] %v10735_v11  ;;  %v10737_v15 = vpop.f32.mrb[12].mxu0 }
 0x322   : > { %12680 = vst [vmem:[#allocation20_spill] sm:$0xff] %v10729_v24  ;;  %v1536_v4 = vpop.f32.mrb[21].mxu1  ;;  %9006 = vmatpush3.bf16.msra.mxu1 %v9003_v3  ;;  %v1375_v39 = vpop.f32.mrb[13].mxu0 }
 0x324   : > { %1943 = vrot.lane.b32.xlu0 %v10709_v44, %s10126_s25 }
 0x325   : > { %v10741_v27 = vpop.f32.mrb[22].mxu1  ;;  %v10743_v30 = vpop.f32.mrb[14].mxu0 }
 0x326   : > { %12682 = vst [vmem:[#allocation22_spill] sm:$0xff] %v10741_v27  ;;  %v1542_v52 = vpop.f32.mrb[23].mxu1  ;;  %v10747_v33 = vpack.i.bf16 %v10741_v27, %v10729_v24  ;;  %v1381_v35 = vpop.f32.mrb[15].mxu0  ;;  %v10759_v54 = vpack.i.bf16 %v10743_v30, %v10737_v15 }
 0x327   : > { %v10749_v43 = vpack.i.bf16 %v1542_v52, %v1536_v4  ;;  %v9007_v46 = vpack.c.bf16 %v1542_v52, %v1536_v4  ;;  %v10751_v48 = vpack.i.bf16 %v1381_v35, %v1375_v39  ;;  %v10763_v3 = vpack.c.bf16 %v1381_v35, %v1375_v39 }
 0x328   : > { %9515 = vrot.lane.b32.xlu1 %v10747_v33, %s10124_s1  ;;  %1947 = vrot.lane.b32.xlu0 %v10737_v15, %s10126_s25 }
 0x329   : > { %12683 = vst [vmem:[#allocation23_spill] sm:$0xff] %v10751_v48  ;;  %9008 = vmatprep.subr.bf16.mxu1 %v9007_v46  ;;  %v10761_v60 = vpop.f32.mrb[16].mxu0  ;;  %12684 = vst [vmem:[#allocation24_spill] sm:$0xff] %v10763_v3 }
 0x32a   : > { %9010 = vmatpush3.bf16.msra.mxu1 %v9007_v46  ;;  %v1387_v26 = vpop.f32.mrb[17].mxu0 }
 0x32c   : > { %9525 = vrot.lane.b32.xlu1 %v10701_v38, %s10125_s24  ;;  %1951 = vrot.lane.b32.xlu0 %v10761_v60, %s10126_s25 }
 0x32d   : > { %v10769_v4 = vpop.f32.mrb[18].mxu0 }
 0x32e   : > { %v1393_v52 = vpop.f32.mrb[19].mxu0  ;;  %v10773_v18 = vpack.i.bf16 %v10769_v4, %v10761_v60 }
 0x32f   : > { %v10775_v47 = vpack.i.bf16 %v1393_v52, %v1387_v26  ;;  %v10779_v39 = vpack.c.bf16 %v1393_v52, %v1387_v26 }
 0x330   : > { %9535 = vrot.lane.b32.xlu1 %v10747_v33, %s10125_s24 }
 0x331   : > { %12685 = vst [vmem:[#allocation25_spill] sm:$0xff] %v10775_v47  ;;  %12686 = vst [vmem:[#allocation26_spill] sm:$0xff] %v10779_v39  ;;  %v10781_v35 = vpop.f32.mrb[20].mxu0 }
 0x332   : > { %1955 = vrot.lane.b32.xlu0 %v10781_v35, %s10126_s25  ;;  %v1399_v46 = vpop.f32.mrb[21].mxu0 }
 0x334   : > { %1945 = vrot.lane.b32.xlu1 %v10715_v53, %s10126_s25 }
 0x335   : > { %v10787_v10 = vpop.f32.mrb[22].mxu0 }
 0x336   : > { %9540 = vrot.lane.b32.xlu0 %v10687_v28, %s12645_s27  ;;  %v1405_v42 = vpop.f32.mrb[23].mxu0  ;;  %v10793_v26 = vpack.i.bf16 %v10787_v10, %v10781_v35 }
 0x337   : > { %v10795_v52 = vpack.i.bf16 %v1405_v42, %v1399_v46  ;;  %v10799_v62 = vpack.c.bf16 %v1405_v42, %v1399_v46 }
 0x338   : > { %1949 = vrot.lane.b32.xlu1 %v10743_v30, %s10126_s25 }
 0x339   : > { %12687 = vst [vmem:[#allocation27_spill] sm:$0xff] %v10795_v52  ;;  %12688 = vst [vmem:[#allocation28_spill] sm:$0xff] %v10799_v62 }
 0x33a   : > { %9550 = vrot.lane.b32.xlu0 %v10719_v55, %s12645_s27 }
 0x33c   : > { %1953 = vrot.lane.b32.xlu1 %v10769_v4, %s10126_s25 }
 0x33e   : > { %2629 = vrot.lane.b32.xlu0 %v10709_v44, %s10128_s29 }
 0x340   : > { %1957 = vrot.lane.b32.xlu1 %v10787_v10, %s10126_s25 }
 0x342   : > { %2633 = vrot.lane.b32.xlu0 %v10737_v15, %s10128_s29 }
 0x344   : > { %9545 = vrot.lane.b32.xlu1 %v10701_v38, %s12645_s27 }
 0x346   : > { %2637 = vrot.lane.b32.xlu0 %v10761_v60, %s10128_s29 }
 0x348   : > { %2631 = vrot.lane.b32.xlu1 %v10715_v53, %s10128_s29 }
 0x34a   : > { %2641 = vrot.lane.b32.xlu0 %v10781_v35, %s10128_s29 }
 0x34c   : > { %2635 = vrot.lane.b32.xlu1 %v10743_v30, %s10128_s29 }
 0x34e   : > { %2643 = vrot.lane.b32.xlu0 %v10787_v10, %s10128_s29 }
 0x350   : > { %2639 = vrot.lane.b32.xlu1 %v10769_v4, %s10128_s29 }
 0x354   : > { %9555 = vrot.lane.b32.xlu1 %v10747_v33, %s12645_s27 }
 0x382   : > { %v9501_v42 = vpop.permute.xlu0 %9500 }
 0x383   : > { %v9503_v46 = vunpack.i.h.bf16 %v9501_v42  ;;  %v9502_v58 = vunpack.i.l.bf16 %v9501_v42 }
 0x385   : > { %v8971_v25 = vpack.c.bf16 %v9503_v46, %v9502_v58 }
 0x386   : > { %v9521_v46 = vpop.permute.xlu0 %9520 }
 0x387   : > { %8973 = vmatprep.subr.msk.bf16.mxu0 %vm10829_vm2, %v8971_v25 }
 0x388   : > { %8976 = vmatpush3.bf16.xpose.msk.msra.mxu0 %vm10829_vm2, %v8971_v25 }
 0x38a   : > { %v9506_v6 = vpop.permute.xlu1 %9505 }
 0x38b   : > { %v9508_v17 = vunpack.i.h.bf16 %v9506_v6  ;;  %v9507_v12 = vunpack.i.l.bf16 %v9506_v6  ;;  %v9523_v6 = vunpack.i.h.bf16 %v9521_v46 }
 0x38d   : > { %v8977_v5 = vpack.c.bf16 %v9508_v17, %v9507_v12  ;;  %v9522_v12 = vunpack.i.l.bf16 %v9521_v46 }
 0x38f   : > { %8979 = vmatprep.subr.msk.bf16.mxu0 %vm10829_vm2, %v8977_v5 }
 0x390   : > { %8982 = vmatpush3.bf16.xpose.msk.msra.mxu0 %vm10829_vm2, %v8977_v5  ;;  %v9011_v5 = vpack.c.bf16 %v9523_v6, %v9522_v12 }
 0x392   : > { %v9511_v42 = vpop.permute.xlu1 %9510  ;;  %v9531_v61 = vpop.permute.xlu0 %9530 }
 0x393   : > { %v9513_v0 = vunpack.i.h.bf16 %v9511_v42  ;;  %v9512_v23 = vunpack.i.l.bf16 %v9511_v42  ;;  %v9532_v6 = vunpack.i.l.bf16 %v9531_v61 }
 0x395   : > { %v8983_v58 = vpack.c.bf16 %v9513_v0, %v9512_v23 }
 0x396   : > { %v1944_v23 = vpop.permute.xlu0 %1943 }
 0x397   : > { %8985 = vmatprep.subr.msk.bf16.mxu0 %vm10829_vm2, %v8983_v58 }
 0x398   : > { %8988 = vmatpush3.bf16.xpose.msk.msra.mxu0 %vm10829_vm2, %v8983_v58 }
 0x39a   : > { %v9516_v25 = vpop.permute.xlu1 %9515 }
 0x39b   : > { %v9518_v17 = vunpack.i.h.bf16 %v9516_v25  ;;  %v9517_v45 = vunpack.i.l.bf16 %v9516_v25  ;;  %v9533_v25 = vunpack.i.h.bf16 %v9531_v61 }
 0x39d   : > { %v8989_v51 = vpack.c.bf16 %v9518_v17, %v9517_v45  ;;  %v1948_v45 = vpop.permute.xlu0 %1947  ;;  %v9023_v17 = vpack.c.bf16 %v9533_v25, %v9532_v6 }
 0x39e   : > { %v9526_v37 = vpop.permute.xlu1 %9525 }
 0x39f   : > { %8991 = vmatprep.subr.msk.bf16.mxu0 %vm10829_vm2, %v8989_v51  ;;  %v9528_v42 = vunpack.i.h.bf16 %v9526_v37  ;;  %v9527_v58 = vunpack.i.l.bf16 %v9526_v37 }
 0x3a0   : > { %8994 = vmatpush3.bf16.xpose.msk.msra.mxu0 %vm10829_vm2, %v8989_v51 }
 0x3a1   : > { %9013 = vmatprep.subr.msk.bf16.mxu0 %vm10829_vm2, %v9011_v5  ;;  %v9017_v2 = vpack.c.bf16 %v9528_v42, %v9527_v58  ;;  %v1952_v37 = vpop.permute.xlu0 %1951 }
 0x3a2   : > { %v9536_v0 = vpop.permute.xlu1 %9535 }
 0x3a3   : > { %v9538_v42 = vunpack.i.h.bf16 %v9536_v0  ;;  %v9537_v58 = vunpack.i.l.bf16 %v9536_v0 }
 0x3a5   : > { %v1956_v61 = vpop.permute.xlu0 %1955  ;;  %v9029_v25 = vpack.c.bf16 %v9538_v42, %v9537_v58 }
 0x3a6   : > { %v1946_v46 = vpop.permute.xlu1 %1945 }
 0x3a7   : > { %8240 = vmatmul.mubr.msk.f32.vlgmr.msra.gmra.mrb[24].mxu0 %vm1569_vm1, %v10715_v53 }
 0x3a8   : > { %8242 = vmatprep.mubr.msk.f32.mxu0 %vm1569_vm1, %v10737_v15  ;;  %9016 = vmatpush3.bf16.xpose.msk.msra.mxu0 %vm10829_vm2, %v9011_v5 }
 0x3a9   : > { %9019 = vmatprep.subr.msk.bf16.mxu0 %vm10829_vm2, %v9017_v2  ;;  %v9541_v6 = vpop.permute.xlu0 %9540 }
 0x3aa   : > { %v1950_v51 = vpop.permute.xlu1 %1949  ;;  %v9542_v57 = vunpack.i.l.bf16 %v9541_v6 }
 0x3ab   : > { %8243 = vmatmul.mubr.msk.f32.gmra.mrb[26].mxu0 %vm1569_vm1, %v10743_v30 }
 0x3ac   : > { %8245 = vmatprep.mubr.msk.f32.mxu0 %vm1569_vm1, %v10761_v60 }
 0x3ae   : > { %v1954_v12 = vpop.permute.xlu1 %1953 }
 0x3af   : > { %8246 = vmatmul.mubr.msk.f32.gmra.mrb[28].mxu0 %vm1569_vm1, %v10769_v4 }
 0x3b0   : > { %8248 = vmatprep.mubr.msk.f32.mxu0 %vm1569_vm1, %v10781_v35  ;;  %9022 = vmatpush3.bf16.xpose.msk.msra.mxu0 %vm10829_vm2, %v9017_v2  ;;  %v9543_v2 = vunpack.i.h.bf16 %v9541_v6 }
 0x3b1   : > { %9025 = vmatprep.subr.msk.bf16.mxu0 %vm10829_vm2, %v9023_v17 }
 0x3b2   : > { %v1958_v5 = vpop.permute.xlu1 %1957  ;;  %v9059_v34 = vpack.c.bf16 %v9543_v2, %v9542_v57 }
 0x3b3   : > { %8249 = vmatmul.mubr.msk.f32.gmra.mrb[30].mxu0 %vm1569_vm1, %v10787_v10 }
 0x3b4   : > { %8295 = vmatprep.mubr.msk.f32.mxu0 %vm1569_vm1, %v1944_v23 }
 0x3b6   : > { %v9546_v14 = vpop.permute.xlu1 %9545 }
 0x3b7   : > { %v9548_v23 = vunpack.i.h.bf16 %v9546_v14  ;;  %v9547_v0 = vunpack.i.l.bf16 %v9546_v14 }
 0x3b8   : > { %9028 = vmatpush3.bf16.xpose.msk.msra.mxu0 %vm10829_vm2, %v9023_v17  ;;  %v9551_v17 = vpop.permute.xlu0 %9550 }
 0x3b9   : > { %9031 = vmatprep.subr.msk.bf16.mxu0 %vm10829_vm2, %v9029_v25  ;;  %v9065_v58 = vpack.c.bf16 %v9548_v23, %v9547_v0  ;;  %v9552_v6 = vunpack.i.l.bf16 %v9551_v17 }
 0x3ba   : > { %v2632_v22 = vpop.permute.xlu1 %2631 }
 0x3be   : > { %v2636_v42 = vpop.permute.xlu1 %2635 }
 0x3c0   : > { %9034 = vmatpush3.bf16.xpose.msk.msra.mxu0 %vm10829_vm2, %v9029_v25  ;;  %v9553_v25 = vunpack.i.h.bf16 %v9551_v17 }
 0x3c1   : > { %9061 = vmatprep.subr.msk.bf16.mxu0 %vm10829_vm2, %v9059_v34 }
 0x3c2   : > { %v2640_v57 = vpop.permute.xlu1 %2639  ;;  %v9071_v14 = vpack.c.bf16 %v9553_v25, %v9552_v6 }
 0x3c7   : > { %8296 = vmatmul.mubr.msk.f32.vlgmr.msra.gmra.mrb[32].mxu0 %vm1569_vm1, %v1946_v46  ;;  %v9556_v46 = vpop.permute.xlu1 %9555 }
 0x3c8   : > { %8298 = vmatprep.mubr.msk.f32.mxu0 %vm1569_vm1, %v1948_v45  ;;  %9064 = vmatpush3.bf16.xpose.msk.msra.mxu0 %vm10829_vm2, %v9059_v34  ;;  %v2630_v34 = vpop.permute.xlu0 %2629  ;;  %v9558_v45 = vunpack.i.h.bf16 %v9556_v46  ;;  %v9557_v2 = vunpack.i.l.bf16 %v9556_v46 }
 0x3c9   : > { %9067 = vmatprep.subr.msk.bf16.mxu0 %vm10829_vm2, %v9065_v58 }
 0x3cb   : > { %8299 = vmatmul.mubr.msk.f32.gmra.mrb[34].mxu0 %vm1569_vm1, %v1950_v51  ;;  %v9077_v51 = vpack.c.bf16 %v9558_v45, %v9557_v2 }
 0x3cc   : > { %8301 = vmatprep.mubr.msk.f32.mxu0 %vm1569_vm1, %v1952_v37  ;;  %v2634_v37 = vpop.permute.xlu0 %2633 }
 0x3cf   : > { %8302 = vmatmul.mubr.msk.f32.gmra.mrb[36].mxu0 %vm1569_vm1, %v1954_v12 }
 0x3d0   : > { %8304 = vmatprep.mubr.msk.f32.mxu0 %vm1569_vm1, %v1956_v61  ;;  %9070 = vmatpush3.bf16.xpose.msk.msra.mxu0 %vm10829_vm2, %v9065_v58  ;;  %v2638_v12 = vpop.permute.xlu0 %2637 }
 0x3d1   : > { %9073 = vmatprep.subr.msk.bf16.mxu0 %vm10829_vm2, %v9071_v14 }
 0x3d3   : > { %8305 = vmatmul.mubr.msk.f32.gmra.mrb[38].mxu0 %vm1569_vm1, %v1958_v5 }
 0x3d4   : > { %8383 = vmatprep.mubr.msk.f32.mxu0 %vm1569_vm1, %v2630_v34  ;;  %v2642_v61 = vpop.permute.xlu0 %2641 }
 0x3d8   : > { %9076 = vmatpush3.bf16.xpose.msk.msra.mxu0 %vm10829_vm2, %v9071_v14  ;;  %v2644_v5 = vpop.permute.xlu0 %2643 }
 0x3d9   : > { %9079 = vmatprep.subr.msk.bf16.mxu0 %vm10829_vm2, %v9077_v51 }
 0x3e0   : > { %9082 = vmatpush3.bf16.xpose.msk.msra.mxu0 %vm10829_vm2, %v9077_v51 }
 0x3e7   : > { %8384 = vmatmul.mubr.msk.f32.vlgmr.msra.gmra.mrb[40].mxu0 %vm1569_vm1, %v2632_v22 }
 0x3e8   : > { %8386 = vmatprep.mubr.msk.f32.mxu0 %vm1569_vm1, %v2634_v37 }
 0x3eb   : > { %8387 = vmatmul.mubr.msk.f32.gmra.mrb[42].mxu0 %vm1569_vm1, %v2636_v42 }
 0x3ec   : > { %8389 = vmatprep.mubr.msk.f32.mxu0 %vm1569_vm1, %v2638_v12 }
 0x3ef   : > { %8390 = vmatmul.mubr.msk.f32.gmra.mrb[44].mxu0 %vm1569_vm1, %v2640_v57 }
 0x3f0   : > { %8392 = vmatprep.mubr.msk.f32.mxu0 %vm1569_vm1, %v2642_v61 }
 0x3f3   : > { %8393 = vmatmul.mubr.msk.f32.gmra.mrb[46].mxu0 %vm1569_vm1, %v2644_v5 }
 0x47a   : > { %v8241_v23 = vpop.f32.mrb[24].mxu0 }
 0x47b   : > { %v10911_v0 = vmul.f32 0.25, %v8241_v23  ;;  %v1676_v58 = vpop.f32.mrb[25].mxu0 }
 0x47c   : > { %v10913_v22 = vmul.f32 0.25, %v1676_v58 }
 0x47d   : > { %v1727_v42 = vsel %vm1723_vm3, %v10911_v0, -inf }
 0x47e   : > { %1728 = vmax.xlane.f32.xlu0 %v1727_v42  ;;  %v8244_v17 = vpop.f32.mrb[26].mxu0  ;;  %v1724_v57 = vsel %vm1723_vm3, %v10913_v22, -inf }
 0x47f   : > { %v10919_v25 = vmul.f32 0.25, %v8244_v17  ;;  %1725 = vmax.xlane.f32.xlu1 %v1724_v57  ;;  %v1686_v6 = vpop.f32.mrb[27].mxu0 }
 0x480   : > { %v10921_v14 = vmul.f32 0.25, %v1686_v6 }
 0x481   : > { %v1733_v46 = vsel %vm1723_vm3, %v10919_v25, -inf }
 0x482   : > { %v8247_v34 = vpop.f32.mrb[28].mxu0  ;;  %v1730_v45 = vsel %vm1723_vm3, %v10921_v14, -inf }
 0x483   : > { %v10927_v2 = vmul.f32 0.25, %v8247_v34  ;;  %1734 = vmax.xlane.f32.xlu1 %v1733_v46  ;;  %1731 = vmax.xlane.f32.xlu0 %v1730_v45  ;;  %v1696_v51 = vpop.f32.mrb[29].mxu0 }
 0x484   : > { %v10929_v37 = vmul.f32 0.25, %v1696_v51 }
 0x485   : > { %v1739_v12 = vsel %vm1723_vm3, %v10927_v2, -inf }
 0x486   : > { %v8250_v61 = vpop.f32.mrb[30].mxu0  ;;  %v1736_v5 = vsel %vm1723_vm3, %v10929_v37, -inf }
 0x487   : > { %v10935_v23 = vmul.f32 0.25, %v8250_v61  ;;  %1740 = vmax.xlane.f32.xlu1 %v1739_v12  ;;  %1737 = vmax.xlane.f32.xlu0 %v1736_v5  ;;  %v1706_v58 = vpop.f32.mrb[31].mxu0 }
 0x488   : > { %v10937_v42 = vmul.f32 0.25, %v1706_v58 }
 0x489   : > { %v1745_v17 = vsel %vm1723_vm3, %v10935_v23, -inf }
 0x48a   : > { %v1742_v57 = vsel %vm1723_vm3, %v10937_v42, -inf }
 0x48b   : > { %1746 = vmax.xlane.f32.xlu1 %v1745_v17  ;;  %1743 = vmax.xlane.f32.xlu0 %v1742_v57 }
 0x49a   : > { %v8297_v6 = vpop.f32.mrb[32].mxu0 }
 0x49b   : > { %v10943_v46 = vmul.f32 0.25, %v8297_v6  ;;  %v2073_v34 = vpop.f32.mrb[33].mxu0 }
 0x49c   : > { %v10945_v45 = vmul.f32 0.25, %v2073_v34 }
 0x49d   : > { %v2123_v51 = vsel %vm1723_vm3, %v10943_v46, -inf }
 0x49e   : > { %2124 = vmax.xlane.f32.xlu1 %v2123_v51  ;;  %v8300_v12 = vpop.f32.mrb[34].mxu0  ;;  %v2120_v61 = vsel %vm1723_vm3, %v10945_v45, -inf }
 0x49f   : > { %v10951_v5 = vmul.f32 0.25, %v8300_v12  ;;  %v2083_v58 = vpop.f32.mrb[35].mxu0  ;;  %2121 = vmax.xlane.f32.xlu0 %v2120_v61 }
 0x4a0   : > { %v10953_v17 = vmul.f32 0.25, %v2083_v58 }
 0x4a1   : > { %v2129_v57 = vsel %vm1723_vm3, %v10951_v5, -inf }
 0x4a2   : > { %2130 = vmax.xlane.f32.xlu1 %v2129_v57  ;;  %v8303_v6 = vpop.f32.mrb[36].mxu0  ;;  %v2126_v34 = vsel %vm1723_vm3, %v10953_v17, -inf }
 0x4a3   : > { %v10959_v21 = vmul.f32 0.25, %v8303_v6  ;;  %v2093_v51 = vpop.f32.mrb[37].mxu0  ;;  %2127 = vmax.xlane.f32.xlu0 %v2126_v34 }
 0x4a4   : > { %v10961_v20 = vmul.f32 0.25, %v2093_v51 }
 0x4a5   : > { %v2135_v12 = vsel %vm1723_vm3, %v10959_v21, -inf }
 0x4a6   : > { %2136 = vmax.xlane.f32.xlu1 %v2135_v12  ;;  %v8306_v61 = vpop.f32.mrb[38].mxu0  ;;  %v2132_v58 = vsel %vm1723_vm3, %v10961_v20, -inf }
 0x4a7   : > { %v10967_v32 = vmul.f32 0.25, %v8306_v61  ;;  %v2103_v57 = vpop.f32.mrb[39].mxu0  ;;  %2133 = vmax.xlane.f32.xlu0 %v2132_v58 }
 0x4a8   : > { %v10969_v7 = vmul.f32 0.25, %v2103_v57 }
 0x4a9   : > { %v2141_v6 = vsel %vm1723_vm3, %v10967_v32, -inf }
 0x4aa   : > { %2142 = vmax.xlane.f32.xlu1 %v2141_v6  ;;  %v2138_v34 = vsel %vm1723_vm3, %v10969_v7, -inf }
 0x4ab   : > { %2139 = vmax.xlane.f32.xlu0 %v2138_v34 }
 0x4ba   : > { %v10975_v51 = vpop.f32.mrb[40].mxu0 }
 0x4bb   : > { %9565 = vrot.lane.b32.xlu1 %v10703_v40, %s10126_s25  ;;  %v10979_v12 = vpop.f32.mrb[41].mxu0 }
 0x4be   : > { %v10981_v61 = vpop.f32.mrb[42].mxu0 }
 0x4bf   : > { %v10983_v58 = vpop.f32.mrb[43].mxu0 }
 0x4c1   : > { %9560 = vrot.lane.b32.xlu0 %v10689_v8, %s10126_s25 }
 0x4c2   : > { %v10987_v57 = vpop.f32.mrb[44].mxu0 }
 0x4c3   : > { %v10989_v6 = vpop.f32.mrb[45].mxu0 }
 0x4c6   : > { %v10991_v56 = vpop.f32.mrb[46].mxu0 }
 0x4c7   : > { %v10993_v34 = vpop.f32.mrb[47].mxu0 }
 0x50b   : > { %v1729_v13 = vpop.xlane.xlu0 %1728 }
 0x50c   : > { %v1749_v49 = vsub.f32 %v10911_v0, %v1729_v13  ;;  %v1726_v36 = vpop.xlane.xlu1 %1725 }
 0x50d   : > { %v1748_v62 = vsub.f32 %v10913_v22, %v1726_v36 }
 0x50e   : > { %v1758_v39 = vmul.f32 1.442695, %v1749_v49 }
 0x50f   : > { %v1756_v3 = vmul.f32 1.442695, %v1748_v62 }
 0x510   : > { %9811 = vpow2.f32 %v1758_v39  ;;  %v1735_v52 = vpop.xlane.xlu1 %1734  ;;  %v1732_v47 = vpop.xlane.xlu0 %1731 }
 0x511   : > { %9813 = vpow2.f32 %v1756_v3  ;;  %v1751_v11 = vsub.f32 %v10919_v25, %v1735_v52  ;;  %v1750_v31 = vsub.f32 %v10921_v14, %v1732_v47 }
 0x513   : > { %v1762_v48 = vmul.f32 1.442695, %v1751_v11  ;;  %v1760_v27 = vmul.f32 1.442695, %v1750_v31 }
 0x514   : > { %v1741_v59 = vpop.xlane.xlu1 %1740  ;;  %v1738_v24 = vpop.xlane.xlu0 %1737 }
 0x515   : > { %9815 = vpow2.f32 %v1762_v48  ;;  %v1753_v13 = vsub.f32 %v10927_v2, %v1741_v59  ;;  %v1752_v0 = vsub.f32 %v10929_v37, %v1738_v24 }
 0x516   : > { %9817 = vpow2.f32 %v1760_v27 }
 0x517   : > { %v1766_v36 = vmul.f32 1.442695, %v1753_v13  ;;  %v1764_v62 = vmul.f32 1.442695, %v1752_v0 }
 0x518   : > { %v1747_v49 = vpop.xlane.xlu1 %1746  ;;  %v1744_v39 = vpop.xlane.xlu0 %1743 }
 0x519   : > { %9819 = vpow2.f32 %v1766_v36  ;;  %v1755_v3 = vsub.f32 %v10935_v23, %v1747_v49  ;;  %v1754_v52 = vsub.f32 %v10937_v42, %v1744_v39 }
 0x51a   : > { %v11003_v47 = vpop.eup %9811  ;;  %9821 = vpow2.f32 %v1764_v62 }
 0x51b   : > { %v11005_v31 = vpop.eup %9813  ;;  %v1770_v11 = vmul.f32 1.442695, %v1755_v3  ;;  %v1768_v48 = vmul.f32 1.442695, %v1754_v52  ;;  %v1775_v59 = vsel %vm1723_vm3, %v11003_v47, 0.0 }
 0x51c   : > { %1776 = vadd.xlane.f32.xlu1 %v1775_v59  ;;  %v1772_v24 = vsel %vm1723_vm3, %v11005_v31, 0.0 }
 0x51d   : > { %9823 = vpow2.f32 %v1770_v11  ;;  %1773 = vadd.xlane.f32.xlu0 %v1772_v24 }
 0x51e   : > { %9825 = vpow2.f32 %v1768_v48 }
 0x51f   : > { %v11011_v27 = vpop.eup %9815 }
 0x520   : > { %v11013_v22 = vpop.eup %9817  ;;  %v1781_v25 = vsel %vm1723_vm3, %v11011_v27, 0.0 }
 0x521   : > { %1782 = vadd.xlane.f32.xlu1 %v1781_v25  ;;  %v1778_v14 = vsel %vm1723_vm3, %v11013_v22, 0.0 }
 0x522   : > { %1779 = vadd.xlane.f32.xlu0 %v1778_v14 }
 0x523   : > { %v11019_v2 = vpop.eup %9819 }
 0x524   : > { %v11021_v37 = vpop.eup %9821  ;;  %v1787_v23 = vsel %vm1723_vm3, %v11019_v2, 0.0 }
 0x525   : > { %1788 = vadd.xlane.f32.xlu1 %v1787_v23  ;;  %v1784_v42 = vsel %vm1723_vm3, %v11021_v37, 0.0 }
 0x526   : > { %1785 = vadd.xlane.f32.xlu0 %v1784_v42 }
 0x527   : > { %v11027_v13 = vpop.eup %9823 }
 0x528   : > { %v11029_v0 = vpop.eup %9825  ;;  %v1793_v36 = vsel %vm1723_vm3, %v11027_v13, 0.0 }
 0x529   : > { %1794 = vadd.xlane.f32.xlu1 %v1793_v36  ;;  %v1790_v62 = vsel %vm1723_vm3, %v11029_v0, 0.0 }
 0x52a   : > { %1791 = vadd.xlane.f32.xlu0 %v1790_v62 }
 0x52b   : > { %v2125_v49 = vpop.xlane.xlu1 %2124 }
 0x52c   : > { %v2145_v39 = vsub.f32 %v10943_v46, %v2125_v49  ;;  %v2122_v3 = vpop.xlane.xlu0 %2121 }
 0x52d   : > { %v2144_v52 = vsub.f32 %v10945_v45, %v2122_v3 }
 0x52e   : > { %v2154_v11 = vmul.f32 1.442695, %v2145_v39 }
 0x52f   : > { %v2152_v48 = vmul.f32 1.442695, %v2144_v52  ;;  %v2131_v59 = vpop.xlane.xlu1 %2130 }
 0x530   : > { %9827 = vpow2.f32 %v2154_v11  ;;  %v2147_v24 = vsub.f32 %v10951_v5, %v2131_v59  ;;  %v2128_v25 = vpop.xlane.xlu0 %2127 }
 0x531   : > { %9829 = vpow2.f32 %v2152_v48  ;;  %v2146_v14 = vsub.f32 %v10953_v17, %v2128_v25 }
 0x532   : > { %v2158_v23 = vmul.f32 1.442695, %v2147_v24 }
 0x533   : > { %v2156_v42 = vmul.f32 1.442695, %v2146_v14  ;;  %v2137_v36 = vpop.xlane.xlu1 %2136 }
 0x534   : > { %9831 = vpow2.f32 %v2158_v23  ;;  %v2149_v62 = vsub.f32 %v10959_v21, %v2137_v36  ;;  %v2134_v46 = vpop.xlane.xlu0 %2133 }
 0x535   : > { %9833 = vpow2.f32 %v2156_v42  ;;  %v2148_v45 = vsub.f32 %v10961_v20, %v2134_v46 }
 0x536   : > { %v2162_v49 = vmul.f32 1.442695, %v2149_v62 }
 0x537   : > { %v2160_v39 = vmul.f32 1.442695, %v2148_v45  ;;  %v2143_v3 = vpop.xlane.xlu1 %2142 }
 0x538   : > { %9835 = vpow2.f32 %v2162_v49  ;;  %v2151_v5 = vsub.f32 %v10967_v32, %v2143_v3  ;;  %v2140_v52 = vpop.xlane.xlu0 %2139 }
 0x539   : > { %9837 = vpow2.f32 %v2160_v39  ;;  %v2150_v17 = vsub.f32 %v10969_v7, %v2140_v52 }
 0x53a   : > { %v11043_v11 = vpop.eup %9827  ;;  %v2166_v48 = vmul.f32 1.442695, %v2151_v5 }
 0x53b   : > { %v11045_v59 = vpop.eup %9829  ;;  %v2164_v21 = vmul.f32 1.442695, %v2150_v17  ;;  %v2171_v24 = vsel %vm1723_vm3, %v11043_v11, 0.0 }
 0x53c   : > { %9839 = vpow2.f32 %v2166_v48  ;;  %2172 = vadd.xlane.f32.xlu1 %v2171_v24  ;;  %v9561_v20 = vpop.permute.xlu0 %9560  ;;  %v2168_v25 = vsel %vm1723_vm3, %v11045_v59, 0.0 }
 0x53d   : > { %v9563_v32 = vunpack.i.h.bf16 %v9561_v20  ;;  %v9562_v14 = vunpack.i.l.bf16 %v9561_v20  ;;  %2169 = vadd.xlane.f32.xlu0 %v2168_v25  ;;  %9841 = vpow2.f32 %v2164_v21 }
 0x53e   : > { %v11051_v23 = vpop.eup %9831 }
 0x53f   : > { %v11053_v7 = vpop.eup %9833  ;;  %v2177_v42 = vsel %vm1723_vm3, %v11051_v23, 0.0  ;;  %v11057_v36 = vpack.c.bf16 %v9563_v32, %v9562_v14 }
 0x540   : > { %2178 = vadd.xlane.f32.xlu1 %v2177_v42  ;;  %v2174_v62 = vsel %vm1723_vm3, %v11053_v7, 0.0 }
 0x541   : > { %2175 = vadd.xlane.f32.xlu0 %v2174_v62  ;;  %9036 = vmatprep.subr.bf16.mxu1 %v11057_v36 }
 0x542   : > { %v11062_v46 = vpop.eup %9835 }
 0x543   : > { %v11064_v45 = vpop.eup %9837  ;;  %v2183_v49 = vsel %vm1723_vm3, %v11062_v46, 0.0 }
 0x544   : > { %2184 = vadd.xlane.f32.xlu1 %v2183_v49  ;;  %v2180_v39 = vsel %vm1723_vm3, %v11064_v45, 0.0 }
 0x545   : > { %2181 = vadd.xlane.f32.xlu0 %v2180_v39 }
 0x546   : > { %v11070_v3 = vpop.eup %9839 }
 0x547   : > { %v2189_v5 = vsel %vm1723_vm3, %v11070_v3, 0.0  ;;  %v11074_v52 = vpop.eup %9841 }
 0x548   : > { %2190 = vadd.xlane.f32.xlu1 %v2189_v5  ;;  %v2186_v17 = vsel %vm1723_vm3, %v11074_v52, 0.0 }
 0x54c   : > { %2187 = vadd.xlane.f32.xlu1 %v2186_v17 }
 0x55b   : > { %9570 = vrot.lane.b32.xlu0 %v10721_v1, %s10126_s25 }
 0x55d   : > { %9575 = vrot.lane.b32.xlu1 %v10749_v43, %s10126_s25 }
 0x55f   : > { %9580 = vrot.lane.b32.xlu0 %v10687_v28, %s12643_s30  ;;  %v11107_v28 = vmul.f32 0.25, %v10979_v12 }
 0x561   : > { %9585 = vrot.lane.b32.xlu1 %v10701_v38, %s12643_s30  ;;  %v11110_v38 = vmul.f32 0.25, %v10983_v58 }
 0x563   : > { %9590 = vrot.lane.b32.xlu0 %v10719_v55, %s12643_s30  ;;  %v11118_v55 = vmul.f32 0.25, %v10981_v61 }
 0x565   : > { %9595 = vrot.lane.b32.xlu1 %v10747_v33, %s12643_s30  ;;  %v11128_v33 = vmul.f32 0.25, %v10989_v6  ;;  %s12700_s30 = smov 16  }
 0x567   : > { %3186 = vrot.lane.b32.xlu0 %v10709_v44, %s12647_s5  ;;  %v2806_v44 = vsel %vm1723_vm3, %v11107_v28, -inf  ;;  %v2818_v12 = vsel %vm1723_vm3, %v11128_v33, -inf }
 0x569   : > { %3188 = vrot.lane.b32.xlu1 %v10715_v53, %s12647_s5  ;;  %v11115_v53 = vmul.f32 0.25, %v10975_v51  ;;  %v11138_v51 = vmul.f32 0.25, %v10993_v34 }
 0x56b   : > { %3190 = vrot.lane.b32.xlu0 %v10737_v15, %s12647_s5  ;;  %v2812_v15 = vsel %vm1723_vm3, %v11110_v38, -inf  ;;  %v2824_v58 = vsel %vm1723_vm3, %v11138_v51, -inf }
 0x56d   : > { %3192 = vrot.lane.b32.xlu1 %v10743_v30, %s12647_s5  ;;  %v2809_v30 = vsel %vm1723_vm3, %v11115_v53, -inf }
 0x56f   : > { %3194 = vrot.lane.b32.xlu0 %v10761_v60, %s12647_s5  ;;  %v2815_v60 = vsel %vm1723_vm3, %v11118_v55, -inf }
 0x571   : > { %3196 = vrot.lane.b32.xlu1 %v10769_v4, %s12647_s5  ;;  %v11133_v4 = vmul.f32 0.25, %v10991_v56  ;;  %v9566_v56 = vpop.permute.xlu1 %9565 }
 0x572   : > { %v9568_v32 = vunpack.i.h.bf16 %v9566_v56  ;;  %v9567_v14 = vunpack.i.l.bf16 %v9566_v56 }
 0x573   : > { %3198 = vrot.lane.b32.xlu0 %v10781_v35, %s12647_s5  ;;  %v2827_v61 = vsel %vm1723_vm3, %v11133_v4, -inf }
 0x574   : > { %v9039_v17 = vpack.c.bf16 %v9568_v32, %v9567_v14 }
 0x575   : > { %3200 = vrot.lane.b32.xlu1 %v10787_v10, %s12647_s5  ;;  %v11123_v10 = vmul.f32 0.25, %v10987_v57 }
 0x577   : > { %v2821_v35 = vsel %vm1723_vm3, %v11123_v10, -inf }
 0x592   : > { %2807 = vmax.xlane.f32.xlu0 %v2806_v44 }
 0x596   : > { %2813 = vmax.xlane.f32.xlu0 %v2812_v15 }
 0x599   : > { %2810 = vmax.xlane.f32.xlu1 %v2809_v30 }
 0x59a   : > { %2816 = vmax.xlane.f32.xlu0 %v2815_v60 }
 0x59d   : > { %2822 = vmax.xlane.f32.xlu1 %v2821_v35 }
 0x59e   : > { %2819 = vmax.xlane.f32.xlu0 %v2818_v12 }
 0x5a1   : > { %2828 = vmax.xlane.f32.xlu1 %v2827_v61 }
 0x5a2   : > { %2825 = vmax.xlane.f32.xlu0 %v2824_v58 }
 0x5a9   : > { %v1777_v57 = vpop.xlane.xlu1 %1776 }
 0x5aa   : > { %9843 = vrcp.f32 %v1777_v57  ;;  %v1774_v6 = vpop.xlane.xlu0 %1773 }
 0x5ab   : > { %9845 = vrcp.f32 %v1774_v6 }
 0x5ae   : > { %v1783_v34 = vpop.xlane.xlu1 %1782 }
 0x5af   : > { %9847 = vrcp.f32 %v1783_v34  ;;  %v1780_v48 = vpop.xlane.xlu0 %1779 }
 0x5b0   : > { %9849 = vrcp.f32 %v1780_v48 }
 0x5b2   : > { %v1789_v21 = vpop.xlane.xlu1 %1788  ;;  %9605 = vrot.lane.b32.xlu1 %v10703_v40, %s10128_s29 }
 0x5b3   : > { %9851 = vrcp.f32 %v1789_v21  ;;  %v1786_v24 = vpop.xlane.xlu0 %1785 }
 0x5b4   : > { %v9844_v20 = vpop.eup %9843  ;;  %9853 = vrcp.f32 %v1786_v24 }
 0x5b5   : > { %v9846_v25 = vpop.eup %9845  ;;  %v1805_v49 = vmul.f32 %v9844_v20, %v11003_v47 }
 0x5b6   : > { %v1795_v42 = vpop.xlane.xlu1 %1794  ;;  %v1804_v62 = vmul.f32 %v9846_v25, %v11005_v31 }
 0x5b7   : > { %9855 = vrcp.f32 %v1795_v42  ;;  %v1792_v39 = vpop.xlane.xlu0 %1791 }
 0x5b8   : > { %9857 = vrcp.f32 %v1792_v39  ;;  %9600 = vrot.lane.b32.xlu0 %v10689_v8, %s10128_s29  ;;  %8267 = vmatprep.mubr.msk.f32.mxu1 %vm1723_vm3, %v1804_v62 }
 0x5b9   : > { %v9848_v5 = vpop.eup %9847  ;;  %8268 = vmatmul.mubr.msk.f32.vlgmr.msra.gmra.mrb[24].mxu1 %vm1723_vm3, %v1805_v49 }
 0x5ba   : > { %v9850_v44 = vpop.eup %9849  ;;  %9038 = vmatpush3.bf16.msra.mxu1 %v11057_v36  ;;  %v1807_v15 = vmul.f32 %v9848_v5, %v11011_v27 }
 0x5bb   : > { %9040 = vmatprep.subr.bf16.mxu1 %v9039_v17  ;;  %v1806_v47 = vmul.f32 %v9850_v44, %v11013_v22 }
 0x5bd   : > { %v9852_v31 = vpop.eup %9851  ;;  %8270 = vmatprep.mubr.msk.f32.mxu1 %vm1723_vm3, %v1806_v47 }
 0x5be   : > { %v9854_v30 = vpop.eup %9853  ;;  %8271 = vmatmul.mubr.msk.f32.gmra.mrb[26].mxu1 %vm1723_vm3, %v1807_v15  ;;  %v1809_v60 = vmul.f32 %v9852_v31, %v11019_v2 }
 0x5bf   : > { %9042 = vmatpush3.bf16.msra.mxu1 %v9039_v17  ;;  %v1808_v35 = vmul.f32 %v9854_v30, %v11021_v37 }
 0x5c1   : > { %v9856_v12 = vpop.eup %9855  ;;  %8273 = vmatprep.mubr.msk.f32.mxu1 %vm1723_vm3, %v1808_v35 }
 0x5c2   : > { %v9858_v36 = vpop.eup %9857  ;;  %8274 = vmatmul.mubr.msk.f32.gmra.mrb[28].mxu1 %vm1723_vm3, %v1809_v60  ;;  %v1811_v27 = vmul.f32 %v9856_v12, %v11027_v13 }
 0x5c3   : > { %v1810_v22 = vmul.f32 %v9858_v36, %v11029_v0 }
 0x5c5   : > { %8276 = vmatprep.mubr.msk.f32.mxu1 %vm1723_vm3, %v1810_v22 }
 0x5c6   : > { %8277 = vmatmul.mubr.msk.f32.gmra.mrb[30].mxu1 %vm1723_vm3, %v1811_v27 }
 0x5c9   : > { %v2173_v61 = vpop.xlane.xlu1 %2172 }
 0x5ca   : > { %v2170_v58 = vpop.xlane.xlu0 %2169 }
 0x5cb   : > { %9859 = vrcp.f32 %v2170_v58 }
 0x5cc   : > { %9861 = vrcp.f32 %v2173_v61 }
 0x5cd   : > { %v2179_v2 = vpop.xlane.xlu1 %2178 }
 0x5ce   : > { %v2176_v56 = vpop.xlane.xlu0 %2175 }
 0x5cf   : > { %9863 = vrcp.f32 %v2176_v56 }
 0x5d0   : > { %9865 = vrcp.f32 %v2179_v2 }
 0x5d1   : > { %v2185_v37 = vpop.xlane.xlu1 %2184 }
 0x5d2   : > { %v2182_v57 = vpop.xlane.xlu0 %2181 }
 0x5d3   : > { %9867 = vrcp.f32 %v2182_v57 }
 0x5d4   : > { %9869 = vrcp.f32 %v2185_v37 }
 0x5d5   : > { %v9860_v6 = vpop.eup %9859  ;;  %v2191_v34 = vpop.xlane.xlu1 %2190 }
 0x5d6   : > { %v9571_v48 = vpop.permute.xlu0 %9570  ;;  %v2200_v21 = vmul.f32 %v9860_v6, %v11045_v59  ;;  %v9862_v17 = vpop.eup %9861 }
 0x5d7   : > { %v9573_v13 = vunpack.i.h.bf16 %v9571_v48  ;;  %v9572_v24 = vunpack.i.l.bf16 %v9571_v48  ;;  %v2201_v12 = vmul.f32 %v9862_v17, %v11043_v11 }
 0x5d8   : > { %8323 = vmatprep.mubr.msk.f32.mxu1 %vm1723_vm3, %v2200_v21 }
 0x5d9   : > { %v2188_v0 = vpop.xlane.xlu1 %2187  ;;  %v9043_v20 = vpack.c.bf16 %v9573_v13, %v9572_v24  ;;  %v9864_v15 = vpop.eup %9863 }
 0x5da   : > { %v9581_v25 = vpop.permute.xlu0 %9580  ;;  %9871 = vrcp.f32 %v2188_v0  ;;  %v9866_v27 = vpop.eup %9865  ;;  %v2202_v22 = vmul.f32 %v9864_v15, %v11053_v7 }
 0x5db   : > { %v9583_v32 = vunpack.i.h.bf16 %v9581_v25  ;;  %v9582_v14 = vunpack.i.l.bf16 %v9581_v25  ;;  %9044 = vmatprep.subr.bf16.mxu1 %v9043_v20  ;;  %9873 = vrcp.f32 %v2191_v34  ;;  %v2203_v56 = vmul.f32 %v9866_v27, %v11051_v23  ;;  %v2369_v25 = vld [vmem:[%s12578_s7 + $0x10] sm:$0xff] }
 0x5dc   : > { %9046 = vmatpush3.bf16.msra.mxu1 %v9043_v20 }
 0x5dd   : > { %v9103_v42 = vpack.c.bf16 %v9583_v32, %v9582_v14  ;;  %v9576_v62 = vpop.permute.xlu1 %9575  ;;  %v9868_v61 = vpop.eup %9867  ;;  %v2370_v32 = vld [vmem:[%s12578_s7 + $0x18] sm:$0xff] }
 0x5de   : > { %v9578_v49 = vunpack.i.h.bf16 %v9576_v62  ;;  %v9577_v39 = vunpack.i.l.bf16 %v9576_v62  ;;  %v9591_v59 = vpop.permute.xlu0 %9590  ;;  %v9870_v11 = vpop.eup %9869  ;;  %v2204_v7 = vmul.f32 %v9868_v61, %v11064_v45  ;;  %v11215_v14 = vpack.c.bf16 %v2370_v32, %v2369_v25 }
 0x5df   : > { %9105 = vmatprep.subr.msk.bf16.mxu0 %vm10829_vm2, %v9103_v42  ;;  %v9593_v60 = vunpack.i.h.bf16 %v9591_v59  ;;  %v9592_v35 = vunpack.i.l.bf16 %v9591_v59  ;;  %v2205_v34 = vmul.f32 %v9870_v11, %v11062_v46 }
 0x5e0   : > { %9108 = vmatpush3.bf16.xpose.msk.msra.mxu0 %vm10829_vm2, %v9103_v42  ;;  %v9047_v5 = vpack.c.bf16 %v9578_v49, %v9577_v39 }
 0x5e1   : > { %v9586_v44 = vpop.permute.xlu1 %9585  ;;  %v9115_v58 = vpack.c.bf16 %v9593_v60, %v9592_v35 }
 0x5e2   : > { %v9588_v47 = vunpack.i.h.bf16 %v9586_v44  ;;  %v9587_v31 = vunpack.i.l.bf16 %v9586_v44  ;;  %v3187_v30 = vpop.permute.xlu0 %3186  ;;  %9048 = vmatprep.subr.bf16.mxu1 %v9047_v5 }
 0x5e3   : > { %9050 = vmatpush3.bf16.msra.mxu1 %v9047_v5  ;;  %8455 = vmatprep.mubr.msk.f32.mxu0 %vm1569_vm1, %v3187_v30 }
 0x5e4   : > { %v9109_v36 = vpack.c.bf16 %v9588_v47, %v9587_v31  ;;  %v9872_v37 = vpop.eup %9871  ;;  %9052 = vmatprep.subr.bf16.mxu1 %v11215_v14 }
 0x5e5   : > { %v9596_v2 = vpop.permute.xlu1 %9595  ;;  %v9874_v48 = vpop.eup %9873  ;;  %v2206_v21 = vmul.f32 %v9872_v37, %v11074_v52 }
 0x5e6   : > { %8324 = vmatmul.mubr.msk.f32.vlgmr.msra.gmra.mrb[32].mxu1 %vm1723_vm3, %v2201_v12  ;;  %9111 = vmatprep.subr.msk.bf16.mxu0 %vm10829_vm2, %v9109_v36  ;;  %v9598_v57 = vunpack.i.h.bf16 %v9596_v2  ;;  %v9597_v6 = vunpack.i.l.bf16 %v9596_v2  ;;  %v2207_v45 = vmul.f32 %v9874_v48, %v11070_v3  ;;  %v3191_v46 = vpop.permute.xlu0 %3190  ;;  %v1942_v48 = vld [vmem:[%s12578_s7 + $0x8] sm:$0xff] }
 0x5e7   : > { %8326 = vmatprep.mubr.msk.f32.mxu1 %vm1723_vm3, %v2202_v22  ;;  %9054 = vmatpush3.bf16.msra.mxu1 %v11215_v14 }
 0x5e8   : > { %9114 = vmatpush3.bf16.xpose.msk.msra.mxu0 %vm10829_vm2, %v9109_v36  ;;  %v9121_v23 = vpack.c.bf16 %v9598_v57, %v9597_v6 }
 0x5e9   : > { %9117 = vmatprep.subr.msk.bf16.mxu0 %vm10829_vm2, %v9115_v58  ;;  %v3189_v13 = vpop.permute.xlu1 %3188 }
 0x5ea   : > { %8327 = vmatmul.mubr.msk.f32.gmra.mrb[34].mxu1 %vm1723_vm3, %v2203_v56  ;;  %v3195_v24 = vpop.permute.xlu0 %3194 }
 0x5eb   : > { %8329 = vmatprep.mubr.msk.f32.mxu1 %vm1723_vm3, %v2204_v7 }
 0x5ed   : > { %v3193_v52 = vpop.permute.xlu1 %3192 }
 0x5ee   : > { %8330 = vmatmul.mubr.msk.f32.gmra.mrb[36].mxu1 %vm1723_vm3, %v2205_v34  ;;  %v3199_v3 = vpop.permute.xlu0 %3198  ;;  %v1941_v34 = vld [vmem:[%s12578_s7] sm:$0xff] }
 0x5ef   : > { %8332 = vmatprep.mubr.msk.f32.mxu1 %vm1723_vm3, %v2206_v21  ;;  %v11255_v21 = vpack.c.bf16 %v1942_v48, %v1941_v34 }
 0x5f0   : > { %9120 = vmatpush3.bf16.xpose.msk.msra.mxu0 %vm10829_vm2, %v9115_v58 }
 0x5f1   : > { %9123 = vmatprep.subr.msk.bf16.mxu0 %vm10829_vm2, %v9121_v23  ;;  %v3197_v0 = vpop.permute.xlu1 %3196  ;;  %9056 = vmatprep.subr.bf16.mxu1 %v11255_v21 }
 0x5f2   : > { %8333 = vmatmul.mubr.msk.f32.gmra.mrb[38].mxu1 %vm1723_vm3, %v2207_v45 }
 0x5f5   : > { %v3201_v20 = vpop.permute.xlu1 %3200 }
 0x5f8   : > { %9126 = vmatpush3.bf16.xpose.msk.msra.mxu0 %vm10829_vm2, %v9121_v23 }
 0x5ff   : > { %8456 = vmatmul.mubr.msk.f32.vlgmr.msra.gmra.mrb[48].mxu0 %vm1569_vm1, %v3189_v13 }
 0x600   : > { %8458 = vmatprep.mubr.msk.f32.mxu0 %vm1569_vm1, %v3191_v46 }
 0x603   : > { %8459 = vmatmul.mubr.msk.f32.gmra.mrb[50].mxu0 %vm1569_vm1, %v3193_v52 }
 0x604   : > { %8461 = vmatprep.mubr.msk.f32.mxu0 %vm1569_vm1, %v3195_v24  ;;  %v12691_v24 = vld [vmem:[#allocation20_spill] sm:$0xff] }
 0x607   : > { %8462 = vmatmul.mubr.msk.f32.gmra.mrb[52].mxu0 %vm1569_vm1, %v3197_v0  ;;  %v12692_v0 = vld [vmem:[#allocation18_spill] sm:$0xff] }
 0x608   : > { %8464 = vmatprep.mubr.msk.f32.mxu0 %vm1569_vm1, %v3199_v3  ;;  %v12693_v3 = vld [vmem:[#allocation22_spill] sm:$0xff] }
 0x60b   : > { %8465 = vmatmul.mubr.msk.f32.gmra.mrb[54].mxu0 %vm1569_vm1, %v3201_v20 }
 0x60c   : > { %8527 = vmatprep.mubr.msk.f32.mxu0 %vm1569_vm1, %v10681_v19 }
 0x61f   : > { %v2808_v42 = vpop.xlane.xlu0 %2807 }
 0x620   : > { %v2830_v62 = vsub.f32 %v11107_v28, %v2808_v42 }
 0x622   : > { %v2838_v49 = vmul.f32 1.442695, %v2830_v62 }
 0x623   : > { %v2814_v39 = vpop.xlane.xlu0 %2813 }
 0x624   : > { %9875 = vpow2.f32 %v2838_v49  ;;  %v2832_v59 = vsub.f32 %v11110_v38, %v2814_v39 }
 0x626   : > { %v2842_v5 = vmul.f32 1.442695, %v2832_v59  ;;  %v2811_v17 = vpop.xlane.xlu1 %2810 }
 0x627   : > { %v2831_v44 = vsub.f32 %v11115_v53, %v2811_v17  ;;  %v2817_v15 = vpop.xlane.xlu0 %2816 }
 0x628   : > { %9877 = vpow2.f32 %v2842_v5  ;;  %v2833_v47 = vsub.f32 %v11118_v55, %v2817_v15 }
 0x629   : > { %v2840_v31 = vmul.f32 1.442695, %v2831_v44 }
 0x62a   : > { %v2844_v30 = vmul.f32 1.442695, %v2833_v47  ;;  %v2823_v60 = vpop.xlane.xlu1 %2822 }
 0x62b   : > { %9879 = vpow2.f32 %v2840_v31  ;;  %v2835_v35 = vsub.f32 %v11123_v10, %v2823_v60  ;;  %v2820_v28 = vpop.xlane.xlu0 %2819 }
 0x62c   : > { %v2834_v12 = vsub.f32 %v11128_v33, %v2820_v28  ;;  %9881 = vpow2.f32 %v2844_v30 }
 0x62d   : > { %v2848_v36 = vmul.f32 1.442695, %v2835_v35 }
 0x62e   : > { %v11225_v38 = vpop.eup %9875  ;;  %v2846_v27 = vmul.f32 1.442695, %v2834_v12  ;;  %v2829_v22 = vpop.xlane.xlu1 %2828 }
 0x62f   : > { %v2837_v53 = vsub.f32 %v11133_v4, %v2829_v22  ;;  %v2826_v61 = vpop.xlane.xlu0 %2825  ;;  %v2854_v55 = vsel %vm1723_vm3, %v11225_v38, 0.0 }
 0x630   : > { %9883 = vpow2.f32 %v2846_v27  ;;  %2855 = vadd.xlane.f32.xlu0 %v2854_v55  ;;  %v2836_v10 = vsub.f32 %v11138_v51, %v2826_v61 }
 0x631   : > { %9885 = vpow2.f32 %v2848_v36  ;;  %v2852_v58 = vmul.f32 1.442695, %v2837_v53 }
 0x632   : > { %v11231_v2 = vpop.eup %9877  ;;  %v2850_v4 = vmul.f32 1.442695, %v2836_v10  ;;  %v9606_v28 = vpop.permute.xlu1 %9605 }
 0x633   : > { %v2860_v33 = vsel %vm1723_vm3, %v11231_v2, 0.0  ;;  %9887 = vpow2.f32 %v2852_v58  ;;  %v9601_v5 = vpop.permute.xlu0 %9600  ;;  %v9608_v55 = vunpack.i.h.bf16 %v9606_v28  ;;  %v9607_v58 = vunpack.i.l.bf16 %v9606_v28 }
 0x634   : > { %2861 = vadd.xlane.f32.xlu0 %v2860_v33  ;;  %9889 = vpow2.f32 %v2850_v4  ;;  %v9603_v17 = vunpack.i.h.bf16 %v9601_v5  ;;  %v9602_v44 = vunpack.i.l.bf16 %v9601_v5 }
 0x635   : > { %v11235_v56 = vpop.eup %9879 }
 0x636   : > { %v2857_v11 = vsel %vm1723_vm3, %v11235_v56, 0.0  ;;  %v11239_v7 = vpop.eup %9881  ;;  %v9083_v31 = vpack.c.bf16 %v9603_v17, %v9602_v44 }
 0x637   : > { %2858 = vadd.xlane.f32.xlu1 %v2857_v11  ;;  %v2863_v51 = vsel %vm1723_vm3, %v11239_v7, 0.0  ;;  %v9087_v11 = vpack.c.bf16 %v9608_v55, %v9607_v58 }
 0x63a   : > { %v11241_v37 = vpop.eup %9883 }
 0x63b   : > { %v11245_v57 = vpop.eup %9885  ;;  %2864 = vadd.xlane.f32.xlu1 %v2863_v51  ;;  %v2866_v6 = vsel %vm1723_vm3, %v11241_v37, 0.0 }
 0x63c   : > { %2867 = vadd.xlane.f32.xlu0 %v2866_v6  ;;  %v2869_v23 = vsel %vm1723_vm3, %v11245_v57, 0.0 }
 0x63d   : > { %v11260_v45 = vpop.eup %9887 }
 0x63e   : > { %v2875_v13 = vsel %vm1723_vm3, %v11260_v45, 0.0  ;;  %v11264_v46 = vpop.eup %9889 }
 0x63f   : > { %2870 = vadd.xlane.f32.xlu1 %v2869_v23  ;;  %v2872_v52 = vsel %vm1723_vm3, %v11264_v46, 0.0 }
 0x643   : > { %2876 = vadd.xlane.f32.xlu1 %v2875_v13 }
 0x647   : > { %2873 = vadd.xlane.f32.xlu1 %v2872_v52 }
 0x652   : > { %9610 = vrot.lane.b32.xlu0 %v10721_v1, %s10128_s29 }
 0x656   : > { %9620 = vrot.lane.b32.xlu0 %v10733_v9, %s10124_s1 }
 0x658   : > { %9615 = vrot.lane.b32.xlu1 %v10749_v43, %s10128_s29 }
 0x65a   : > { %9630 = vrot.lane.b32.xlu0 %v10773_v18, %s10124_s1 }
 0x65c   : > { %9625 = vrot.lane.b32.xlu1 %v10759_v54, %s10124_s1 }
 0x65e   : > { %9640 = vrot.lane.b32.xlu0 %v10733_v9, %s10125_s24 }
 0x660   : > { %9635 = vrot.lane.b32.xlu1 %v10793_v26, %s10124_s1 }
 0x662   : > { %9650 = vrot.lane.b32.xlu0 %v10773_v18, %s10125_s24 }
 0x664   : > { %9645 = vrot.lane.b32.xlu1 %v10759_v54, %s10125_s24 }
 0x666   : > { %4136 = vrot.lane.b32.xlu0 %v10681_v19, %s10126_s25 }
 0x668   : > { %9655 = vrot.lane.b32.xlu1 %v10793_v26, %s10125_s24 }
 0x66a   : > { %4140 = vrot.lane.b32.xlu0 %v10693_v50, %s10126_s25 }
 0x66c   : > { %4138 = vrot.lane.b32.xlu1 %v10683_v29, %s10126_s25 }
 0x66e   : > { %4144 = vrot.lane.b32.xlu0 %v10707_v63, %s10126_s25 }
 0x670   : > { %4142 = vrot.lane.b32.xlu1 %v10697_v16, %s10126_s25 }
 0x672   : > { %4148 = vrot.lane.b32.xlu0 %v12691_v24, %s10126_s25 }
 0x674   : > { %4146 = vrot.lane.b32.xlu1 %v12692_v0, %s10126_s25 }
 0x678   : > { %4150 = vrot.lane.b32.xlu1 %v12693_v3, %s10126_s25 }
 0x68c   : > { %v8269_v20 = vpop.f32.mrb[24].mxu1 }
 0x68d   : > { %v1902_v25 = vpop.f32.mrb[25].mxu1 }
 0x691   : > { %v8272_v32 = vpop.f32.mrb[26].mxu1 }
 0x692   : > { %v1912_v42 = vpop.f32.mrb[27].mxu1 }
 0x695   : > { %v11304_v62 = vpop.f32.mrb[28].mxu1 }
 0x696   : > { %v1922_v49 = vpop.f32.mrb[29].mxu1 }
 0x699   : > { %v11306_v39 = vpop.f32.mrb[30].mxu1 }
 0x69a   : > { %v1932_v59 = vpop.f32.mrb[31].mxu1 }
 0x6b9   : > { %v8325_v15 = vpop.f32.mrb[32].mxu1 }
 0x6ba   : > { %v2330_v47 = vpop.f32.mrb[33].mxu1 }
 0x6bb   : > { %8339 = vmatprep.mubr.msk.f32.mxu1 %vm1569_vm1, %v2330_v47 }
 0x6bc   : > { %8340 = vmatmul.mubr.msk.f32.vlgmr.msra.gmra.mrb[40].mxu1 %vm1569_vm1, %v8325_v15 }
 0x6bd   : > { %9058 = vmatpush3.bf16.msra.mxu1 %v11255_v21  ;;  %v8328_v30 = vpop.f32.mrb[34].mxu1  ;;  %v2856_v35 = vpop.xlane.xlu0 %2855 }
 0x6be   : > { %9084 = vmatprep.subr.bf16.mxu1 %v9083_v31  ;;  %v2340_v60 = vpop.f32.mrb[35].mxu1  ;;  %9891 = vrcp.f32 %v2856_v35 }
 0x6bf   : > { %8342 = vmatprep.mubr.msk.f32.mxu1 %vm1569_vm1, %v2340_v60 }
 0x6c0   : > { %8343 = vmatmul.mubr.msk.f32.gmra.mrb[42].mxu1 %vm1569_vm1, %v8328_v30 }
 0x6c1   : > { %v8331_v12 = vpop.f32.mrb[36].mxu1  ;;  %v2862_v22 = vpop.xlane.xlu0 %2861 }
 0x6c2   : > { %v2350_v36 = vpop.f32.mrb[37].mxu1 }
 0x6c3   : > { %8345 = vmatprep.mubr.msk.f32.mxu1 %vm1569_vm1, %v2350_v36 }
 0x6c4   : > { %v2859_v27 = vpop.xlane.xlu1 %2858  ;;  %8346 = vmatmul.mubr.msk.f32.gmra.mrb[44].mxu1 %vm1569_vm1, %v8331_v12 }
 0x6c5   : > { %v8334_v53 = vpop.f32.mrb[38].mxu1  ;;  %9893 = vrcp.f32 %v2859_v27 }
 0x6c6   : > { %v2360_v61 = vpop.f32.mrb[39].mxu1  ;;  %9895 = vrcp.f32 %v2862_v22 }
 0x6c7   : > { %8348 = vmatprep.mubr.msk.f32.mxu1 %vm1569_vm1, %v2360_v61 }
 0x6c8   : > { %v2865_v10 = vpop.xlane.xlu1 %2864  ;;  %8349 = vmatmul.mubr.msk.f32.gmra.mrb[46].mxu1 %vm1569_vm1, %v8334_v53 }
 0x6c9   : > { %v2868_v33 = vpop.xlane.xlu0 %2867  ;;  %8355 = vmatprep.mubr.msk.f32.mxu1 %vm1569_vm1, %v1902_v25  ;;  %9897 = vrcp.f32 %v2865_v10 }
 0x6ca   : > { %9899 = vrcp.f32 %v2868_v33 }
 0x6cc   : > { %v2871_v4 = vpop.xlane.xlu1 %2870  ;;  %8356 = vmatmul.mubr.msk.f32.vlgmr.msra.gmra.mrb[40].mxu1 %vm1569_vm1, %v8269_v20 }
 0x6cd   : > { %9086 = vmatpush3.bf16.msra.mxu1 %v9083_v31  ;;  %v9611_v51 = vpop.permute.xlu0 %9610  ;;  %8358 = vmatprep.mubr.msk.f32.mxu1 %vm1569_vm1, %v1912_v42  ;;  %v9892_v42 = vpop.eup %9891  ;;  %9901 = vrcp.f32 %v2871_v4 }
 0x6ce   : > { %v9613_v6 = vunpack.i.h.bf16 %v9611_v51  ;;  %v9612_v34 = vunpack.i.l.bf16 %v9611_v51  ;;  %9088 = vmatprep.subr.bf16.mxu1 %v9087_v11 }
 0x6cf   : > { %v9894_v55 = vpop.eup %9893 }
 0x6d0   : > { %v2877_v48 = vpop.xlane.xlu1 %2876  ;;  %8359 = vmatmul.mubr.msk.f32.gmra.mrb[42].mxu1 %vm1569_vm1, %v8272_v32  ;;  %v9091_v23 = vpack.c.bf16 %v9613_v6, %v9612_v34  ;;  %v9896_v51 = vpop.eup %9895 }
 0x6d1   : > { %9090 = vmatpush3.bf16.msra.mxu1 %v9087_v11  ;;  %v9621_v13 = vpop.permute.xlu0 %9620  ;;  %8361 = vmatprep.mubr.msk.f32.mxu1 %vm1569_vm1, %v1922_v49 }
 0x6d2   : > { %v9623_v52 = vunpack.i.h.bf16 %v9621_v13  ;;  %v9622_v25 = vunpack.i.l.bf16 %v9621_v13  ;;  %9092 = vmatprep.subr.bf16.mxu1 %v9091_v23  ;;  %v8457_v20 = vpop.f32.mrb[48].mxu0 }
 0x6d3   : > { %v11322_v5 = vmul.f32 0.25, %v8457_v20  ;;  %v3316_v17 = vpop.f32.mrb[49].mxu0 }
 0x6d4   : > { %v9147_v44 = vpack.c.bf16 %v9623_v52, %v9622_v25  ;;  %v11324_v15 = vmul.f32 0.25, %v3316_v17  ;;  %v2874_v47 = vpop.xlane.xlu1 %2873  ;;  %8362 = vmatmul.mubr.msk.f32.gmra.mrb[44].mxu1 %vm1569_vm1, %v11304_v62  ;;  %v9898_v17 = vpop.eup %9897 }
 0x6d5   : > { %9094 = vmatpush3.bf16.msra.mxu1 %v9091_v23  ;;  %8364 = vmatprep.mubr.msk.f32.mxu1 %vm1569_vm1, %v1932_v59  ;;  %v3366_v32 = vsel %vm1723_vm3, %v11322_v5, -inf  ;;  %v2886_v59 = vmul.f32 %v9892_v42, %v11225_v38  ;;  %v9631_v35 = vpop.permute.xlu0 %9630  ;;  %9903 = vrcp.f32 %v2874_v47  ;;  %v2887_v23 = vmul.f32 %v9894_v55, %v11235_v56  ;;  %v9900_v42 = vpop.eup %9899 }
 0x6d6   : > { %9149 = vmatprep.subr.msk.bf16.mxu0 %vm10829_vm2, %v9147_v44  ;;  %3367 = vmax.xlane.f32.xlu1 %v3366_v32  ;;  %v8460_v49 = vpop.f32.mrb[50].mxu0  ;;  %v3363_v31 = vsel %vm1723_vm3, %v11324_v15, -inf  ;;  %v9632_v10 = vunpack.i.l.bf16 %v9631_v35  ;;  %9905 = vrcp.f32 %v2877_v48  ;;  %v2888_v56 = vmul.f32 %v9896_v51, %v11231_v2 }
 0x6d7   : > { %9152 = vmatpush3.bf16.xpose.msk.msra.mxu0 %vm10829_vm2, %v9147_v44  ;;  %3364 = vmax.xlane.f32.xlu0 %v3363_v31  ;;  %v3326_v62 = vpop.f32.mrb[51].mxu0  ;;  %v11343_v36 = vmul.f32 0.25, %v8460_v49  ;;  %v2889_v31 = vmul.f32 %v9898_v17, %v11239_v7  ;;  %v2890_v2 = vmul.f32 %v9900_v42, %v11241_v37 }
 0x6d8   : > { %v11338_v30 = vmul.f32 0.25, %v3326_v62  ;;  %v9616_v60 = vpop.permute.xlu1 %9615  ;;  %8365 = vmatmul.mubr.msk.f32.gmra.mrb[46].mxu1 %vm1569_vm1, %v11306_v39  ;;  %v9633_v39 = vunpack.i.h.bf16 %v9631_v35  ;;  %v9902_v62 = vpop.eup %9901 }
 0x6d9   : > { %v9618_v28 = vunpack.i.h.bf16 %v9616_v60  ;;  %v9617_v12 = vunpack.i.l.bf16 %v9616_v60  ;;  %8411 = vmatprep.mubr.msk.f32.mxu1 %vm1723_vm3, %v2886_v59  ;;  %v3372_v34 = vsel %vm1723_vm3, %v11343_v36, -inf  ;;  %v9641_v37 = vpop.permute.xlu0 %9640 }
 0x6da   : > { %v8463_v27 = vpop.f32.mrb[52].mxu0  ;;  %v3369_v22 = vsel %vm1723_vm3, %v11338_v30, -inf  ;;  %v9159_v44 = vpack.c.bf16 %v9633_v39, %v9632_v10 }
 0x6db   : > { %v11347_v38 = vmul.f32 0.25, %v8463_v27  ;;  %3370 = vmax.xlane.f32.xlu0 %v3369_v22  ;;  %v3336_v53 = vpop.f32.mrb[53].mxu0  ;;  %v9095_v61 = vpack.c.bf16 %v9618_v28, %v9617_v12  ;;  %v2891_v12 = vmul.f32 %v9902_v62, %v11245_v57  ;;  %v9642_v57 = vunpack.i.l.bf16 %v9641_v37 }
 0x6dc   : > { %v9626_v58 = vpop.permute.xlu1 %9625  ;;  %v11354_v13 = vmul.f32 0.25, %v3336_v53 }
 0x6dd   : > { %v9628_v33 = vunpack.i.h.bf16 %v9626_v58  ;;  %v9627_v11 = vunpack.i.l.bf16 %v9626_v58  ;;  %9096 = vmatprep.subr.bf16.mxu1 %v9095_v61  ;;  %v3378_v4 = vsel %vm1723_vm3, %v11347_v38, -inf }
 0x6de   : > { %3379 = vmax.xlane.f32.xlu1 %v3378_v4  ;;  %9098 = vmatpush3.bf16.msra.mxu1 %v9095_v61  ;;  %v8466_v6 = vpop.f32.mrb[54].mxu0  ;;  %v3375_v49 = vsel %vm1723_vm3, %v11354_v13, -inf  ;;  %v9643_v61 = vunpack.i.h.bf16 %v9641_v37 }
 0x6df   : > { %v9153_v52 = vpack.c.bf16 %v9628_v33, %v9627_v11  ;;  %v11356_v25 = vmul.f32 0.25, %v8466_v6  ;;  %3373 = vmax.xlane.f32.xlu0 %v3372_v34  ;;  %v3346_v20 = vpop.f32.mrb[55].mxu0  ;;  %v9904_v59 = vpop.eup %9903  ;;  %v3047_v33 = vld [vmem:[%s12578_s7 + $0x20] sm:$0xff] }
 0x6e0   : > { %v9636_v47 = vpop.permute.xlu1 %9635  ;;  %v11366_v32 = vmul.f32 0.25, %v3346_v20  ;;  %v9906_v27 = vpop.eup %9905  ;;  %v2892_v7 = vmul.f32 %v9904_v59, %v11264_v46  ;;  %v9187_v55 = vpack.c.bf16 %v9643_v61, %v9642_v57 }
 0x6e1   : > { %8412 = vmatmul.mubr.msk.f32.vlgmr.msra.gmra.mrb[48].mxu1 %vm1723_vm3, %v2887_v23  ;;  %9155 = vmatprep.subr.msk.bf16.mxu0 %vm10829_vm2, %v9153_v52  ;;  %v3384_v48 = vsel %vm1723_vm3, %v11356_v25, -inf  ;;  %v9638_v60 = vunpack.i.h.bf16 %v9636_v47  ;;  %v9637_v35 = vunpack.i.l.bf16 %v9636_v47  ;;  %v2893_v53 = vmul.f32 %v9906_v27, %v11260_v45  ;;  %v9651_v45 = vpop.permute.xlu0 %9650 }
 0x6e2   : > { %9158 = vmatpush3.bf16.xpose.msk.msra.mxu0 %vm10829_vm2, %v9153_v52  ;;  %3385 = vmax.xlane.f32.xlu1 %v3384_v48  ;;  %v3381_v28 = vsel %vm1723_vm3, %v11366_v32, -inf  ;;  %v9653_v4 = vunpack.i.h.bf16 %v9651_v45  ;;  %v9652_v51 = vunpack.i.l.bf16 %v9651_v45 }
 0x6e3   : > { %8414 = vmatprep.mubr.msk.f32.mxu1 %vm1723_vm3, %v2888_v56  ;;  %9161 = vmatprep.subr.msk.bf16.mxu0 %vm10829_vm2, %v9159_v44  ;;  %v9165_v22 = vpack.c.bf16 %v9638_v60, %v9637_v35 }
 0x6e4   : > { %3376 = vmax.xlane.f32.xlu0 %v3375_v49  ;;  %v9646_v46 = vpop.permute.xlu1 %9645  ;;  %v9199_v6 = vpack.c.bf16 %v9653_v4, %v9652_v51 }
 0x6e5   : > { %8415 = vmatmul.mubr.msk.f32.gmra.mrb[50].mxu1 %vm1723_vm3, %v2889_v31  ;;  %v9648_v39 = vunpack.i.h.bf16 %v9646_v46  ;;  %v9647_v58 = vunpack.i.l.bf16 %v9646_v46 }
 0x6e6   : > { %8417 = vmatprep.mubr.msk.f32.mxu1 %vm1723_vm3, %v2890_v2 }
 0x6e7   : > { %v9193_v10 = vpack.c.bf16 %v9648_v39, %v9647_v58 }
 0x6e8   : > { %3382 = vmax.xlane.f32.xlu0 %v3381_v28  ;;  %v9656_v34 = vpop.permute.xlu1 %9655 }
 0x6e9   : > { %8418 = vmatmul.mubr.msk.f32.gmra.mrb[52].mxu1 %vm1723_vm3, %v2891_v12  ;;  %v9658_v23 = vunpack.i.h.bf16 %v9656_v34  ;;  %v9657_v52 = vunpack.i.l.bf16 %v9656_v34 }
 0x6ea   : > { %8420 = vmatprep.mubr.msk.f32.mxu1 %vm1723_vm3, %v2892_v7  ;;  %9164 = vmatpush3.bf16.xpose.msk.msra.mxu0 %vm10829_vm2, %v9159_v44 }
 0x6eb   : > { %9167 = vmatprep.subr.msk.bf16.mxu0 %vm10829_vm2, %v9165_v22  ;;  %v9205_v20 = vpack.c.bf16 %v9658_v23, %v9657_v52 }
 0x6ec   : > { %v4139_v17 = vpop.permute.xlu1 %4138 }
 0x6ed   : > { %8421 = vmatmul.mubr.msk.f32.gmra.mrb[54].mxu1 %vm1723_vm3, %v2893_v53 }
 0x6f0   : > { %v4143_v44 = vpop.permute.xlu1 %4142 }
 0x6f2   : > { %9170 = vmatpush3.bf16.xpose.msk.msra.mxu0 %vm10829_vm2, %v9165_v22 }
 0x6f3   : > { %9189 = vmatprep.subr.msk.bf16.mxu0 %vm10829_vm2, %v9187_v55  ;;  %9665 = vrot.lane.b32.xlu1 %v10703_v40, %s12647_s5  ;;  %v3048_v40 = vld [vmem:[%s12578_s7 + $0x28] sm:$0xff] }
 0x6f4   : > { %v11409_v11 = vpack.c.bf16 %v3048_v40, %v3047_v33  ;;  %v4147_v56 = vpop.permute.xlu1 %4146 }
 0x6f6   : > { %9100 = vmatprep.subr.bf16.mxu1 %v11409_v11 }
 0x6f7   : > { %9102 = vmatpush3.bf16.msra.mxu1 %v11409_v11 }
 0x6f8   : > { %v4151_v49 = vpop.permute.xlu1 %4150 }
 0x6f9   : > { %8528 = vmatmul.mubr.msk.f32.vlgmr.msra.gmra.mrb[56].mxu0 %vm1569_vm1, %v10683_v29 }
 0x6fa   : > { %8530 = vmatprep.mubr.msk.f32.mxu0 %vm1569_vm1, %v10693_v50  ;;  %9192 = vmatpush3.bf16.xpose.msk.msra.mxu0 %vm10829_vm2, %v9187_v55 }
 0x6fb   : > { %9195 = vmatprep.subr.msk.bf16.mxu0 %vm10829_vm2, %v9193_v10 }
 0x6fd   : > { %8531 = vmatmul.mubr.msk.f32.gmra.mrb[58].mxu0 %vm1569_vm1, %v10697_v16 }
 0x6fe   : > { %9660 = vrot.lane.b32.xlu0 %v10689_v8, %s12647_s5  ;;  %8533 = vmatprep.mubr.msk.f32.mxu0 %vm1569_vm1, %v10707_v63  ;;  %v4137_v8 = vpop.permute.xlu0 %4136 }
 0x701   : > { %8534 = vmatmul.mubr.msk.f32.gmra.mrb[60].mxu0 %vm1569_vm1, %v12692_v0 }
 0x702   : > { %8536 = vmatprep.mubr.msk.f32.mxu0 %vm1569_vm1, %v12691_v24  ;;  %9198 = vmatpush3.bf16.xpose.msk.msra.mxu0 %vm10829_vm2, %v9193_v10  ;;  %v4141_v42 = vpop.permute.xlu0 %4140 }
 0x703   : > { %9201 = vmatprep.subr.msk.bf16.mxu0 %vm10829_vm2, %v9199_v6 }
 0x705   : > { %8537 = vmatmul.mubr.msk.f32.gmra.mrb[62].mxu0 %vm1569_vm1, %v12693_v3 }
 0x706   : > { %8583 = vmatprep.mubr.msk.f32.mxu0 %vm1569_vm1, %v4137_v8  ;;  %v4145_v48 = vpop.permute.xlu0 %4144 }
 0x70a   : > { %9204 = vmatpush3.bf16.xpose.msk.msra.mxu0 %vm10829_vm2, %v9199_v6  ;;  %v4149_v47 = vpop.permute.xlu0 %4148 }
 0x70b   : > { %9207 = vmatprep.subr.msk.bf16.mxu0 %vm10829_vm2, %v9205_v20 }
 0x712   : > { %9210 = vmatpush3.bf16.xpose.msk.msra.mxu0 %vm10829_vm2, %v9205_v20 }
 0x719   : > { %8584 = vmatmul.mubr.msk.f32.vlgmr.msra.gmra.mrb[64].mxu0 %vm1569_vm1, %v4139_v17 }
 0x71a   : > { %8586 = vmatprep.mubr.msk.f32.mxu0 %vm1569_vm1, %v4141_v42 }
 0x71d   : > { %8587 = vmatmul.mubr.msk.f32.gmra.mrb[66].mxu0 %vm1569_vm1, %v4143_v44 }
 0x71e   : > { %8589 = vmatprep.mubr.msk.f32.mxu0 %vm1569_vm1, %v4145_v48 }
 0x721   : > { %8590 = vmatmul.mubr.msk.f32.gmra.mrb[68].mxu0 %vm1569_vm1, %v4147_v56 }
 0x722   : > { %8592 = vmatprep.mubr.msk.f32.mxu0 %vm1569_vm1, %v4149_v47 }
 0x725   : > { %8593 = vmatmul.mubr.msk.f32.gmra.mrb[70].mxu0 %vm1569_vm1, %v4151_v49 }
 0x763   : > { %v3368_v31 = vpop.xlane.xlu1 %3367 }
 0x764   : > { %v3388_v62 = vsub.f32 %v11322_v5, %v3368_v31  ;;  %v3365_v2 = vpop.xlane.xlu0 %3364 }
 0x765   : > { %v3387_v59 = vsub.f32 %v11324_v15, %v3365_v2 }
 0x766   : > { %v3397_v60 = vmul.f32 1.442695, %v3388_v62 }
 0x767   : > { %v3395_v35 = vmul.f32 1.442695, %v3387_v59 }
 0x768   : > { %9907 = vpow2.f32 %v3397_v60  ;;  %v3371_v28 = vpop.xlane.xlu0 %3370 }
 0x769   : > { %9909 = vpow2.f32 %v3395_v35  ;;  %v3389_v12 = vsub.f32 %v11338_v30, %v3371_v28 }
 0x76b   : > { %v3399_v27 = vmul.f32 1.442695, %v3389_v12  ;;  %v3380_v7 = vpop.xlane.xlu1 %3379 }
 0x76c   : > { %v3392_v22 = vsub.f32 %v11347_v38, %v3380_v7  ;;  %v3374_v37 = vpop.xlane.xlu0 %3373 }
 0x76d   : > { %9911 = vpow2.f32 %v3399_v27  ;;  %v3390_v53 = vsub.f32 %v11343_v36, %v3374_v37 }
 0x76e   : > { %v3405_v61 = vmul.f32 1.442695, %v3392_v22 }
 0x76f   : > { %v3401_v5 = vmul.f32 1.442695, %v3390_v53  ;;  %v3386_v57 = vpop.xlane.xlu1 %3385 }
 0x770   : > { %v3394_v15 = vsub.f32 %v11356_v25, %v3386_v57 }
 0x771   : > { %9913 = vpow2.f32 %v3401_v5  ;;  %v3377_v55 = vpop.xlane.xlu0 %3376 }
 0x772   : > { %v11449_v46 = vpop.eup %9907  ;;  %v3391_v39 = vsub.f32 %v11354_v13, %v3377_v55  ;;  %9915 = vpow2.f32 %v3405_v61  ;;  %v3409_v58 = vmul.f32 1.442695, %v3394_v15 }
 0x773   : > { %v11452_v30 = vpop.eup %9909  ;;  %v3414_v38 = vsel %vm1723_vm3, %v11449_v46, 0.0 }
 0x774   : > { %v3403_v10 = vmul.f32 1.442695, %v3391_v39  ;;  %3415 = vadd.xlane.f32.xlu1 %v3414_v38  ;;  %v3411_v45 = vsel %vm1723_vm3, %v11452_v30, 0.0 }
 0x775   : > { %v3383_v36 = vpop.xlane.xlu0 %3382  ;;  %3412 = vadd.xlane.f32.xlu0 %v3411_v45 }
 0x776   : > { %9917 = vpow2.f32 %v3403_v10  ;;  %v3393_v25 = vsub.f32 %v11366_v32, %v3383_v36 }
 0x777   : > { %v11459_v33 = vpop.eup %9911  ;;  %9919 = vpow2.f32 %v3409_v58 }
 0x778   : > { %v3407_v13 = vmul.f32 1.442695, %v3393_v25  ;;  %v3417_v40 = vsel %vm1723_vm3, %v11459_v33, 0.0 }
 0x779   : > { %v9661_v4 = vpop.permute.xlu0 %9660  ;;  %3418 = vadd.xlane.f32.xlu0 %v3417_v40 }
 0x77a   : > { %v9663_v51 = vunpack.i.h.bf16 %v9661_v4  ;;  %v9662_v6 = vunpack.i.l.bf16 %v9661_v4  ;;  %9921 = vpow2.f32 %v3407_v13 }
 0x77b   : > { %v11463_v34 = vpop.eup %9913 }
 0x77c   : > { %v3420_v8 = vsel %vm1723_vm3, %v11463_v34, 0.0  ;;  %v9127_v23 = vpack.c.bf16 %v9663_v51, %v9662_v6  ;;  %v11467_v32 = vpop.eup %9915 }
 0x77d   : > { %3421 = vadd.xlane.f32.xlu1 %v3420_v8  ;;  %v3426_v20 = vsel %vm1723_vm3, %v11467_v32, 0.0 }
 0x77e   : > { %9128 = vmatprep.subr.bf16.mxu1 %v9127_v23 }
 0x780   : > { %v11469_v52 = vpop.eup %9917 }
 0x781   : > { %v11473_v17 = vpop.eup %9919  ;;  %3427 = vadd.xlane.f32.xlu1 %v3426_v20  ;;  %v3423_v42 = vsel %vm1723_vm3, %v11469_v52, 0.0 }
 0x782   : > { %3424 = vadd.xlane.f32.xlu0 %v3423_v42  ;;  %v3432_v44 = vsel %vm1723_vm3, %v11473_v17, 0.0 }
 0x784   : > { %v11479_v48 = vpop.eup %9921 }
 0x785   : > { %3433 = vadd.xlane.f32.xlu1 %v3432_v44  ;;  %v3429_v56 = vsel %vm1723_vm3, %v11479_v48, 0.0 }
 0x789   : > { %3430 = vadd.xlane.f32.xlu1 %v3429_v56 }
 0x798   : > { %9670 = vrot.lane.b32.xlu0 %v10721_v1, %s12647_s5  ;;  %v9666_v1 = vpop.permute.xlu1 %9665 }
 0x799   : > { %v9667_v47 = vunpack.i.l.bf16 %v9666_v1 }
 0x79a   : > { %9675 = vrot.lane.b32.xlu1 %v10749_v43, %s12647_s5  ;;  %v9668_v43 = vunpack.i.h.bf16 %v9666_v1 }
 0x79c   : > { %9680 = vrot.lane.b32.xlu0 %v10733_v9, %s12694_s22  ;;  %v9131_v62 = vpack.c.bf16 %v9668_v43, %v9667_v47 }
 0x79e   : > { %9685 = vrot.lane.b32.xlu1 %v10759_v54, %s12694_s22 }
 0x7a0   : > { %9690 = vrot.lane.b32.xlu0 %v10773_v18, %s12694_s22 }
 0x7a2   : > { %9695 = vrot.lane.b32.xlu1 %v10793_v26, %s12694_s22  ;;  %s676_s22 = scalar_lea.vmem %s12592_s21, %s10273_s0 }
 0x7a4   : > { %4820 = vrot.lane.b32.xlu0 %v10681_v19, %s10128_s29 }
 0x7a6   : > { %4822 = vrot.lane.b32.xlu1 %v10683_v29, %s10128_s29 }
 0x7a8   : > { %4824 = vrot.lane.b32.xlu0 %v10693_v50, %s10128_s29 }
 0x7aa   : > { %4826 = vrot.lane.b32.xlu1 %v10697_v16, %s10128_s29 }
 0x7ac   : > { %4828 = vrot.lane.b32.xlu0 %v10707_v63, %s10128_s29 }
 0x7ae   : > { %4830 = vrot.lane.b32.xlu1 %v12692_v0, %s10128_s29 }
 0x7b0   : > { %4832 = vrot.lane.b32.xlu0 %v12691_v24, %s10128_s29 }
 0x7b4   : > { %4834 = vrot.lane.b32.xlu0 %v12693_v3, %s10128_s29  ;;  %v8413_v49 = vpop.f32.mrb[48].mxu1 }
 0x7b5   : > { %v3008_v31 = vpop.f32.mrb[49].mxu1 }
 0x7b6   : > { %8427 = vmatprep.mubr.msk.f32.mxu1 %vm1569_vm1, %v3008_v31 }
 0x7b7   : > { %8428 = vmatmul.mubr.msk.f32.vlgmr.msra.gmra.mrb[40].mxu1 %vm1569_vm1, %v8413_v49 }
 0x7b8   : > { %9130 = vmatpush3.bf16.msra.mxu1 %v9127_v23  ;;  %v8416_v2 = vpop.f32.mrb[50].mxu1 }
 0x7b9   : > { %9132 = vmatprep.subr.bf16.mxu1 %v9131_v62  ;;  %v3018_v59 = vpop.f32.mrb[51].mxu1 }
 0x7ba   : > { %8430 = vmatprep.mubr.msk.f32.mxu1 %vm1569_vm1, %v3018_v59 }
 0x7bb   : > { %8431 = vmatmul.mubr.msk.f32.gmra.mrb[42].mxu1 %vm1569_vm1, %v8416_v2 }
 0x7bc   : > { %9134 = vmatpush3.bf16.msra.mxu1 %v9131_v62  ;;  %v8419_v60 = vpop.f32.mrb[52].mxu1 }
 0x7bd   : > { %v3028_v35 = vpop.f32.mrb[53].mxu1 }
 0x7be   : > { %8433 = vmatprep.mubr.msk.f32.mxu1 %vm1569_vm1, %v3028_v35 }
 0x7bf   : > { %8434 = vmatmul.mubr.msk.f32.gmra.mrb[44].mxu1 %vm1569_vm1, %v8419_v60 }
 0x7c0   : > { %v8422_v28 = vpop.f32.mrb[54].mxu1 }
 0x7c1   : > { %v3038_v12 = vpop.f32.mrb[55].mxu1 }
 0x7c2   : > { %8436 = vmatprep.mubr.msk.f32.mxu1 %vm1569_vm1, %v3038_v12 }
 0x7c3   : > { %8437 = vmatmul.mubr.msk.f32.gmra.mrb[46].mxu1 %vm1569_vm1, %v8422_v28 }
 0x7cc   : > { %v8529_v27 = vpop.f32.mrb[56].mxu0 }
 0x7cd   : > { %v3872_v7 = vpop.f32.mrb[57].mxu0  ;;  %v11519_v22 = vmul.f32 0.25, %v8529_v27 }
 0x7ce   : > { %v11521_v37 = vmul.f32 0.25, %v3872_v7 }
 0x7cf   : > { %v3922_v55 = vsel %vm1723_vm3, %v11519_v22, -inf }
 0x7d0   : > { %v8532_v53 = vpop.f32.mrb[58].mxu0  ;;  %v3919_v61 = vsel %vm1723_vm3, %v11521_v37, -inf }
 0x7d1   : > { %v11525_v5 = vmul.f32 0.25, %v8532_v53  ;;  %v3882_v57 = vpop.f32.mrb[59].mxu0 }
 0x7d2   : > { %v11527_v15 = vmul.f32 0.25, %v3882_v57  ;;  %3920 = vmax.xlane.f32.xlu1 %v3919_v61 }
 0x7d3   : > { %3923 = vmax.xlane.f32.xlu0 %v3922_v55  ;;  %v3928_v36 = vsel %vm1723_vm3, %v11525_v5, -inf }
 0x7d4   : > { %v8535_v39 = vpop.f32.mrb[60].mxu0  ;;  %v3925_v58 = vsel %vm1723_vm3, %v11527_v15, -inf }
 0x7d5   : > { %v11533_v38 = vmul.f32 0.25, %v8535_v39  ;;  %v3892_v10 = vpop.f32.mrb[61].mxu0 }
 0x7d6   : > { %v11537_v45 = vmul.f32 0.25, %v3892_v10  ;;  %3929 = vmax.xlane.f32.xlu1 %v3928_v36 }
 0x7d7   : > { %3926 = vmax.xlane.f32.xlu0 %v3925_v58  ;;  %v3934_v51 = vsel %vm1723_vm3, %v11533_v38, -inf }
 0x7d8   : > { %v8538_v25 = vpop.f32.mrb[62].mxu0  ;;  %v3931_v13 = vsel %vm1723_vm3, %v11537_v45, -inf }
 0x7d9   : > { %v11541_v40 = vmul.f32 0.25, %v8538_v25  ;;  %v3902_v4 = vpop.f32.mrb[63].mxu0 }
 0x7da   : > { %v11545_v6 = vmul.f32 0.25, %v3902_v4  ;;  %3935 = vmax.xlane.f32.xlu1 %v3934_v51  ;;  %v12695_v4 = vld [vmem:[#allocation23_spill] sm:$0xff] }
 0x7db   : > { %3932 = vmax.xlane.f32.xlu0 %v3931_v13  ;;  %v3940_v23 = vsel %vm1723_vm3, %v11541_v40, -inf }
 0x7dc   : > { %v3937_v8 = vsel %vm1723_vm3, %v11545_v6, -inf }
 0x7de   : > { %3941 = vmax.xlane.f32.xlu1 %v3940_v23 }
 0x7df   : > { %3938 = vmax.xlane.f32.xlu0 %v3937_v8 }
 0x7ec   : > { %v8585_v20 = vpop.f32.mrb[64].mxu0 }
 0x7ed   : > { %v11551_v42 = vmul.f32 0.25, %v8585_v20  ;;  %v4266_v44 = vpop.f32.mrb[65].mxu0 }
 0x7ee   : > { %v11553_v56 = vmul.f32 0.25, %v4266_v44 }
 0x7ef   : > { %v4316_v1 = vsel %vm1723_vm3, %v11551_v42, -inf }
 0x7f0   : > { %v8588_v43 = vpop.f32.mrb[66].mxu0  ;;  %4317 = vmax.xlane.f32.xlu1 %v4316_v1  ;;  %v4313_v47 = vsel %vm1723_vm3, %v11553_v56, -inf }
 0x7f1   : > { %v11559_v49 = vmul.f32 0.25, %v8588_v43  ;;  %v4276_v31 = vpop.f32.mrb[67].mxu0  ;;  %4314 = vmax.xlane.f32.xlu0 %v4313_v47  ;;  %v12696_v43 = vld [vmem:[#allocation19_spill] sm:$0xff] }
 0x7f2   : > { %v11561_v62 = vmul.f32 0.25, %v4276_v31 }
 0x7f3   : > { %v4322_v2 = vsel %vm1723_vm3, %v11559_v49, -inf }
 0x7f4   : > { %v8591_v59 = vpop.f32.mrb[68].mxu0  ;;  %4323 = vmax.xlane.f32.xlu1 %v4322_v2  ;;  %v4319_v60 = vsel %vm1723_vm3, %v11561_v62, -inf }
 0x7f5   : > { %v11567_v35 = vmul.f32 0.25, %v8591_v59  ;;  %v4286_v28 = vpop.f32.mrb[69].mxu0  ;;  %4320 = vmax.xlane.f32.xlu0 %v4319_v60 }
 0x7f6   : > { %v11569_v12 = vmul.f32 0.25, %v4286_v28 }
 0x7f7   : > { %v4328_v27 = vsel %vm1723_vm3, %v11567_v35, -inf }
 0x7f8   : > { %v8594_v7 = vpop.f32.mrb[70].mxu0  ;;  %4329 = vmax.xlane.f32.xlu1 %v4328_v27  ;;  %v4325_v53 = vsel %vm1723_vm3, %v11569_v12, -inf }
 0x7f9   : > { %v11575_v61 = vmul.f32 0.25, %v8594_v7  ;;  %v4296_v57 = vpop.f32.mrb[71].mxu0  ;;  %4326 = vmax.xlane.f32.xlu0 %v4325_v53  ;;  %v3604_v53 = vld [vmem:[%s12578_s7 + $0x30] sm:$0xff] }
 0x7fa   : > { %v11577_v55 = vmul.f32 0.25, %v4296_v57  ;;  %v3605_v57 = vld [vmem:[%s12578_s7 + $0x38] sm:$0xff] }
 0x7fb   : > { %v4334_v39 = vsel %vm1723_vm3, %v11575_v61, -inf }
 0x7fc   : > { %4335 = vmax.xlane.f32.xlu1 %v4334_v39  ;;  %v4331_v58 = vsel %vm1723_vm3, %v11577_v55, -inf }
 0x7fd   : > { %4332 = vmax.xlane.f32.xlu0 %v4331_v58 }
 0x801   : > { %v3416_v36 = vpop.xlane.xlu1 %3415 }
 0x802   : > { %v3413_v10 = vpop.xlane.xlu0 %3412 }
 0x803   : > { %9923 = vrcp.f32 %v3413_v10 }
 0x804   : > { %9925 = vrcp.f32 %v3416_v36 }
 0x806   : > { %v3419_v13 = vpop.xlane.xlu0 %3418 }
 0x807   : > { %9927 = vrcp.f32 %v3419_v13 }
 0x80a   : > { %v3422_v25 = vpop.xlane.xlu1 %3421 }
 0x80b   : > { %9929 = vrcp.f32 %v3422_v25  ;;  %v11599_v25 = vpack.c.bf16 %v3605_v57, %v3604_v53 }
 0x80d   : > { %9705 = vrot.lane.b32.xlu1 %v12695_v4, %s10126_s25  ;;  %v9924_v51 = vpop.eup %9923 }
 0x80e   : > { %v3428_v8 = vpop.xlane.xlu1 %3427  ;;  %v3443_v20 = vmul.f32 %v9924_v51, %v11452_v30  ;;  %v9926_v13 = vpop.eup %9925 }
 0x80f   : > { %v3425_v23 = vpop.xlane.xlu0 %3424 }
 0x810   : > { %8483 = vmatprep.mubr.msk.f32.mxu1 %vm1723_vm3, %v3443_v20  ;;  %9931 = vrcp.f32 %v3425_v23 }
 0x811   : > { %9933 = vrcp.f32 %v3428_v8  ;;  %v9928_v23 = vpop.eup %9927 }
 0x812   : > { %v3434_v44 = vpop.xlane.xlu1 %3433 }
 0x813   : > { %v9671_v1 = vpop.permute.xlu0 %9670  ;;  %9700 = vrot.lane.b32.xlu0 %v12696_v43, %s10126_s25 }
 0x814   : > { %v9673_v47 = vunpack.i.h.bf16 %v9671_v1  ;;  %v9672_v31 = vunpack.i.l.bf16 %v9671_v1 }
 0x816   : > { %v3431_v2 = vpop.xlane.xlu1 %3430  ;;  %v9135_v59 = vpack.c.bf16 %v9673_v47, %v9672_v31 }
 0x817   : > { %v9681_v60 = vpop.permute.xlu0 %9680  ;;  %9935 = vrcp.f32 %v3431_v2  ;;  %v3444_v2 = vmul.f32 %v9926_v13, %v11449_v46  ;;  %v12697_v46 = vld [vmem:[#allocation21_spill] sm:$0xff] }
 0x818   : > { %v9683_v28 = vunpack.i.h.bf16 %v9681_v60  ;;  %v9682_v27 = vunpack.i.l.bf16 %v9681_v60  ;;  %9136 = vmatprep.subr.bf16.mxu1 %v9135_v59  ;;  %9937 = vrcp.f32 %v3434_v44  ;;  %v9930_v60 = vpop.eup %9929 }
 0x819   : > { %9138 = vmatpush3.bf16.msra.mxu1 %v9135_v59 }
 0x81a   : > { %v9235_v30 = vpack.c.bf16 %v9683_v28, %v9682_v27  ;;  %v9676_v7 = vpop.permute.xlu1 %9675  ;;  %v3445_v28 = vmul.f32 %v9928_v23, %v11459_v33  ;;  %v9932_v27 = vpop.eup %9931 }
 0x81b   : > { %v9678_v39 = vunpack.i.h.bf16 %v9676_v7  ;;  %v9677_v58 = vunpack.i.l.bf16 %v9676_v7  ;;  %v9691_v10 = vpop.permute.xlu0 %9690  ;;  %v3446_v7 = vmul.f32 %v9930_v60, %v11463_v34  ;;  %v9934_v33 = vpop.eup %9933  ;;  %v3447_v53 = vmul.f32 %v9932_v27, %v11469_v52 }
 0x81c   : > { %9237 = vmatprep.subr.msk.bf16.mxu0 %vm10829_vm2, %v9235_v30  ;;  %v9693_v31 = vunpack.i.h.bf16 %v9691_v10  ;;  %v9692_v8 = vunpack.i.l.bf16 %v9691_v10  ;;  %v3448_v10 = vmul.f32 %v9934_v33, %v11467_v32 }
 0x81d   : > { %9240 = vmatpush3.bf16.xpose.msk.msra.mxu0 %vm10829_vm2, %v9235_v30  ;;  %v9139_v36 = vpack.c.bf16 %v9678_v39, %v9677_v58 }
 0x81e   : > { %v9686_v51 = vpop.permute.xlu1 %9685  ;;  %v9247_v44 = vpack.c.bf16 %v9693_v31, %v9692_v8 }
 0x81f   : > { %v9688_v20 = vunpack.i.h.bf16 %v9686_v51  ;;  %v9687_v1 = vunpack.i.l.bf16 %v9686_v51  ;;  %v4821_v47 = vpop.permute.xlu0 %4820  ;;  %9140 = vmatprep.subr.bf16.mxu1 %v9139_v36 }
 0x820   : > { %8671 = vmatprep.mubr.msk.f32.mxu0 %vm1569_vm1, %v4821_v47  ;;  %9142 = vmatpush3.bf16.msra.mxu1 %v9139_v36 }
 0x821   : > { %v9241_v59 = vpack.c.bf16 %v9688_v20, %v9687_v1  ;;  %9144 = vmatprep.subr.bf16.mxu1 %v11599_v25  ;;  %v9936_v57 = vpop.eup %9935 }
 0x822   : > { %v9696_v30 = vpop.permute.xlu1 %9695  ;;  %v9938_v36 = vpop.eup %9937  ;;  %v3449_v13 = vmul.f32 %v9936_v57, %v11479_v48 }
 0x823   : > { %8484 = vmatmul.mubr.msk.f32.vlgmr.msra.gmra.mrb[56].mxu1 %vm1723_vm3, %v3444_v2  ;;  %9243 = vmatprep.subr.msk.bf16.mxu0 %vm10829_vm2, %v9241_v59  ;;  %v9698_v39 = vunpack.i.h.bf16 %v9696_v30  ;;  %v9697_v58 = vunpack.i.l.bf16 %v9696_v30  ;;  %v3450_v52 = vmul.f32 %v9938_v36, %v11473_v17  ;;  %v4825_v51 = vpop.permute.xlu0 %4824 }
 0x824   : > { %8486 = vmatprep.mubr.msk.f32.mxu1 %vm1723_vm3, %v3445_v28  ;;  %9146 = vmatpush3.bf16.msra.mxu1 %v11599_v25 }
 0x825   : > { %9246 = vmatpush3.bf16.xpose.msk.msra.mxu0 %vm10829_vm2, %v9241_v59  ;;  %9172 = vmatprep.subr.bf16.mxu1 %v12697_v46  ;;  %v9253_v34 = vpack.c.bf16 %v9698_v39, %v9697_v58 }
 0x826   : > { %9249 = vmatprep.subr.msk.bf16.mxu0 %vm10829_vm2, %v9247_v44  ;;  %v4823_v32 = vpop.permute.xlu1 %4822 }
 0x827   : > { %8487 = vmatmul.mubr.msk.f32.gmra.mrb[58].mxu1 %vm1723_vm3, %v3446_v7  ;;  %v4829_v48 = vpop.permute.xlu0 %4828 }
 0x828   : > { %8489 = vmatprep.mubr.msk.f32.mxu1 %vm1723_vm3, %v3447_v53 }
 0x82a   : > { %v4827_v23 = vpop.permute.xlu1 %4826 }
 0x82b   : > { %8490 = vmatmul.mubr.msk.f32.gmra.mrb[60].mxu1 %vm1723_vm3, %v3448_v10  ;;  %v4833_v20 = vpop.permute.xlu0 %4832 }
 0x82c   : > { %8492 = vmatprep.mubr.msk.f32.mxu1 %vm1723_vm3, %v3449_v13 }
 0x82d   : > { %9252 = vmatpush3.bf16.xpose.msk.msra.mxu0 %vm10829_vm2, %v9247_v44 }
 0x82e   : > { %9255 = vmatprep.subr.msk.bf16.mxu0 %vm10829_vm2, %v9253_v34  ;;  %v4831_v17 = vpop.permute.xlu1 %4830 }
 0x82f   : > { %8493 = vmatmul.mubr.msk.f32.gmra.mrb[62].mxu1 %vm1723_vm3, %v3450_v52  ;;  %v4835_v1 = vpop.permute.xlu0 %4834 }
 0x835   : > { %9258 = vmatpush3.bf16.xpose.msk.msra.mxu0 %vm10829_vm2, %v9253_v34 }
 0x83c   : > { %8672 = vmatmul.mubr.msk.f32.vlgmr.msra.gmra.mrb[72].mxu0 %vm1569_vm1, %v4823_v32 }
 0x83d   : > { %8674 = vmatprep.mubr.msk.f32.mxu0 %vm1569_vm1, %v4825_v51 }
 0x840   : > { %8675 = vmatmul.mubr.msk.f32.gmra.mrb[74].mxu0 %vm1569_vm1, %v4827_v23 }
 0x841   : > { %8677 = vmatprep.mubr.msk.f32.mxu0 %vm1569_vm1, %v4829_v48 }
 0x844   : > { %8678 = vmatmul.mubr.msk.f32.gmra.mrb[76].mxu0 %vm1569_vm1, %v4831_v17 }
 0x845   : > { %8680 = vmatprep.mubr.msk.f32.mxu0 %vm1569_vm1, %v4833_v20 }
 0x848   : > { %8681 = vmatmul.mubr.msk.f32.gmra.mrb[78].mxu0 %vm1569_vm1, %v4835_v1 }
 0x85f   : > { %v3921_v47 = vpop.xlane.xlu1 %3920 }
 0x860   : > { %v3943_v31 = vsub.f32 %v11521_v37, %v3921_v47  ;;  %v3924_v8 = vpop.xlane.xlu0 %3923 }
 0x861   : > { %v3944_v2 = vsub.f32 %v11519_v22, %v3924_v8 }
 0x862   : > { %v3951_v59 = vmul.f32 1.442695, %v3943_v31 }
 0x863   : > { %v3953_v60 = vmul.f32 1.442695, %v3944_v2  ;;  %v3930_v28 = vpop.xlane.xlu1 %3929 }
 0x864   : > { %9939 = vpow2.f32 %v3951_v59  ;;  %v3946_v27 = vsub.f32 %v11525_v5, %v3930_v28  ;;  %v3927_v44 = vpop.xlane.xlu0 %3926 }
 0x865   : > { %9941 = vpow2.f32 %v3953_v60  ;;  %v3945_v30 = vsub.f32 %v11527_v15, %v3927_v44 }
 0x866   : > { %v3957_v7 = vmul.f32 1.442695, %v3946_v27 }
 0x867   : > { %v3955_v33 = vmul.f32 1.442695, %v3945_v30  ;;  %v3936_v53 = vpop.xlane.xlu1 %3935 }
 0x868   : > { %9943 = vpow2.f32 %v3957_v7  ;;  %v3948_v57 = vsub.f32 %v11533_v38, %v3936_v53  ;;  %v3933_v37 = vpop.xlane.xlu0 %3932 }
 0x869   : > { %9945 = vpow2.f32 %v3955_v33  ;;  %v3947_v22 = vsub.f32 %v11537_v45, %v3933_v37 }
 0x86a   : > { %v3961_v39 = vmul.f32 1.442695, %v3948_v57 }
 0x86b   : > { %v3959_v58 = vmul.f32 1.442695, %v3947_v22  ;;  %v3942_v10 = vpop.xlane.xlu1 %3941 }
 0x86c   : > { %9947 = vpow2.f32 %v3961_v39  ;;  %v3950_v5 = vsub.f32 %v11541_v40, %v3942_v10  ;;  %v3939_v36 = vpop.xlane.xlu0 %3938 }
 0x86d   : > { %9949 = vpow2.f32 %v3959_v58  ;;  %v3949_v15 = vsub.f32 %v11545_v6, %v3939_v36 }
 0x86e   : > { %v11646_v13 = vpop.eup %9939  ;;  %v3965_v34 = vmul.f32 1.442695, %v3950_v5 }
 0x86f   : > { %v11648_v52 = vpop.eup %9941  ;;  %v3963_v38 = vmul.f32 1.442695, %v3949_v15  ;;  %v3967_v51 = vsel %vm1723_vm3, %v11646_v13, 0.0 }
 0x870   : > { %9951 = vpow2.f32 %v3965_v34  ;;  %3968 = vadd.xlane.f32.xlu0 %v3967_v51  ;;  %v3970_v45 = vsel %vm1723_vm3, %v11648_v52, 0.0 }
 0x871   : > { %9953 = vpow2.f32 %v3963_v38  ;;  %3971 = vadd.xlane.f32.xlu1 %v3970_v45 }
 0x872   : > { %v11654_v40 = vpop.eup %9943 }
 0x873   : > { %v11656_v32 = vpop.eup %9945  ;;  %v3976_v6 = vsel %vm1723_vm3, %v11654_v40, 0.0 }
 0x874   : > { %v3973_v48 = vsel %vm1723_vm3, %v11656_v32, 0.0 }
 0x875   : > { %3977 = vadd.xlane.f32.xlu1 %v3976_v6  ;;  %3974 = vadd.xlane.f32.xlu0 %v3973_v48 }
 0x876   : > { %v11662_v23 = vpop.eup %9947 }
 0x877   : > { %v11664_v20 = vpop.eup %9949  ;;  %v3982_v17 = vsel %vm1723_vm3, %v11662_v23, 0.0 }
 0x878   : > { %v3979_v1 = vsel %vm1723_vm3, %v11664_v20, 0.0 }
 0x879   : > { %3983 = vadd.xlane.f32.xlu1 %v3982_v17  ;;  %3980 = vadd.xlane.f32.xlu0 %v3979_v1 }
 0x87a   : > { %v11670_v47 = vpop.eup %9951 }
 0x87b   : > { %v11672_v31 = vpop.eup %9953  ;;  %v3988_v8 = vsel %vm1723_vm3, %v11670_v47, 0.0 }
 0x87c   : > { %v3985_v2 = vsel %vm1723_vm3, %v11672_v31, 0.0 }
 0x87d   : > { %3989 = vadd.xlane.f32.xlu1 %v3988_v8  ;;  %3986 = vadd.xlane.f32.xlu0 %v3985_v2  ;;  %v4318_v59 = vpop.xlane.xlu1 %4317 }
 0x87e   : > { %v4338_v60 = vsub.f32 %v11551_v42, %v4318_v59  ;;  %v4315_v28 = vpop.xlane.xlu0 %4314 }
 0x87f   : > { %v4337_v27 = vsub.f32 %v11553_v56, %v4315_v28 }
 0x880   : > { %v4347_v44 = vmul.f32 1.442695, %v4338_v60 }
 0x881   : > { %v4345_v30 = vmul.f32 1.442695, %v4337_v27  ;;  %v4324_v7 = vpop.xlane.xlu1 %4323 }
 0x882   : > { %9955 = vpow2.f32 %v4347_v44  ;;  %v4340_v33 = vsub.f32 %v11559_v49, %v4324_v7  ;;  %v4321_v53 = vpop.xlane.xlu0 %4320  ;;  %v12698_v44 = vld [vmem:[#allocation25_spill] sm:$0xff] }
 0x883   : > { %9957 = vpow2.f32 %v4345_v30  ;;  %v4339_v57 = vsub.f32 %v11561_v62, %v4321_v53  ;;  %v12699_v30 = vld [vmem:[#allocation27_spill] sm:$0xff] }
 0x884   : > { %v4351_v37 = vmul.f32 1.442695, %v4340_v33 }
 0x885   : > { %v4349_v22 = vmul.f32 1.442695, %v4339_v57  ;;  %v4330_v39 = vpop.xlane.xlu1 %4329 }
 0x886   : > { %9959 = vpow2.f32 %v4351_v37  ;;  %v4342_v58 = vsub.f32 %v11567_v35, %v4330_v39  ;;  %v4327_v42 = vpop.xlane.xlu0 %4326  ;;  %v12703_v37 = vld [vmem:[#allocation28_spill] sm:$0xff] }
 0x887   : > { %9961 = vpow2.f32 %v4349_v22  ;;  %v4341_v56 = vsub.f32 %v11569_v12, %v4327_v42 }
 0x888   : > { %v4355_v10 = vmul.f32 1.442695, %v4342_v58 }
 0x889   : > { %v4353_v5 = vmul.f32 1.442695, %v4341_v56  ;;  %v4336_v36 = vpop.xlane.xlu1 %4335 }
 0x88a   : > { %9963 = vpow2.f32 %v4355_v10  ;;  %v4344_v49 = vsub.f32 %v11575_v61, %v4336_v36  ;;  %v4333_v15 = vpop.xlane.xlu0 %4332 }
 0x88b   : > { %9965 = vpow2.f32 %v4353_v5  ;;  %v4343_v62 = vsub.f32 %v11577_v55, %v4333_v15 }
 0x88c   : > { %v11686_v34 = vpop.eup %9955  ;;  %v4359_v38 = vmul.f32 1.442695, %v4344_v49 }
 0x88d   : > { %v11688_v51 = vpop.eup %9957  ;;  %v4357_v35 = vmul.f32 1.442695, %v4343_v62  ;;  %v4364_v45 = vsel %vm1723_vm3, %v11686_v34, 0.0 }
 0x88e   : > { %9967 = vpow2.f32 %v4359_v38  ;;  %4365 = vadd.xlane.f32.xlu1 %v4364_v45  ;;  %v4361_v12 = vsel %vm1723_vm3, %v11688_v51, 0.0 }
 0x88f   : > { %4362 = vadd.xlane.f32.xlu0 %v4361_v12  ;;  %9969 = vpow2.f32 %v4357_v35 }
 0x890   : > { %v11694_v61 = vpop.eup %9959 }
 0x891   : > { %v11696_v6 = vpop.eup %9961  ;;  %v4370_v55 = vsel %vm1723_vm3, %v11694_v61, 0.0 }
 0x892   : > { %4371 = vadd.xlane.f32.xlu1 %v4370_v55  ;;  %v4367_v48 = vsel %vm1723_vm3, %v11696_v6, 0.0 }
 0x893   : > { %4368 = vadd.xlane.f32.xlu0 %v4367_v48 }
 0x894   : > { %v11702_v17 = vpop.eup %9963 }
 0x895   : > { %v11704_v1 = vpop.eup %9965  ;;  %v4376_v8 = vsel %vm1723_vm3, %v11702_v17, 0.0 }
 0x896   : > { %4377 = vadd.xlane.f32.xlu1 %v4376_v8  ;;  %v4373_v2 = vsel %vm1723_vm3, %v11704_v1, 0.0 }
 0x897   : > { %4374 = vadd.xlane.f32.xlu0 %v4373_v2 }
 0x898   : > { %v11710_v59 = vpop.eup %9967 }
 0x899   : > { %v4382_v60 = vsel %vm1723_vm3, %v11710_v59, 0.0  ;;  %v11714_v28 = vpop.eup %9969 }
 0x89a   : > { %4383 = vadd.xlane.f32.xlu1 %v4382_v60  ;;  %v4379_v27 = vsel %vm1723_vm3, %v11714_v28, 0.0 }
 0x89e   : > { %4380 = vadd.xlane.f32.xlu1 %v4379_v27 }
 0x8ad   : > { %9710 = vrot.lane.b32.xlu0 %v12698_v44, %s10126_s25 }
 0x8af   : > { %9715 = vrot.lane.b32.xlu1 %v12699_v30, %s10126_s25 }
 0x8b1   : > { %9720 = vrot.lane.b32.xlu0 %v10733_v9, %s12700_s30 }
 0x8b3   : > { %9725 = vrot.lane.b32.xlu1 %v10759_v54, %s12700_s30 }
 0x8b5   : > { %9730 = vrot.lane.b32.xlu0 %v10773_v18, %s12700_s30 }
 0x8b7   : > { %9735 = vrot.lane.b32.xlu1 %v10793_v26, %s12700_s30 }
 0x8b9   : > { %5375 = vrot.lane.b32.xlu0 %v10681_v19, %s12647_s5 }
 0x8bb   : > { %5377 = vrot.lane.b32.xlu1 %v10683_v29, %s12647_s5  ;;  %v9701_v29 = vpop.permute.xlu0 %9700 }
 0x8bc   : > { %v9702_v7 = vunpack.i.l.bf16 %v9701_v29 }
 0x8bd   : > { %5379 = vrot.lane.b32.xlu0 %v10693_v50, %s12647_s5  ;;  %v9706_v50 = vpop.permute.xlu1 %9705 }
 0x8be   : > { %v9708_v10 = vunpack.i.h.bf16 %v9706_v50  ;;  %v9707_v5 = vunpack.i.l.bf16 %v9706_v50 }
 0x8bf   : > { %5381 = vrot.lane.b32.xlu1 %v10697_v16, %s12647_s5 }
 0x8c0   : > { %v9215_v35 = vpack.c.bf16 %v9708_v10, %v9707_v5 }
 0x8c1   : > { %5383 = vrot.lane.b32.xlu0 %v10707_v63, %s12647_s5  ;;  %v12701_v63 = vld [vmem:[#allocation24_spill] sm:$0xff] }
 0x8c3   : > { %5385 = vrot.lane.b32.xlu1 %v12692_v0, %s12647_s5  ;;  %v12702_v0 = vld [vmem:[#allocation26_spill] sm:$0xff] }
 0x8c5   : > { %5387 = vrot.lane.b32.xlu0 %v12691_v24, %s12647_s5 }
 0x8c7   : > { %5389 = vrot.lane.b32.xlu1 %v12693_v3, %s12647_s5 }
 0x8f6   : > { %v8485_v18 = vpop.f32.mrb[56].mxu1 }
 0x8f7   : > { %v3565_v19 = vpop.f32.mrb[57].mxu1 }
 0x8f8   : > { %8499 = vmatprep.mubr.msk.f32.mxu1 %vm1569_vm1, %v3565_v19 }
 0x8f9   : > { %8500 = vmatmul.mubr.msk.f32.vlgmr.msra.gmra.mrb[40].mxu1 %vm1569_vm1, %v8485_v18 }
 0x8fa   : > { %9174 = vmatpush3.bf16.msra.mxu1 %v12697_v46  ;;  %v8488_v16 = vpop.f32.mrb[58].mxu1  ;;  %v9703_v46 = vunpack.i.h.bf16 %v9701_v29 }
 0x8fb   : > { %9176 = vmatprep.subr.bf16.mxu1 %v12701_v63  ;;  %v3575_v9 = vpop.f32.mrb[59].mxu1 }
 0x8fc   : > { %8502 = vmatprep.mubr.msk.f32.mxu1 %vm1569_vm1, %v3575_v9  ;;  %v9211_v42 = vpack.c.bf16 %v9703_v46, %v9702_v7 }
 0x8fd   : > { %v3969_v54 = vpop.xlane.xlu0 %3968  ;;  %8503 = vmatmul.mubr.msk.f32.gmra.mrb[42].mxu1 %vm1569_vm1, %v8488_v16 }
 0x8fe   : > { %v3972_v26 = vpop.xlane.xlu1 %3971  ;;  %9971 = vrcp.f32 %v3969_v54  ;;  %9178 = vmatpush3.bf16.msra.mxu1 %v12701_v63  ;;  %v8491_v24 = vpop.f32.mrb[60].mxu1 }
 0x8ff   : > { %9973 = vrcp.f32 %v3972_v26  ;;  %9180 = vmatprep.subr.bf16.mxu1 %v12702_v0  ;;  %v3585_v3 = vpop.f32.mrb[61].mxu1 }
 0x900   : > { %8505 = vmatprep.mubr.msk.f32.mxu1 %vm1569_vm1, %v3585_v3 }
 0x901   : > { %8506 = vmatmul.mubr.msk.f32.gmra.mrb[44].mxu1 %vm1569_vm1, %v8491_v24 }
 0x902   : > { %v3978_v33 = vpop.xlane.xlu1 %3977  ;;  %v3975_v53 = vpop.xlane.xlu0 %3974  ;;  %9182 = vmatpush3.bf16.msra.mxu1 %v12702_v0 }
 0x903   : > { %9975 = vrcp.f32 %v3978_v33  ;;  %v8494_v57 = vpop.f32.mrb[62].mxu1  ;;  %9184 = vmatprep.subr.bf16.mxu1 %v12703_v37 }
 0x904   : > { %9977 = vrcp.f32 %v3975_v53  ;;  %v3595_v22 = vpop.f32.mrb[63].mxu1 }
 0x905   : > { %8508 = vmatprep.mubr.msk.f32.mxu1 %vm1569_vm1, %v3595_v22 }
 0x906   : > { %v3984_v39 = vpop.xlane.xlu1 %3983  ;;  %v3981_v58 = vpop.xlane.xlu0 %3980  ;;  %8509 = vmatmul.mubr.msk.f32.gmra.mrb[46].mxu1 %vm1569_vm1, %v8494_v57 }
 0x907   : > { %9979 = vrcp.f32 %v3984_v39  ;;  %9186 = vmatpush3.bf16.msra.mxu1 %v12703_v37 }
 0x908   : > { %v9972_v56 = vpop.eup %9971  ;;  %9981 = vrcp.f32 %v3981_v58  ;;  %9212 = vmatprep.subr.bf16.mxu1 %v9211_v42 }
 0x909   : > { %v9974_v36 = vpop.eup %9973  ;;  %v3999_v49 = vmul.f32 %v9972_v56, %v11646_v13 }
 0x90a   : > { %v4000_v15 = vmul.f32 %v9974_v36, %v11648_v52  ;;  %v3990_v62 = vpop.xlane.xlu1 %3989  ;;  %v3987_v38 = vpop.xlane.xlu0 %3986 }
 0x90b   : > { %9983 = vrcp.f32 %v3990_v62  ;;  %8555 = vmatprep.mubr.msk.f32.mxu1 %vm1723_vm3, %v3999_v49 }
 0x90c   : > { %9985 = vrcp.f32 %v3987_v38  ;;  %8556 = vmatmul.mubr.msk.f32.vlgmr.msra.gmra.mrb[64].mxu1 %vm1723_vm3, %v4000_v15 }
 0x90d   : > { %v9976_v45 = vpop.eup %9975  ;;  %9214 = vmatpush3.bf16.msra.mxu1 %v9211_v42 }
 0x90e   : > { %v9978_v12 = vpop.eup %9977  ;;  %9216 = vmatprep.subr.bf16.mxu1 %v9215_v35  ;;  %v4002_v55 = vmul.f32 %v9976_v45, %v11654_v40 }
 0x90f   : > { %v8673_v48 = vpop.f32.mrb[72].mxu0  ;;  %v4001_v13 = vmul.f32 %v9978_v12, %v11656_v32 }
 0x910   : > { %v11767_v8 = vmul.f32 0.25, %v8673_v48  ;;  %v4950_v52 = vpop.f32.mrb[73].mxu0 }
 0x911   : > { %v9980_v2 = vpop.eup %9979  ;;  %8558 = vmatprep.mubr.msk.f32.mxu1 %vm1723_vm3, %v4001_v13  ;;  %v11770_v60 = vmul.f32 0.25, %v4950_v52  ;;  %9218 = vmatpush3.bf16.msra.mxu1 %v9215_v35 }
 0x912   : > { %v9982_v27 = vpop.eup %9981  ;;  %8559 = vmatmul.mubr.msk.f32.gmra.mrb[66].mxu1 %vm1723_vm3, %v4002_v55  ;;  %v5000_v18 = vsel %vm1723_vm3, %v11767_v8, -inf  ;;  %v4004_v40 = vmul.f32 %v9980_v2, %v11662_v23 }
 0x913   : > { %5001 = vmax.xlane.f32.xlu1 %v5000_v18  ;;  %v8676_v19 = vpop.f32.mrb[74].mxu0  ;;  %v4997_v32 = vsel %vm1723_vm3, %v11770_v60, -inf  ;;  %v4003_v29 = vmul.f32 %v9982_v27, %v11664_v20 }
 0x914   : > { %4998 = vmax.xlane.f32.xlu0 %v4997_v32  ;;  %v4960_v50 = vpop.f32.mrb[75].mxu0  ;;  %v11784_v23 = vmul.f32 0.25, %v8676_v19 }
 0x915   : > { %v9984_v16 = vpop.eup %9983  ;;  %8561 = vmatprep.mubr.msk.f32.mxu1 %vm1723_vm3, %v4003_v29  ;;  %v11780_v63 = vmul.f32 0.25, %v4960_v50 }
 0x916   : > { %v9986_v9 = vpop.eup %9985  ;;  %8562 = vmatmul.mubr.msk.f32.gmra.mrb[68].mxu1 %vm1723_vm3, %v4004_v40  ;;  %v4006_v54 = vmul.f32 %v9984_v16, %v11670_v47  ;;  %v5006_v53 = vsel %vm1723_vm3, %v11784_v23, -inf }
 0x917   : > { %v8679_v26 = vpop.f32.mrb[76].mxu0  ;;  %v5003_v24 = vsel %vm1723_vm3, %v11780_v63, -inf  ;;  %v4005_v20 = vmul.f32 %v9986_v9, %v11672_v31 }
 0x918   : > { %v11789_v0 = vmul.f32 0.25, %v8679_v26  ;;  %5004 = vmax.xlane.f32.xlu0 %v5003_v24  ;;  %v4970_v3 = vpop.f32.mrb[77].mxu0 }
 0x919   : > { %8564 = vmatprep.mubr.msk.f32.mxu1 %vm1723_vm3, %v4005_v20  ;;  %v11795_v47 = vmul.f32 0.25, %v4970_v3 }
 0x91a   : > { %8565 = vmatmul.mubr.msk.f32.gmra.mrb[70].mxu1 %vm1723_vm3, %v4006_v54  ;;  %v5012_v46 = vsel %vm1723_vm3, %v11789_v0, -inf }
 0x91b   : > { %5013 = vmax.xlane.f32.xlu1 %v5012_v46  ;;  %v8682_v7 = vpop.f32.mrb[78].mxu0  ;;  %v4366_v33 = vpop.xlane.xlu1 %4365  ;;  %v5009_v42 = vsel %vm1723_vm3, %v11795_v47, -inf }
 0x91c   : > { %v11799_v31 = vmul.f32 0.25, %v8682_v7  ;;  %5007 = vmax.xlane.f32.xlu0 %v5006_v53  ;;  %v4980_v57 = vpop.f32.mrb[79].mxu0  ;;  %v4363_v37 = vpop.xlane.xlu0 %4362 }
 0x91d   : > { %9987 = vrcp.f32 %v4363_v37  ;;  %v11803_v39 = vmul.f32 0.25, %v4980_v57 }
 0x91e   : > { %v5018_v22 = vsel %vm1723_vm3, %v11799_v31, -inf  ;;  %9989 = vrcp.f32 %v4366_v33 }
 0x91f   : > { %5019 = vmax.xlane.f32.xlu1 %v5018_v22  ;;  %v4372_v58 = vpop.xlane.xlu1 %4371  ;;  %v5015_v5 = vsel %vm1723_vm3, %v11803_v39, -inf }
 0x920   : > { %5010 = vmax.xlane.f32.xlu0 %v5009_v42  ;;  %v4369_v56 = vpop.xlane.xlu0 %4368 }
 0x921   : > { %9991 = vrcp.f32 %v4369_v56 }
 0x922   : > { %9993 = vrcp.f32 %v4372_v58 }
 0x923   : > { %v4378_v10 = vpop.xlane.xlu1 %4377 }
 0x924   : > { %5016 = vmax.xlane.f32.xlu0 %v5015_v5  ;;  %v4375_v36 = vpop.xlane.xlu0 %4374 }
 0x925   : > { %9995 = vrcp.f32 %v4375_v36 }
 0x926   : > { %9997 = vrcp.f32 %v4378_v10 }
 0x927   : > { %v9988_v49 = vpop.eup %9987  ;;  %v4384_v15 = vpop.xlane.xlu1 %4383 }
 0x928   : > { %v9711_v62 = vpop.permute.xlu0 %9710  ;;  %v4393_v38 = vmul.f32 %v9988_v49, %v11688_v51  ;;  %v9990_v32 = vpop.eup %9989  ;;  %v5941_v49 = vld [vmem:[%s12580_s9 + $0x18] sm:$0xff] }
 0x929   : > { %v9713_v35 = vunpack.i.h.bf16 %v9711_v62  ;;  %v9712_v45 = vunpack.i.l.bf16 %v9711_v62  ;;  %v4394_v20 = vmul.f32 %v9990_v32, %v11686_v34  ;;  %v12714_v32 = vld [vmem:[#allocation15_spill] sm:$0xff] }
 0x92a   : > { %8611 = vmatprep.mubr.msk.f32.mxu1 %vm1723_vm3, %v4393_v38 }
 0x92b   : > { %v4381_v12 = vpop.xlane.xlu1 %4380  ;;  %v9219_v55 = vpack.c.bf16 %v9713_v35, %v9712_v45  ;;  %v9992_v50 = vpop.eup %9991 }
 0x92c   : > { %v9721_v48 = vpop.permute.xlu0 %9720  ;;  %9999 = vrcp.f32 %v4381_v12  ;;  %v9994_v46 = vpop.eup %9993  ;;  %v4395_v7 = vmul.f32 %v9992_v50, %v11696_v6  ;;  %v12716_v50 = vld [vmem:[#allocation16_spill] sm:$0xff] }
 0x92d   : > { %v9723_v13 = vunpack.i.h.bf16 %v9721_v48  ;;  %v9722_v52 = vunpack.i.l.bf16 %v9721_v48  ;;  %9220 = vmatprep.subr.bf16.mxu1 %v9219_v55  ;;  %10001 = vrcp.f32 %v4384_v15  ;;  %v4396_v34 = vmul.f32 %v9994_v46, %v11694_v61  ;;  %v12724_v46 = vld [vmem:[#allocation4_spill] sm:$0xff] }
 0x92e   : > { %9222 = vmatpush3.bf16.msra.mxu1 %v9219_v55  ;;  %v12704_v55 = vld [vmem:[#allocation7_spill] sm:$0xff] }
 0x92f   : > { %v9279_v2 = vpack.c.bf16 %v9723_v13, %v9722_v52  ;;  %v9716_v27 = vpop.permute.xlu1 %9715  ;;  %v9996_v33 = vpop.eup %9995  ;;  %v12705_v48 = vmax.f32 %v12704_v55, 0.0  ;;  %v12706_v13 = vld [vmem:[#allocation9_spill] sm:$0xff] }
 0x930   : > { %v9718_v18 = vunpack.i.h.bf16 %v9716_v27  ;;  %v9717_v40 = vunpack.i.l.bf16 %v9716_v27  ;;  %9745 = vrot.lane.b32.xlu1 %v12695_v4, %s10128_s29  ;;  %v9731_v51 = vpop.permute.xlu0 %9730  ;;  %v9998_v6 = vpop.eup %9997  ;;  %v4397_v37 = vmul.f32 %v9996_v33, %v11704_v1  ;;  %v12707_v52 = vmax.f32 %v12706_v13, 0.0  ;;  %v12726_v33 = vld [vmem:[#allocation5_spill] sm:$0xff] }
 0x931   : > { %9281 = vmatprep.subr.msk.bf16.mxu0 %vm10829_vm2, %v9279_v2  ;;  %v9733_v26 = vunpack.i.h.bf16 %v9731_v51  ;;  %v9732_v24 = vunpack.i.l.bf16 %v9731_v51  ;;  %v4398_v42 = vmul.f32 %v9998_v6, %v11702_v17  ;;  %v5938_v17 = vld [vmem:[%s12580_s9] sm:$0xff]  ;;  %v12730_v6 = vld [vmem:[#allocation8_spill] sm:$0xff] }
 0x932   : > { %9284 = vmatpush3.bf16.xpose.msk.msra.mxu0 %vm10829_vm2, %v9279_v2  ;;  %v9223_v19 = vpack.c.bf16 %v9718_v18, %v9717_v40  ;;  %v12708_v2 = vld [vmem:[#allocation11_spill] sm:$0xff]  ;;  %v12710_v18 = vld [vmem:[#allocation13_spill] sm:$0xff]  ;;  %v12712_v51 = vld [vmem:[#allocation14_spill] sm:$0xff] }
 0x933   : > { %v9726_v29 = vpop.permute.xlu1 %9725  ;;  %v9291_v53 = vpack.c.bf16 %v9733_v26, %v9732_v24  ;;  %v12709_v27 = vmax.f32 %v12708_v2, 0.0  ;;  %v12711_v40 = vmax.f32 %v12710_v18, 0.0  ;;  %v12720_v26 = vld [vmem:[#allocation2_spill] sm:$0xff] }
 0x934   : > { %v9728_v16 = vunpack.i.h.bf16 %v9726_v29  ;;  %v9727_v9 = vunpack.i.l.bf16 %v9726_v29  ;;  %v5376_v54 = vpop.permute.xlu0 %5375  ;;  %9224 = vmatprep.subr.bf16.mxu1 %v9223_v19  ;;  %v12715_v29 = vmax.f32 %v12714_v32, 0.0  ;;  %v12721_v24 = vmax.f32 %v12720_v26, 0.0 }
 0x935   : > { %9226 = vmatpush3.bf16.msra.mxu1 %v9223_v19  ;;  %8743 = vmatprep.mubr.msk.f32.mxu0 %vm1569_vm1, %v5376_v54  ;;  %v12713_v19 = vmax.f32 %v12712_v51, 0.0 }
 0x936   : > { %v9285_v3 = vpack.c.bf16 %v9728_v16, %v9727_v9  ;;  %9228 = vmatprep.subr.bf16.mxu1 %v11215_v14  ;;  %v10000_v22 = vpop.eup %9999  ;;  %v12717_v16 = vmax.f32 %v12716_v50, 0.0  ;;  %v12718_v9 = vld [vmem:[#allocation17_spill] sm:$0xff] }
 0x937   : > { %v9736_v57 = vpop.permute.xlu1 %9735  ;;  %v10002_v56 = vpop.eup %10001  ;;  %v4399_v61 = vmul.f32 %v10000_v22, %v11714_v28  ;;  %v5939_v28 = vld [vmem:[%s12580_s9 + $0x8] sm:$0xff]  ;;  %v12719_v54 = vmax.f32 %v12718_v9, 0.0  ;;  %v12732_v22 = vld [vmem:[#allocation10_spill] sm:$0xff] }
 0x938   : > { %8612 = vmatmul.mubr.msk.f32.vlgmr.msra.gmra.mrb[72].mxu1 %vm1723_vm3, %v4394_v20  ;;  %9287 = vmatprep.subr.msk.bf16.mxu0 %vm10829_vm2, %v9285_v3  ;;  %v9737_v58 = vunpack.i.l.bf16 %v9736_v57  ;;  %v4400_v1 = vmul.f32 %v10002_v56, %v11710_v59  ;;  %v9323_v5 = vpack.c.bf16 %v5939_v28, %v5938_v17  ;;  %v5940_v59 = vld [vmem:[%s12580_s9 + $0x10] sm:$0xff]  ;;  %v5380_v15 = vpop.permute.xlu0 %5379  ;;  %v12722_v20 = vld [vmem:[#allocation3_spill] sm:$0xff] }
 0x939   : > { %8614 = vmatprep.mubr.msk.f32.mxu1 %vm1723_vm3, %v4395_v7  ;;  %9230 = vmatpush3.bf16.msra.mxu1 %v11215_v14  ;;  %v9738_v14 = vunpack.i.h.bf16 %v9736_v57  ;;  %v9327_v62 = vpack.c.bf16 %v5941_v49, %v5940_v59  ;;  %v12725_v7 = vmax.f32 %v12724_v46, 0.0  ;;  %v12728_v57 = vld [vmem:[#allocation6_spill] sm:$0xff] }
 0x93a   : > { %9740 = vrot.lane.b32.xlu0 %v12696_v43, %s10128_s29  ;;  %9290 = vmatpush3.bf16.xpose.msk.msra.mxu0 %vm10829_vm2, %v9285_v3  ;;  %v12723_v3 = vmax.f32 %v12722_v20, 0.0 }
 0x93b   : > { %9293 = vmatprep.subr.msk.bf16.mxu0 %vm10829_vm2, %v9291_v53  ;;  %9232 = vmatprep.subr.bf16.mxu1 %v11255_v21  ;;  %v9297_v10 = vpack.c.bf16 %v9738_v14, %v9737_v58  ;;  %v5378_v36 = vpop.permute.xlu1 %5377  ;;  %v12733_v14 = vmax.f32 %v12732_v22, 0.0  ;;  %v12734_v58 = vld [vmem:[#allocation12_spill] sm:$0xff] }
 0x93c   : > { %8615 = vmatmul.mubr.msk.f32.gmra.mrb[74].mxu1 %vm1723_vm3, %v4396_v34  ;;  %v5384_v35 = vpop.permute.xlu0 %5383  ;;  %v12729_v34 = vmax.f32 %v12728_v57, 0.0 }
 0x93d   : > { %8617 = vmatprep.mubr.msk.f32.mxu1 %vm1723_vm3, %v4397_v37  ;;  %v12731_v37 = vmax.f32 %v12730_v6, 0.0 }
 0x93f   : > { %v5382_v38 = vpop.permute.xlu1 %5381 }
 0x940   : > { %8618 = vmatmul.mubr.msk.f32.gmra.mrb[76].mxu1 %vm1723_vm3, %v4398_v42  ;;  %v5388_v45 = vpop.permute.xlu0 %5387  ;;  %v12735_v42 = vmax.f32 %v12734_v58, 0.0 }
 0x941   : > { %8620 = vmatprep.mubr.msk.f32.mxu1 %vm1723_vm3, %v4399_v61 }
 0x942   : > { %9296 = vmatpush3.bf16.xpose.msk.msra.mxu0 %vm10829_vm2, %v9291_v53  ;;  %v12727_v53 = vmax.f32 %v12726_v33, 0.0 }
 0x943   : > { %9299 = vmatprep.subr.msk.bf16.mxu0 %vm10829_vm2, %v9297_v10  ;;  %v5386_v41 = vpop.permute.xlu1 %5385 }
 0x944   : > { %8621 = vmatmul.mubr.msk.f32.gmra.mrb[78].mxu1 %vm1723_vm3, %v4400_v1 }
 0x947   : > { %v5390_v12 = vpop.permute.xlu1 %5389 }
 0x94a   : > { %9302 = vmatpush3.bf16.xpose.msk.msra.mxu0 %vm10829_vm2, %v9297_v10 }
 0x94b   : > { %9324 = vmatprep.subr.bf16.mxu0 %v9323_v5 }
 0x951   : > { %8744 = vmatmul.mubr.msk.f32.vlgmr.msra.gmra.mrb[80].mxu0 %vm1569_vm1, %v5378_v36 }
 0x952   : > { %8746 = vmatprep.mubr.msk.f32.mxu0 %vm1569_vm1, %v5380_v15  ;;  %9326 = vmatpush3.bf16.msra.mxu0 %v9323_v5 }
 0x953   : > { %9328 = vmatprep.subr.bf16.mxu0 %v9327_v62 }
 0x955   : > { %8747 = vmatmul.mubr.msk.f32.gmra.mrb[82].mxu0 %vm1569_vm1, %v5382_v38 }
 0x956   : > { %8749 = vmatprep.mubr.msk.f32.mxu0 %vm1569_vm1, %v5384_v35  ;;  %9330 = vmatpush3.bf16.msra.mxu0 %v9327_v62 }
 0x957   : > { %9340 = vmatprep.subr.bf16.mxu0 %v9323_v5 }
 0x959   : > { %8750 = vmatmul.mubr.msk.f32.gmra.mrb[84].mxu0 %vm1569_vm1, %v5386_v41 }
 0x95a   : > { %8752 = vmatprep.mubr.msk.f32.mxu0 %vm1569_vm1, %v5388_v45 }
 0x95d   : > { %8753 = vmatmul.mubr.msk.f32.gmra.mrb[86].mxu0 %vm1569_vm1, %v5390_v12 }
 0x95e   : > { %8807 = vmatprep.mubr.msk.f32.mxu0 %vm704_vm0, %v12705_v48 }
 0x961   : > { %8808 = vmatmul.mubr.msk.f32.vlgmr.msra.gmra.mrb[88].mxu0 %vm704_vm0, %v12707_v52 }
 0x962   : > { %8810 = vmatprep.mubr.msk.f32.mxu0 %vm704_vm0, %v12709_v27  ;;  %9342 = vmatpush3.bf16.msra.mxu0 %v9323_v5 }
 0x963   : > { %9344 = vmatprep.subr.bf16.mxu0 %v9327_v62 }
 0x965   : > { %8811 = vmatmul.mubr.msk.f32.gmra.mrb[90].mxu0 %vm704_vm0, %v12711_v40 }
 0x966   : > { %8813 = vmatprep.mubr.msk.f32.mxu0 %vm704_vm0, %v12713_v19  ;;  %9346 = vmatpush3.bf16.msra.mxu0 %v9327_v62 }
 0x969   : > { %8814 = vmatmul.mubr.msk.f32.gmra.mrb[92].mxu0 %vm704_vm0, %v12715_v29 }
 0x96a   : > { %8816 = vmatprep.mubr.msk.f32.mxu0 %vm704_vm0, %v12717_v16 }
 0x96d   : > { %8817 = vmatmul.mubr.msk.f32.gmra.mrb[94].mxu0 %vm704_vm0, %v12719_v54 }
 0x96e   : > { %8847 = vmatprep.mubr.msk.f32.mxu0 %vm704_vm0, %v12721_v24 }
 0x971   : > { %8848 = vmatmul.mubr.msk.f32.vlgmr.msra.gmra.mrb[96].mxu0 %vm704_vm0, %v12723_v3 }
 0x972   : > { %8850 = vmatprep.mubr.msk.f32.mxu0 %vm704_vm0, %v12725_v7 }
 0x975   : > { %8851 = vmatmul.mubr.msk.f32.gmra.mrb[98].mxu0 %vm704_vm0, %v12727_v53 }
 0x976   : > { %8853 = vmatprep.mubr.msk.f32.mxu0 %vm704_vm0, %v12729_v34 }
 0x979   : > { %8854 = vmatmul.mubr.msk.f32.gmra.mrb[100].mxu0 %vm704_vm0, %v12731_v37 }
 0x97a   : > { %8856 = vmatprep.mubr.msk.f32.mxu0 %vm704_vm0, %v12733_v14 }
 0x97d   : > { %8857 = vmatmul.mubr.msk.f32.gmra.mrb[102].mxu0 %vm704_vm0, %v12735_v42 }
 0x9a0   : > { %v5002_v56 = vpop.xlane.xlu1 %5001 }
 0x9a1   : > { %v5022_v61 = vsub.f32 %v11767_v8, %v5002_v56  ;;  %v4999_v10 = vpop.xlane.xlu0 %4998 }
 0x9a2   : > { %v5021_v1 = vsub.f32 %v11770_v60, %v4999_v10 }
 0x9a3   : > { %v5031_v17 = vmul.f32 1.442695, %v5022_v61 }
 0x9a4   : > { %v5029_v28 = vmul.f32 1.442695, %v5021_v1 }
 0x9a5   : > { %10003 = vpow2.f32 %v5031_v17  ;;  %v5005_v5 = vpop.xlane.xlu0 %5004 }
 0x9a6   : > { %10005 = vpow2.f32 %v5029_v28  ;;  %v5023_v36 = vsub.f32 %v11780_v63, %v5005_v5 }
 0x9a8   : > { %v5033_v59 = vmul.f32 1.442695, %v5023_v36  ;;  %v5014_v49 = vpop.xlane.xlu1 %5013 }
 0x9a9   : > { %v5026_v15 = vsub.f32 %v11789_v0, %v5014_v49  ;;  %v5008_v62 = vpop.xlane.xlu0 %5007 }
 0x9aa   : > { %10007 = vpow2.f32 %v5033_v59  ;;  %v5024_v38 = vsub.f32 %v11784_v23, %v5008_v62 }
 0x9ab   : > { %v5039_v35 = vmul.f32 1.442695, %v5026_v15 }
 0x9ac   : > { %v5035_v8 = vmul.f32 1.442695, %v5024_v38  ;;  %v5020_v41 = vpop.xlane.xlu1 %5019 }
 0x9ad   : > { %v5028_v60 = vsub.f32 %v11799_v31, %v5020_v41  ;;  %v5011_v45 = vpop.xlane.xlu0 %5010 }
 0x9ae   : > { %10009 = vpow2.f32 %v5035_v8  ;;  %v5025_v12 = vsub.f32 %v11795_v47, %v5011_v45 }
 0x9af   : > { %v11923_v55 = vpop.eup %10003  ;;  %10011 = vpow2.f32 %v5039_v35  ;;  %v5043_v48 = vmul.f32 1.442695, %v5028_v60 }
 0x9b0   : > { %v11925_v63 = vpop.eup %10005  ;;  %v5037_v0 = vmul.f32 1.442695, %v5025_v12  ;;  %v5048_v13 = vsel %vm1723_vm3, %v11923_v55, 0.0  ;;  %v9746_v61 = vpop.permute.xlu1 %9745 }
 0x9b1   : > { %5049 = vadd.xlane.f32.xlu1 %v5048_v13  ;;  %v5017_v23 = vpop.xlane.xlu0 %5016  ;;  %v5045_v52 = vsel %vm1723_vm3, %v11925_v63, 0.0  ;;  %v9748_v17 = vunpack.i.h.bf16 %v9746_v61 }
 0x9b2   : > { %10013 = vpow2.f32 %v5037_v0  ;;  %v5027_v31 = vsub.f32 %v11803_v39, %v5017_v23  ;;  %5046 = vadd.xlane.f32.xlu0 %v5045_v52 }
 0x9b3   : > { %10015 = vpow2.f32 %v5043_v48 }
 0x9b4   : > { %v11932_v47 = vpop.eup %10007  ;;  %v5041_v2 = vmul.f32 1.442695, %v5027_v31 }
 0x9b5   : > { %v5051_v27 = vsel %vm1723_vm3, %v11932_v47, 0.0  ;;  %v9741_v53 = vpop.permute.xlu0 %9740 }
 0x9b6   : > { %5052 = vadd.xlane.f32.xlu0 %v5051_v27  ;;  %10017 = vpow2.f32 %v5041_v2  ;;  %v9743_v57 = vunpack.i.h.bf16 %v9741_v53  ;;  %v9742_v34 = vunpack.i.l.bf16 %v9741_v53 }
 0x9b8   : > { %v11936_v18 = vpop.eup %10009  ;;  %v9259_v22 = vpack.c.bf16 %v9743_v57, %v9742_v34 }
 0x9b9   : > { %v5054_v40 = vsel %vm1723_vm3, %v11936_v18, 0.0  ;;  %v11940_v51 = vpop.eup %10011 }
 0x9ba   : > { %5055 = vadd.xlane.f32.xlu1 %v5054_v40  ;;  %v5060_v39 = vsel %vm1723_vm3, %v11940_v51, 0.0 }
 0x9bc   : > { %v11942_v19 = vpop.eup %10013 }
 0x9bd   : > { %v5057_v32 = vsel %vm1723_vm3, %v11942_v19, 0.0  ;;  %v11948_v29 = vpop.eup %10015 }
 0x9be   : > { %5061 = vadd.xlane.f32.xlu1 %v5060_v39  ;;  %5058 = vadd.xlane.f32.xlu0 %v5057_v32  ;;  %v5066_v50 = vsel %vm1723_vm3, %v11948_v29, 0.0 }
 0x9c0   : > { %v11952_v16 = vpop.eup %10017 }
 0x9c1   : > { %v5063_v9 = vsel %vm1723_vm3, %v11952_v16, 0.0 }
 0x9c2   : > { %5067 = vadd.xlane.f32.xlu1 %v5066_v50 }
 0x9c6   : > { %5064 = vadd.xlane.f32.xlu1 %v5063_v9 }
 0x9d4   : > { %9750 = vrot.lane.b32.xlu0 %v12698_v44, %s10128_s29 }
 0x9d7   : > { %9755 = vrot.lane.b32.xlu1 %v12699_v30, %s10128_s29  ;;  %s12736_s29 = smov 80  }
 0x9df   : > { %v8557_v54 = vpop.f32.mrb[64].mxu1 }
 0x9e0   : > { %v4097_v26 = vpop.f32.mrb[65].mxu1 }
 0x9e5   : > { %v8560_v24 = vpop.f32.mrb[66].mxu1 }
 0x9e6   : > { %v4107_v20 = vpop.f32.mrb[67].mxu1 }
 0x9e9   : > { %v8563_v3 = vpop.f32.mrb[68].mxu1 }
 0x9ea   : > { %v4117_v46 = vpop.f32.mrb[69].mxu1 }
 0x9ed   : > { %v8566_v7 = vpop.f32.mrb[70].mxu1 }
 0x9ee   : > { %v4127_v33 = vpop.f32.mrb[71].mxu1 }
 0xa0b   : > { %v8613_v6 = vpop.f32.mrb[72].mxu1 }
 0xa0c   : > { %v4523_v37 = vpop.f32.mrb[73].mxu1 }
 0xa0d   : > { %8627 = vmatprep.mubr.msk.f32.mxu1 %vm1569_vm1, %v4523_v37 }
 0xa0e   : > { %8628 = vmatmul.mubr.msk.f32.vlgmr.msra.gmra.mrb[80].mxu1 %vm1569_vm1, %v8613_v6 }
 0xa0f   : > { %9234 = vmatpush3.bf16.msra.mxu1 %v11255_v21  ;;  %v8616_v14 = vpop.f32.mrb[74].mxu1  ;;  %v9747_v21 = vunpack.i.l.bf16 %v9746_v61 }
 0xa10   : > { %9260 = vmatprep.subr.bf16.mxu1 %v9259_v22  ;;  %v4533_v58 = vpop.f32.mrb[75].mxu1 }
 0xa11   : > { %8630 = vmatprep.mubr.msk.f32.mxu1 %vm1569_vm1, %v4533_v58  ;;  %v9263_v28 = vpack.c.bf16 %v9748_v17, %v9747_v21 }
 0xa12   : > { %8631 = vmatmul.mubr.msk.f32.gmra.mrb[82].mxu1 %vm1569_vm1, %v8616_v14 }
 0xa13   : > { %v8619_v42 = vpop.f32.mrb[76].mxu1 }
 0xa14   : > { %v4543_v56 = vpop.f32.mrb[77].mxu1 }
 0xa15   : > { %8633 = vmatprep.mubr.msk.f32.mxu1 %vm1569_vm1, %v4543_v56 }
 0xa16   : > { %8634 = vmatmul.mubr.msk.f32.gmra.mrb[84].mxu1 %vm1569_vm1, %v8619_v42 }
 0xa17   : > { %v8622_v10 = vpop.f32.mrb[78].mxu1 }
 0xa18   : > { %v4553_v1 = vpop.f32.mrb[79].mxu1 }
 0xa19   : > { %8636 = vmatprep.mubr.msk.f32.mxu1 %vm1569_vm1, %v4553_v1 }
 0xa1a   : > { %8637 = vmatmul.mubr.msk.f32.gmra.mrb[86].mxu1 %vm1569_vm1, %v8622_v10 }
 0xa1b   : > { %8643 = vmatprep.mubr.msk.f32.mxu1 %vm1569_vm1, %v4097_v26 }
 0xa1e   : > { %8644 = vmatmul.mubr.msk.f32.vlgmr.msra.gmra.mrb[80].mxu1 %vm1569_vm1, %v8557_v54 }
 0xa1f   : > { %9262 = vmatpush3.bf16.msra.mxu1 %v9259_v22  ;;  %8646 = vmatprep.mubr.msk.f32.mxu1 %vm1569_vm1, %v4107_v20 }
 0xa20   : > { %9264 = vmatprep.subr.bf16.mxu1 %v9263_v28 }
 0xa22   : > { %8647 = vmatmul.mubr.msk.f32.gmra.mrb[82].mxu1 %vm1569_vm1, %v8560_v24 }
 0xa23   : > { %9266 = vmatpush3.bf16.msra.mxu1 %v9263_v28  ;;  %8649 = vmatprep.mubr.msk.f32.mxu1 %vm1569_vm1, %v4117_v46 }
 0xa24   : > { %v8745_v5 = vpop.f32.mrb[80].mxu0 }
 0xa25   : > { %v11974_v36 = vmul.f32 0.25, %v8745_v5  ;;  %v5505_v59 = vpop.f32.mrb[81].mxu0 }
 0xa26   : > { %v11976_v49 = vmul.f32 0.25, %v5505_v59  ;;  %8650 = vmatmul.mubr.msk.f32.gmra.mrb[84].mxu1 %vm1569_vm1, %v8563_v3 }
 0xa27   : > { %8652 = vmatprep.mubr.msk.f32.mxu1 %vm1569_vm1, %v4127_v33  ;;  %v5555_v15 = vsel %vm1723_vm3, %v11974_v36, -inf }
 0xa28   : > { %v8748_v62 = vpop.f32.mrb[82].mxu0  ;;  %5556 = vmax.xlane.f32.xlu1 %v5555_v15  ;;  %v5552_v38 = vsel %vm1723_vm3, %v11976_v49, -inf }
 0xa29   : > { %v5515_v35 = vpop.f32.mrb[83].mxu0  ;;  %5553 = vmax.xlane.f32.xlu0 %v5552_v38  ;;  %v11987_v41 = vmul.f32 0.25, %v8748_v62 }
 0xa2a   : > { %v11984_v8 = vmul.f32 0.25, %v5515_v35  ;;  %8653 = vmatmul.mubr.msk.f32.gmra.mrb[86].mxu1 %vm1569_vm1, %v8566_v7 }
 0xa2b   : > { %v5561_v52 = vsel %vm1723_vm3, %v11987_v41, -inf }
 0xa2c   : > { %v8751_v60 = vpop.f32.mrb[84].mxu0  ;;  %v5558_v45 = vsel %vm1723_vm3, %v11984_v8, -inf }
 0xa2d   : > { %v11991_v12 = vmul.f32 0.25, %v8751_v60  ;;  %v5525_v48 = vpop.f32.mrb[85].mxu0  ;;  %5559 = vmax.xlane.f32.xlu0 %v5558_v45 }
 0xa2e   : > { %v11995_v13 = vmul.f32 0.25, %v5525_v48 }
 0xa2f   : > { %v5567_v0 = vsel %vm1723_vm3, %v11991_v12, -inf }
 0xa30   : > { %v8754_v23 = vpop.f32.mrb[86].mxu0  ;;  %5568 = vmax.xlane.f32.xlu1 %v5567_v0  ;;  %v5564_v32 = vsel %vm1723_vm3, %v11995_v13, -inf }
 0xa31   : > { %v11999_v31 = vmul.f32 0.25, %v8754_v23  ;;  %v5535_v2 = vpop.f32.mrb[87].mxu0  ;;  %5562 = vmax.xlane.f32.xlu0 %v5561_v52 }
 0xa32   : > { %v12003_v40 = vmul.f32 0.25, %v5535_v2 }
 0xa33   : > { %v5573_v27 = vsel %vm1723_vm3, %v11999_v31, -inf }
 0xa34   : > { %v12005_v39 = vpop.f32.mrb[88].mxu0  ;;  %5574 = vmax.xlane.f32.xlu1 %v5573_v27  ;;  %v5570_v54 = vsel %vm1723_vm3, %v12003_v40, -inf }
 0xa35   : > { %v12009_v50 = vpop.f32.mrb[89].mxu0  ;;  %5565 = vmax.xlane.f32.xlu0 %v5564_v32 }
 0xa38   : > { %v12011_v9 = vpop.f32.mrb[90].mxu0 }
 0xa39   : > { %v12015_v26 = vpop.f32.mrb[91].mxu0  ;;  %5571 = vmax.xlane.f32.xlu0 %v5570_v54 }
 0xa3c   : > { %v12017_v24 = vpop.f32.mrb[92].mxu0 }
 0xa3d   : > { %v12019_v20 = vpop.f32.mrb[93].mxu0 }
 0xa3e   : > { %v5050_v33 = vpop.xlane.xlu1 %5049 }
 0xa3f   : > { %v5047_v3 = vpop.xlane.xlu0 %5046 }
 0xa40   : > { %10019 = vrcp.f32 %v5047_v3  ;;  %v12021_v46 = vpop.f32.mrb[94].mxu0 }
 0xa41   : > { %v12023_v7 = vpop.f32.mrb[95].mxu0  ;;  %10021 = vrcp.f32 %v5050_v33 }
 0xa43   : > { %v5053_v34 = vpop.xlane.xlu0 %5052 }
 0xa44   : > { %v12025_v53 = vpop.f32.mrb[96].mxu0  ;;  %10023 = vrcp.f32 %v5053_v34 }
 0xa45   : > { %v12027_v57 = vpop.f32.mrb[97].mxu0  ;;  %9765 = vrot.lane.b32.xlu1 %v12695_v4, %s12736_s29 }
 0xa47   : > { %v5056_v6 = vpop.xlane.xlu1 %5055 }
 0xa48   : > { %v12031_v37 = vpop.f32.mrb[98].mxu0  ;;  %10025 = vrcp.f32 %v5056_v6 }
 0xa49   : > { %v12033_v22 = vpop.f32.mrb[99].mxu0 }
 0xa4a   : > { %v10020_v14 = vpop.eup %10019 }
 0xa4b   : > { %v5062_v58 = vpop.xlane.xlu1 %5061  ;;  %v5059_v42 = vpop.xlane.xlu0 %5058  ;;  %v5077_v56 = vmul.f32 %v10020_v14, %v11925_v63 }
 0xa4c   : > { %v12036_v61 = vpop.f32.mrb[100].mxu0  ;;  %10027 = vrcp.f32 %v5059_v42  ;;  %v10022_v35 = vpop.eup %10021 }
 0xa4d   : > { %8699 = vmatprep.mubr.msk.f32.mxu1 %vm1723_vm3, %v5077_v56  ;;  %v12039_v10 = vpop.f32.mrb[101].mxu0  ;;  %10029 = vrcp.f32 %v5062_v58  ;;  %v5078_v45 = vmul.f32 %v10022_v35, %v11923_v55 }
 0xa4e   : > { %v10024_v60 = vpop.eup %10023 }
 0xa4f   : > { %v5068_v1 = vpop.xlane.xlu1 %5067  ;;  %v9751_v17 = vpop.permute.xlu0 %9750  ;;  %9760 = vrot.lane.b32.xlu0 %v12696_v43, %s12736_s29  ;;  %v5079_v0 = vmul.f32 %v10024_v60, %v11932_v47 }
 0xa50   : > { %v9753_v4 = vunpack.i.h.bf16 %v9751_v17  ;;  %v9752_v21 = vunpack.i.l.bf16 %v9751_v17  ;;  %v12043_v28 = vpop.f32.mrb[102].mxu0 }
 0xa51   : > { %v12045_v5 = vpop.f32.mrb[103].mxu0 }
 0xa52   : > { %v9267_v63 = vpack.c.bf16 %v9753_v4, %v9752_v21  ;;  %v10026_v48 = vpop.eup %10025 }
 0xa53   : > { %v5065_v59 = vpop.xlane.xlu1 %5064  ;;  %v5080_v52 = vmul.f32 %v10026_v48, %v11936_v18 }
 0xa54   : > { %9268 = vmatprep.subr.bf16.mxu1 %v9267_v63  ;;  %10031 = vrcp.f32 %v5065_v59 }
 0xa55   : > { %9270 = vmatpush3.bf16.msra.mxu1 %v9267_v63  ;;  %10033 = vrcp.f32 %v5068_v1 }
 0xa56   : > { %v10028_v23 = vpop.eup %10027 }
 0xa57   : > { %v9756_v15 = vpop.permute.xlu1 %9755  ;;  %v10030_v2 = vpop.eup %10029  ;;  %v5081_v27 = vmul.f32 %v10028_v23, %v11942_v19 }
 0xa58   : > { %v9758_v62 = vunpack.i.h.bf16 %v9756_v15  ;;  %v9757_v38 = vunpack.i.l.bf16 %v9756_v15  ;;  %v5082_v55 = vmul.f32 %v10030_v2, %v11940_v51 }
 0xa5a   : > { %v9271_v43 = vpack.c.bf16 %v9758_v62, %v9757_v38 }
 0xa5c   : > { %9272 = vmatprep.subr.bf16.mxu1 %v9271_v43 }
 0xa5d   : > { %9274 = vmatpush3.bf16.msra.mxu1 %v9271_v43 }
 0xa5e   : > { %9276 = vmatprep.subr.bf16.mxu1 %v11409_v11  ;;  %v10032_v32 = vpop.eup %10031 }
 0xa5f   : > { %v10034_v47 = vpop.eup %10033  ;;  %v5083_v54 = vmul.f32 %v10032_v32, %v11952_v16 }
 0xa60   : > { %8700 = vmatmul.mubr.msk.f32.vlgmr.msra.gmra.mrb[88].mxu1 %vm1723_vm3, %v5078_v45 }
 0xa61   : > { %8702 = vmatprep.mubr.msk.f32.mxu1 %vm1723_vm3, %v5079_v0  ;;  %9278 = vmatpush3.bf16.msra.mxu1 %v11409_v11  ;;  %v5084_v11 = vmul.f32 %v10034_v47, %v11948_v29 }
 0xa64   : > { %8703 = vmatmul.mubr.msk.f32.gmra.mrb[90].mxu1 %vm1723_vm3, %v5080_v52 }
 0xa65   : > { %8705 = vmatprep.mubr.msk.f32.mxu1 %vm1723_vm3, %v5081_v27 }
 0xa68   : > { %8706 = vmatmul.mubr.msk.f32.gmra.mrb[92].mxu1 %vm1723_vm3, %v5082_v55 }
 0xa69   : > { %8708 = vmatprep.mubr.msk.f32.mxu1 %vm1723_vm3, %v5083_v54 }
 0xa6c   : > { %8709 = vmatmul.mubr.msk.f32.gmra.mrb[94].mxu1 %vm1723_vm3, %v5084_v11  ;;  %v7666_v11 = vld [vmem:[%s12581_s10] ss:$0 sm:$0xff] }
 0xab5   : > { %v5557_v18 = vpop.xlane.xlu1 %5556 }
 0xab6   : > { %v5577_v19 = vsub.f32 %v11974_v36, %v5557_v18  ;;  %v5554_v3 = vpop.xlane.xlu0 %5553  ;;  %v12114_v18 = vadd.f32 %v7666_v11, %v12009_v50  ;;  %v12130_v50 = vadd.f32 %v12017_v24, %v7666_v11 }
 0xab7   : > { %v5576_v33 = vsub.f32 %v11976_v49, %v5554_v3 }
 0xab8   : > { %v5586_v34 = vmul.f32 1.442695, %v5577_v19  ;;  %v12117_v19 = vadd.f32 %v7666_v11, %v12015_v26  ;;  %v6056_v3 = vsel %vm704_vm0, %v12114_v18, 0.0  ;;  %v12133_v26 = vadd.f32 %v7666_v11, %v12019_v20 }
 0xab9   : > { %v5584_v6 = vmul.f32 1.442695, %v5576_v33  ;;  %v12122_v33 = vadd.f32 %v12005_v39, %v7666_v11  ;;  %v6071_v20 = vsel %vm704_vm0, %v12130_v50, 0.0 }
 0xaba   : > { %10035 = vpow2.f32 %v5586_v34  ;;  %v5560_v51 = vpop.xlane.xlu0 %5559  ;;  %v6068_v24 = vsel %vm704_vm0, %v12133_v26, 0.0 }
 0xabb   : > { %10037 = vpow2.f32 %v5584_v6  ;;  %v5578_v16 = vsub.f32 %v11984_v8, %v5560_v51  ;;  %v6059_v39 = vsel %vm704_vm0, %v12122_v33, 0.0  ;;  %v12143_v6 = vadd.f32 %v7666_v11, %v12023_v7 }
 0xabc   : > { %v12150_v51 = vadd.f32 %v12025_v53, %v7666_v11 }
 0xabd   : > { %v5588_v14 = vmul.f32 1.442695, %v5578_v16  ;;  %v5569_v58 = vpop.xlane.xlu1 %5568  ;;  %v12153_v16 = vadd.f32 %v7666_v11, %v12027_v57 }
 0xabe   : > { %v5581_v42 = vsub.f32 %v11991_v12, %v5569_v58  ;;  %v5563_v29 = vpop.xlane.xlu0 %5562  ;;  %v12163_v58 = vadd.f32 %v7666_v11, %v12033_v22  ;;  %v6444_v57 = vsel %vm704_vm0, %v12150_v51, 0.0 }
 0xabf   : > { %10039 = vpow2.f32 %v5588_v14  ;;  %v5579_v56 = vsub.f32 %v11987_v41, %v5563_v29  ;;  %v12160_v14 = vadd.f32 %v12031_v37, %v7666_v11  ;;  %v6441_v53 = vsel %vm704_vm0, %v12153_v16, 0.0 }
 0xac0   : > { %v5594_v1 = vmul.f32 1.442695, %v5581_v42  ;;  %v12170_v42 = vadd.f32 %v12036_v61, %v7666_v11  ;;  %v12173_v29 = vadd.f32 %v7666_v11, %v12039_v10  ;;  %v6447_v37 = vsel %vm704_vm0, %v12163_v58, 0.0 }
 0xac1   : > { %v5590_v36 = vmul.f32 1.442695, %v5579_v56  ;;  %v5575_v17 = vpop.xlane.xlu1 %5574  ;;  %v6450_v22 = vsel %vm704_vm0, %v12160_v14, 0.0  ;;  %v12180_v56 = vadd.f32 %v12043_v28, %v7666_v11 }
 0xac2   : > { %v5583_v49 = vsub.f32 %v11999_v31, %v5575_v17  ;;  %v5566_v4 = vpop.xlane.xlu0 %5565  ;;  %v6453_v61 = vsel %vm704_vm0, %v12173_v29, 0.0  ;;  %v6456_v10 = vsel %vm704_vm0, %v12170_v42, 0.0 }
 0xac3   : > { %10041 = vpow2.f32 %v5590_v36  ;;  %v5580_v21 = vsub.f32 %v11995_v13, %v5566_v4  ;;  %v6462_v17 = vsel %vm704_vm0, %v12180_v56, 0.0 }
 0xac4   : > { %v12070_v63 = vpop.eup %10035  ;;  %10043 = vpow2.f32 %v5594_v1  ;;  %v5598_v59 = vmul.f32 1.442695, %v5583_v49  ;;  %v12183_v1 = vadd.f32 %v7666_v11, %v12045_v5 }
 0xac5   : > { %v12072_v8 = vpop.eup %10037  ;;  %v5592_v12 = vmul.f32 1.442695, %v5580_v21  ;;  %v5603_v15 = vsel %vm1723_vm3, %v12070_v63, 0.0  ;;  %v9766_v28 = vpop.permute.xlu1 %9765 }
 0xac6   : > { %5604 = vadd.xlane.f32.xlu1 %v5603_v15  ;;  %v5572_v41 = vpop.xlane.xlu0 %5571  ;;  %v5600_v62 = vsel %vm1723_vm3, %v12072_v8, 0.0  ;;  %v6459_v36 = vsel %vm704_vm0, %v12183_v1, 0.0  ;;  %v9768_v49 = vunpack.i.h.bf16 %v9766_v28  ;;  %v9767_v5 = vunpack.i.l.bf16 %v9766_v28 }
 0xac7   : > { %10045 = vpow2.f32 %v5592_v12  ;;  %v5582_v31 = vsub.f32 %v12003_v40, %v5572_v41  ;;  %5601 = vadd.xlane.f32.xlu0 %v5600_v62 }
 0xac8   : > { %10047 = vpow2.f32 %v5598_v59  ;;  %v9307_v59 = vpack.c.bf16 %v9768_v49, %v9767_v5 }
 0xac9   : > { %v12079_v13 = vpop.eup %10039  ;;  %v5596_v38 = vmul.f32 1.442695, %v5582_v31 }
 0xaca   : > { %v9761_v43 = vpop.permute.xlu0 %9760  ;;  %v5606_v35 = vsel %vm1723_vm3, %v12079_v13, 0.0 }
 0xacb   : > { %v9763_v60 = vunpack.i.h.bf16 %v9761_v43  ;;  %v9762_v45 = vunpack.i.l.bf16 %v9761_v43  ;;  %5607 = vadd.xlane.f32.xlu0 %v5606_v35  ;;  %10049 = vpow2.f32 %v5596_v38 }
 0xacd   : > { %v12083_v48 = vpop.eup %10041  ;;  %v12085_v0 = vpack.c.bf16 %v9763_v60, %v9762_v45 }
 0xace   : > { %v5609_v40 = vsel %vm1723_vm3, %v12083_v48, 0.0  ;;  %v12089_v23 = vpop.eup %10043 }
 0xacf   : > { %5610 = vadd.xlane.f32.xlu1 %v5609_v40  ;;  %9304 = vmatprep.subr.bf16.mxu1 %v12085_v0  ;;  %v5615_v2 = vsel %vm1723_vm3, %v12089_v23, 0.0 }
 0xad1   : > { %v12092_v52 = vpop.eup %10045 }
 0xad2   : > { %v5612_v27 = vsel %vm1723_vm3, %v12092_v52, 0.0  ;;  %v12098_v32 = vpop.eup %10047 }
 0xad3   : > { %5616 = vadd.xlane.f32.xlu1 %v5615_v2  ;;  %5613 = vadd.xlane.f32.xlu0 %v5612_v27  ;;  %v5621_v55 = vsel %vm1723_vm3, %v12098_v32, 0.0 }
 0xad5   : > { %v12102_v47 = vpop.eup %10049 }
 0xad6   : > { %v5618_v54 = vsel %vm1723_vm3, %v12102_v47, 0.0 }
 0xad7   : > { %5622 = vadd.xlane.f32.xlu1 %v5621_v55 }
 0xadb   : > { %5619 = vadd.xlane.f32.xlu1 %v5618_v54 }
 0xae9   : > { %9770 = vrot.lane.b32.xlu0 %v12698_v44, %s12736_s29  ;;  %v12125_v44 = vadd.f32 %v12011_v9, %v7666_v11  ;;  %v12140_v9 = vadd.f32 %v12021_v46, %v7666_v11  ;;  %v6074_v46 = vsel %vm704_vm0, %v12143_v6, 0.0 }
 0xaeb   : > { %v6065_v34 = vsel %vm704_vm0, %v12125_v44, 0.0  ;;  %v6077_v7 = vsel %vm704_vm0, %v12140_v9, 0.0 }
 0xaec   : > { %9775 = vrot.lane.b32.xlu1 %v12699_v30, %s12736_s29  ;;  %v6062_v30 = vsel %vm704_vm0, %v12117_v19, 0.0 }
 0xb08   : > { %6057 = vadd.xlane.f32.xlu0 %v6056_v3 }
 0xb0c   : > { %6063 = vadd.xlane.f32.xlu0 %v6062_v30 }
 0xb10   : > { %6066 = vadd.xlane.f32.xlu0 %v6065_v34  ;;  %6060 = vadd.xlane.f32.xlu1 %v6059_v39 }
 0xb14   : > { %6069 = vadd.xlane.f32.xlu0 %v6068_v24  ;;  %6072 = vadd.xlane.f32.xlu1 %v6071_v20 }
 0xb18   : > { %6075 = vadd.xlane.f32.xlu0 %v6074_v46  ;;  %6078 = vadd.xlane.f32.xlu1 %v6077_v7 }
 0xb1c   : > { %6442 = vadd.xlane.f32.xlu0 %v6441_v53  ;;  %6445 = vadd.xlane.f32.xlu1 %v6444_v57 }
 0xb20   : > { %6448 = vadd.xlane.f32.xlu0 %v6447_v37  ;;  %6451 = vadd.xlane.f32.xlu1 %v6450_v22 }
 0xb24   : > { %6454 = vadd.xlane.f32.xlu0 %v6453_v61  ;;  %6457 = vadd.xlane.f32.xlu1 %v6456_v10 }
 0xb28   : > { %6460 = vadd.xlane.f32.xlu0 %v6459_v36  ;;  %6463 = vadd.xlane.f32.xlu1 %v6462_v17 }
 0xb33   : > { %v8701_v4 = vpop.f32.mrb[88].mxu1 }
 0xb34   : > { %v5199_v21 = vpop.f32.mrb[89].mxu1 }
 0xb35   : > { %8715 = vmatprep.mubr.msk.f32.mxu1 %vm1569_vm1, %v5199_v21 }
 0xb36   : > { %8716 = vmatmul.mubr.msk.f32.vlgmr.msra.gmra.mrb[80].mxu1 %vm1569_vm1, %v8701_v4 }
 0xb37   : > { %9306 = vmatpush3.bf16.msra.mxu1 %v12085_v0  ;;  %v8704_v12 = vpop.f32.mrb[90].mxu1 }
 0xb38   : > { %9308 = vmatprep.subr.bf16.mxu1 %v9307_v59  ;;  %v5209_v15 = vpop.f32.mrb[91].mxu1 }
 0xb39   : > { %8718 = vmatprep.mubr.msk.f32.mxu1 %vm1569_vm1, %v5209_v15 }
 0xb3a   : > { %8719 = vmatmul.mubr.msk.f32.gmra.mrb[82].mxu1 %vm1569_vm1, %v8704_v12 }
 0xb3b   : > { %9310 = vmatpush3.bf16.msra.mxu1 %v9307_v59  ;;  %v8707_v41 = vpop.f32.mrb[92].mxu1 }
 0xb3c   : > { %v5219_v62 = vpop.f32.mrb[93].mxu1 }
 0xb3d   : > { %8721 = vmatprep.mubr.msk.f32.mxu1 %vm1569_vm1, %v5219_v62 }
 0xb3e   : > { %8722 = vmatmul.mubr.msk.f32.gmra.mrb[84].mxu1 %vm1569_vm1, %v8707_v41 }
 0xb3f   : > { %v8710_v31 = vpop.f32.mrb[94].mxu1 }
 0xb40   : > { %v5229_v38 = vpop.f32.mrb[95].mxu1 }
 0xb41   : > { %8724 = vmatprep.mubr.msk.f32.mxu1 %vm1569_vm1, %v5229_v38 }
 0xb42   : > { %8725 = vmatmul.mubr.msk.f32.gmra.mrb[86].mxu1 %vm1569_vm1, %v8710_v31 }
 0xb53   : > { %v5605_v35 = vpop.xlane.xlu1 %5604 }
 0xb54   : > { %v5602_v43 = vpop.xlane.xlu0 %5601 }
 0xb55   : > { %10051 = vrcp.f32 %v5602_v43 }
 0xb56   : > { %10053 = vrcp.f32 %v5605_v35 }
 0xb58   : > { %v5608_v60 = vpop.xlane.xlu0 %5607 }
 0xb59   : > { %10055 = vrcp.f32 %v5608_v60 }
 0xb5c   : > { %v5611_v45 = vpop.xlane.xlu1 %5610 }
 0xb5d   : > { %10057 = vrcp.f32 %v5611_v45 }
 0xb5f   : > { %v10052_v0 = vpop.eup %10051 }
 0xb60   : > { %v5617_v40 = vpop.xlane.xlu1 %5616  ;;  %v5614_v2 = vpop.xlane.xlu0 %5613  ;;  %v5632_v27 = vmul.f32 %v10052_v0, %v12072_v8 }
 0xb61   : > { %10059 = vrcp.f32 %v5614_v2  ;;  %v10054_v46 = vpop.eup %10053 }
 0xb62   : > { %8771 = vmatprep.mubr.msk.f32.mxu1 %vm1723_vm3, %v5632_v27  ;;  %10061 = vrcp.f32 %v5617_v40  ;;  %v5633_v53 = vmul.f32 %v10054_v46, %v12070_v63 }
 0xb63   : > { %v10056_v7 = vpop.eup %10055 }
 0xb64   : > { %v5623_v55 = vpop.xlane.xlu1 %5622  ;;  %v9771_v54 = vpop.permute.xlu0 %9770  ;;  %v5634_v37 = vmul.f32 %v10056_v7, %v12079_v13 }
 0xb65   : > { %v9773_v11 = vunpack.i.h.bf16 %v9771_v54  ;;  %v9772_v3 = vunpack.i.l.bf16 %v9771_v54 }
 0xb67   : > { %v9311_v30 = vpack.c.bf16 %v9773_v11, %v9772_v3  ;;  %v10058_v57 = vpop.eup %10057 }
 0xb68   : > { %v5620_v34 = vpop.xlane.xlu1 %5619  ;;  %v5635_v61 = vmul.f32 %v10058_v57, %v12083_v48 }
 0xb69   : > { %9312 = vmatprep.subr.bf16.mxu1 %v9311_v30  ;;  %10063 = vrcp.f32 %v5620_v34 }
 0xb6a   : > { %9314 = vmatpush3.bf16.msra.mxu1 %v9311_v30  ;;  %10065 = vrcp.f32 %v5623_v55 }
 0xb6b   : > { %v10060_v22 = vpop.eup %10059 }
 0xb6c   : > { %v9776_v39 = vpop.permute.xlu1 %9775  ;;  %v10062_v10 = vpop.eup %10061  ;;  %v5636_v36 = vmul.f32 %v10060_v22, %v12092_v52 }
 0xb6d   : > { %v9778_v24 = vunpack.i.h.bf16 %v9776_v39  ;;  %v9777_v20 = vunpack.i.l.bf16 %v9776_v39  ;;  %v5637_v63 = vmul.f32 %v10062_v10, %v12089_v23 }
 0xb6f   : > { %v9315_v8 = vpack.c.bf16 %v9778_v24, %v9777_v20 }
 0xb71   : > { %9316 = vmatprep.subr.bf16.mxu1 %v9315_v8 }
 0xb72   : > { %9318 = vmatpush3.bf16.msra.mxu1 %v9315_v8 }
 0xb73   : > { %9320 = vmatprep.subr.bf16.mxu1 %v11599_v25  ;;  %v10064_v17 = vpop.eup %10063 }
 0xb74   : > { %v10066_v13 = vpop.eup %10065  ;;  %v5638_v28 = vmul.f32 %v10064_v17, %v12102_v47 }
 0xb75   : > { %8772 = vmatmul.mubr.msk.f32.vlgmr.msra.gmra.mrb[96].mxu1 %vm1723_vm3, %v5633_v53 }
 0xb76   : > { %8774 = vmatprep.mubr.msk.f32.mxu1 %vm1723_vm3, %v5634_v37  ;;  %9322 = vmatpush3.bf16.msra.mxu1 %v11599_v25  ;;  %v5639_v25 = vmul.f32 %v10066_v13, %v12098_v32 }
 0xb79   : > { %8775 = vmatmul.mubr.msk.f32.gmra.mrb[98].mxu1 %vm1723_vm3, %v5635_v61 }
 0xb7a   : > { %8777 = vmatprep.mubr.msk.f32.mxu1 %vm1723_vm3, %v5636_v36 }
 0xb7d   : > { %8778 = vmatmul.mubr.msk.f32.gmra.mrb[100].mxu1 %vm1723_vm3, %v5637_v63 }
 0xb7e   : > { %8780 = vmatprep.mubr.msk.f32.mxu1 %vm1723_vm3, %v5638_v28 }
 0xb81   : > { %8781 = vmatmul.mubr.msk.f32.gmra.mrb[102].mxu1 %vm1723_vm3, %v5639_v25 }
 0xb95   : > { %v6058_v48 = vpop.xlane.xlu0 %6057 }
 0xb96   : > { %v6080_v52 = vmul.f32 0.03125, %v6058_v48 }
 0xb98   : > { %v12221_v49 = vsub.f32 %v12114_v18, %v6080_v52 }
 0xb99   : > { %v6064_v5 = vpop.xlane.xlu0 %6063 }
 0xb9a   : > { %v6082_v4 = vmul.f32 0.03125, %v6064_v5  ;;  %v6096_v23 = vmul.f32 %v12221_v49, %v12221_v49 }
 0xb9c   : > { %v12226_v47 = vsub.f32 %v12117_v19, %v6082_v4  ;;  %v6104_v21 = vsel %vm704_vm0, %v6096_v23, 0.0 }
 0xb9d   : > { %v6061_v59 = vpop.xlane.xlu1 %6060  ;;  %6105 = vadd.xlane.f32.xlu0 %v6104_v21  ;;  %v6067_v32 = vpop.xlane.xlu0 %6066 }
 0xb9e   : > { %v6081_v12 = vmul.f32 0.03125, %v6061_v59  ;;  %v6083_v15 = vmul.f32 0.03125, %v6067_v32  ;;  %v6098_v41 = vmul.f32 %v12226_v47, %v12226_v47 }
 0xba0   : > { %v12232_v18 = vsub.f32 %v12122_v33, %v6081_v12  ;;  %v12235_v62 = vsub.f32 %v12125_v44, %v6083_v15  ;;  %v6110_v31 = vsel %vm704_vm0, %v6098_v41, 0.0 }
 0xba1   : > { %v6073_v19 = vpop.xlane.xlu1 %6072  ;;  %6111 = vadd.xlane.f32.xlu0 %v6110_v31  ;;  %v6070_v38 = vpop.xlane.xlu0 %6069 }
 0xba2   : > { %v6085_v43 = vmul.f32 0.03125, %v6073_v19  ;;  %v6084_v35 = vmul.f32 0.03125, %v6070_v38  ;;  %v6097_v60 = vmul.f32 %v12232_v18, %v12232_v18  ;;  %v6099_v45 = vmul.f32 %v12235_v62, %v12235_v62 }
 0xba4   : > { %v12243_v0 = vsub.f32 %v12130_v50, %v6085_v43  ;;  %v12246_v33 = vsub.f32 %v12133_v26, %v6084_v35  ;;  %v6107_v44 = vsel %vm704_vm0, %v6097_v60, 0.0  ;;  %v6113_v11 = vsel %vm704_vm0, %v6099_v45, 0.0  ;;  %v6196_v60 = vld [vmem:[%s12584_s13] sm:$0xff]  ;;  %v6197_v45 = vld [vmem:[%s12584_s13 + $0x8] sm:$0xff] }
 0xba5   : > { %6108 = vadd.xlane.f32.xlu1 %v6107_v44  ;;  %v6079_v40 = vpop.xlane.xlu1 %6078  ;;  %v6076_v2 = vpop.xlane.xlu0 %6075  ;;  %v12322_v44 = vpack.c.bf16 %v6197_v45, %v6196_v60 }
 0xba6   : > { %v6087_v27 = vmul.f32 0.03125, %v6079_v40  ;;  %v6086_v55 = vmul.f32 0.03125, %v6076_v2  ;;  %v6100_v54 = vmul.f32 %v12246_v33, %v12246_v33  ;;  %v6101_v30 = vmul.f32 %v12243_v0, %v12243_v0  ;;  %v7702_v40 = vld [vmem:[%s12586_s15 + $0x20] sm:$0xff]  ;;  %v7703_v2 = vld [vmem:[%s12586_s15 + $0x28] sm:$0xff] }
 0xba7   : > { %9332 = vmatprep.subr.bf16.mxu1 %v12322_v44 }
 0xba8   : > { %v12253_v3 = vsub.f32 %v12140_v9, %v6087_v27  ;;  %v12256_v50 = vsub.f32 %v12143_v6, %v6086_v55  ;;  %v6116_v26 = vsel %vm704_vm0, %v6100_v54, 0.0  ;;  %v6119_v7 = vsel %vm704_vm0, %v6101_v30, 0.0  ;;  %v7704_v27 = vld [vmem:[%s12586_s15 + $0x30] sm:$0xff]  ;;  %v7705_v54 = vld [vmem:[%s12586_s15 + $0x38] sm:$0xff] }
 0xba9   : > { %v6446_v34 = vpop.xlane.xlu1 %6445  ;;  %6114 = vadd.xlane.f32.xlu1 %v6113_v11  ;;  %6117 = vadd.xlane.f32.xlu0 %v6116_v26  ;;  %v6443_v39 = vpop.xlane.xlu0 %6442  ;;  %v9355_v55 = vpack.c.bf16 %v7703_v2, %v7702_v40  ;;  %v9359_v11 = vpack.c.bf16 %v7705_v54, %v7704_v27  ;;  %v12350_v2 = vld [vmem:[%s12582_s11] ss:$0 sm:$0xff] }
 0xbaa   : > { %v6466_v24 = vmul.f32 0.03125, %v6446_v34  ;;  %v6465_v20 = vmul.f32 0.03125, %v6443_v39  ;;  %v6102_v8 = vmul.f32 %v12256_v50, %v12256_v50  ;;  %v6103_v9 = vmul.f32 %v12253_v3, %v12253_v3 }
 0xbab   : > { %9356 = vmatprep.subr.bf16.mxu0 %v9355_v55 }
 0xbac   : > { %v12266_v6 = vsub.f32 %v12150_v51, %v6466_v24  ;;  %v12269_v46 = vsub.f32 %v12153_v16, %v6465_v20  ;;  %v6122_v53 = vsel %vm704_vm0, %v6102_v8, 0.0  ;;  %v6125_v36 = vsel %vm704_vm0, %v6103_v9, 0.0  ;;  %9358 = vmatpush3.bf16.msra.mxu0 %v9355_v55 }
 0xbad   : > { %v6452_v57 = vpop.xlane.xlu1 %6451  ;;  %6120 = vadd.xlane.f32.xlu1 %v6119_v7  ;;  %6123 = vadd.xlane.f32.xlu0 %v6122_v53  ;;  %v6449_v37 = vpop.xlane.xlu0 %6448 }
 0xbae   : > { %v6468_v22 = vmul.f32 0.03125, %v6452_v57  ;;  %v6467_v61 = vmul.f32 0.03125, %v6449_v37  ;;  %v6481_v10 = vmul.f32 %v12269_v46, %v12269_v46  ;;  %v6482_v63 = vmul.f32 %v12266_v6, %v12266_v6  ;;  %9360 = vmatprep.subr.bf16.mxu0 %v9359_v11 }
 0xbb0   : > { %v12277_v51 = vsub.f32 %v12160_v14, %v6468_v22  ;;  %v12280_v16 = vsub.f32 %v12163_v58, %v6467_v61  ;;  %v6489_v17 = vsel %vm704_vm0, %v6481_v10, 0.0  ;;  %v6492_v4 = vsel %vm704_vm0, %v6482_v63, 0.0  ;;  %9362 = vmatpush3.bf16.msra.mxu0 %v9359_v11 }
 0xbb1   : > { %v6458_v13 = vpop.xlane.xlu1 %6457  ;;  %6126 = vadd.xlane.f32.xlu1 %v6125_v36  ;;  %6490 = vadd.xlane.f32.xlu0 %v6489_v17  ;;  %v6455_v28 = vpop.xlane.xlu0 %6454 }
 0xbb2   : > { %v6470_v25 = vmul.f32 0.03125, %v6458_v13  ;;  %v6469_v48 = vmul.f32 0.03125, %v6455_v28  ;;  %v6483_v52 = vmul.f32 %v12280_v16, %v12280_v16  ;;  %v6484_v14 = vmul.f32 %v12277_v51, %v12277_v51 }
 0xbb4   : > { %v12290_v58 = vsub.f32 %v12170_v42, %v6470_v25  ;;  %v12293_v5 = vsub.f32 %v12173_v29, %v6469_v48  ;;  %v6495_v23 = vsel %vm704_vm0, %v6483_v52, 0.0  ;;  %v6498_v41 = vsel %vm704_vm0, %v6484_v14, 0.0 }
 0xbb5   : > { %v6464_v21 = vpop.xlane.xlu1 %6463  ;;  %6493 = vadd.xlane.f32.xlu1 %v6492_v4  ;;  %6496 = vadd.xlane.f32.xlu0 %v6495_v23  ;;  %v6461_v59 = vpop.xlane.xlu0 %6460 }
 0xbb6   : > { %v6472_v32 = vmul.f32 0.03125, %v6464_v21  ;;  %v6471_v12 = vmul.f32 0.03125, %v6461_v59  ;;  %v6485_v15 = vmul.f32 %v12293_v5, %v12293_v5  ;;  %v6486_v19 = vmul.f32 %v12290_v58, %v12290_v58 }
 0xbb8   : > { %v12301_v42 = vsub.f32 %v12180_v56, %v6472_v32  ;;  %v12304_v29 = vsub.f32 %v12183_v1, %v6471_v12  ;;  %v6501_v31 = vsel %vm704_vm0, %v6485_v15, 0.0  ;;  %v6504_v43 = vsel %vm704_vm0, %v6486_v19, 0.0  ;;  %v6198_v32 = vld [vmem:[%s12584_s13 + $0x10] sm:$0xff]  ;;  %v6199_v12 = vld [vmem:[%s12584_s13 + $0x18] sm:$0xff] }
 0xbb9   : > { %6499 = vadd.xlane.f32.xlu1 %v6498_v41  ;;  %6502 = vadd.xlane.f32.xlu0 %v6501_v31  ;;  %v12343_v60 = vpack.c.bf16 %v6199_v12, %v6198_v32 }
 0xbba   : > { %v6487_v38 = vmul.f32 %v12304_v29, %v12304_v29  ;;  %v6488_v56 = vmul.f32 %v12301_v42, %v12301_v42 }
 0xbbc   : > { %v6507_v35 = vsel %vm704_vm0, %v6487_v38, 0.0  ;;  %v6510_v1 = vsel %vm704_vm0, %v6488_v56, 0.0 }
 0xbbd   : > { %6505 = vadd.xlane.f32.xlu1 %v6504_v43  ;;  %6508 = vadd.xlane.f32.xlu0 %v6507_v35 }
 0xbc1   : > { %6511 = vadd.xlane.f32.xlu1 %v6510_v1 }
 0xc2a   : > { %v6106_v26 = vpop.xlane.xlu0 %6105 }
 0xc2b   : > { %v6128_v39 = vmul.f32 0.03125, %v6106_v26 }
 0xc2d   : > { %v6136_v9 = vadd.f32 1e-05, %v6128_v39 }
 0xc2e   : > { %v6112_v30 = vpop.xlane.xlu0 %6111 }
 0xc2f   : > { %v6130_v7 = vmul.f32 0.03125, %v6112_v30  ;;  %10067 = vrsqrt.f32 %v6136_v9  ;;  %v12362_v9 = vld [vmem:[%s12583_s12] ss:$0 sm:$0xff] }
 0xc31   : > { %v6138_v61 = vadd.f32 1e-05, %v6130_v7 }
 0xc32   : > { %v6109_v34 = vpop.xlane.xlu1 %6108 }
 0xc33   : > { %v6129_v8 = vmul.f32 0.03125, %v6109_v34 }
 0xc35   : > { %v6137_v37 = vadd.f32 1e-05, %v6129_v8 }
 0xc36   : > { %v6115_v24 = vpop.xlane.xlu1 %6114  ;;  %v6118_v20 = vpop.xlane.xlu0 %6117 }
 0xc37   : > { %v6131_v22 = vmul.f32 0.03125, %v6115_v24  ;;  %v6132_v10 = vmul.f32 0.03125, %v6118_v20  ;;  %10069 = vrsqrt.f32 %v6137_v37 }
 0xc38   : > { %10071 = vrsqrt.f32 %v6138_v61 }
 0xc39   : > { %v6139_v63 = vadd.f32 1e-05, %v6131_v22  ;;  %v6140_v28 = vadd.f32 1e-05, %v6132_v10  ;;  %v10068_v15 = vpop.eup %10067 }
 0xc3a   : > { %v6121_v53 = vpop.xlane.xlu1 %6120  ;;  %v6124_v57 = vpop.xlane.xlu0 %6123  ;;  %v6152_v45 = vmul.f32 %v10068_v15, %v12221_v49 }
 0xc3b   : > { %v6133_v13 = vmul.f32 0.03125, %v6121_v53  ;;  %v6134_v25 = vmul.f32 0.03125, %v6124_v57  ;;  %10073 = vrsqrt.f32 %v6139_v63 }
 0xc3c   : > { %10075 = vrsqrt.f32 %v6140_v28  ;;  %v6166_v20 = vmul.f32 %v12350_v2, %v6152_v45 }
 0xc3d   : > { %v6141_v14 = vadd.f32 1e-05, %v6133_v13  ;;  %v6142_v23 = vadd.f32 1e-05, %v6134_v25 }
 0xc3e   : > { %v6127_v36 = vpop.xlane.xlu1 %6126  ;;  %v6491_v17 = vpop.xlane.xlu0 %6490  ;;  %v6180_v63 = vadd.f32 %v12362_v9, %v6166_v20 }
 0xc3f   : > { %v6135_v4 = vmul.f32 0.03125, %v6127_v36  ;;  %v6513_v21 = vmul.f32 0.03125, %v6491_v17  ;;  %10077 = vrsqrt.f32 %v6141_v14 }
 0xc40   : > { %10079 = vrsqrt.f32 %v6142_v23 }
 0xc41   : > { %v6143_v41 = vadd.f32 1e-05, %v6135_v4  ;;  %v10070_v43 = vpop.eup %10069  ;;  %v6521_v35 = vadd.f32 1e-05, %v6513_v21 }
 0xc42   : > { %v6494_v48 = vpop.xlane.xlu1 %6493  ;;  %v6497_v52 = vpop.xlane.xlu0 %6496  ;;  %v6153_v55 = vmul.f32 %v10070_v43, %v12232_v18 }
 0xc43   : > { %v6514_v31 = vmul.f32 0.03125, %v6494_v48  ;;  %v6515_v56 = vmul.f32 0.03125, %v6497_v52  ;;  %v10072_v40 = vpop.eup %10071  ;;  %10081 = vrsqrt.f32 %v6143_v41 }
 0xc44   : > { %10083 = vrsqrt.f32 %v6521_v35  ;;  %v6154_v18 = vmul.f32 %v10072_v40, %v12226_v47  ;;  %v6167_v7 = vmul.f32 %v12350_v2, %v6153_v55 }
 0xc45   : > { %v6522_v54 = vadd.f32 1e-05, %v6514_v31  ;;  %v6523_v30 = vadd.f32 1e-05, %v6515_v56  ;;  %v10074_v39 = vpop.eup %10073 }
 0xc46   : > { %v6500_v59 = vpop.xlane.xlu1 %6499  ;;  %v6503_v19 = vpop.xlane.xlu0 %6502  ;;  %v6155_v36 = vmul.f32 %v10074_v39, %v12235_v62  ;;  %v6168_v13 = vmul.f32 %v12350_v2, %v6154_v18  ;;  %v6181_v48 = vadd.f32 %v12362_v9, %v6167_v7 }
 0xc47   : > { %v6516_v11 = vmul.f32 0.03125, %v6500_v59  ;;  %v6517_v49 = vmul.f32 0.03125, %v6503_v19  ;;  %v10076_v8 = vpop.eup %10075  ;;  %10085 = vrsqrt.f32 %v6522_v54 }
 0xc48   : > { %v8773_v38 = vpop.f32.mrb[96].mxu1  ;;  %10087 = vrsqrt.f32 %v6523_v30  ;;  %v6156_v28 = vmul.f32 %v10076_v8, %v12246_v33  ;;  %v6169_v21 = vmul.f32 %v12350_v2, %v6155_v36  ;;  %v6188_v33 = vmax.f32 %v6180_v63, 0.0 }
 0xc49   : > { %v5754_v1 = vpop.f32.mrb[97].mxu1  ;;  %v6524_v53 = vadd.f32 1e-05, %v6516_v11  ;;  %v6525_v22 = vadd.f32 1e-05, %v6517_v49  ;;  %v10078_v17 = vpop.eup %10077  ;;  %v6182_v12 = vadd.f32 %v12362_v9, %v6168_v13  ;;  %v6189_v19 = vmax.f32 %v6181_v48, 0.0 }
 0xc4a   : > { %8787 = vmatprep.mubr.msk.f32.mxu1 %vm1569_vm1, %v5754_v1  ;;  %v6506_v27 = vpop.xlane.xlu1 %6505  ;;  %v6509_v24 = vpop.xlane.xlu0 %6508  ;;  %v6157_v59 = vmul.f32 %v10078_v17, %v12243_v0  ;;  %v6170_v15 = vmul.f32 %v12350_v2, %v6156_v28  ;;  %v6183_v0 = vadd.f32 %v12362_v9, %v6169_v21 }
 0xc4b   : > { %8788 = vmatmul.mubr.msk.f32.vlgmr.msra.gmra.mrb[80].mxu1 %vm1569_vm1, %v8773_v38  ;;  %v6518_v57 = vmul.f32 0.03125, %v6506_v27  ;;  %v6519_v61 = vmul.f32 0.03125, %v6509_v24  ;;  %v10080_v25 = vpop.eup %10079  ;;  %10089 = vrsqrt.f32 %v6524_v53  ;;  %v6190_v1 = vmax.f32 %v6182_v12, 0.0  ;;  %v7677_v12 = vld [vmem:[%s12585_s14] ss:$0 sm:$0xff] }
 0xc4c   : > { %v8776_v26 = vpop.f32.mrb[98].mxu1  ;;  %9334 = vmatpush3.bf16.msra.mxu1 %v12322_v44  ;;  %10091 = vrsqrt.f32 %v6525_v22  ;;  %v6158_v41 = vmul.f32 %v10080_v25, %v12256_v50  ;;  %v6171_v43 = vmul.f32 %v12350_v2, %v6157_v59  ;;  %v6184_v45 = vadd.f32 %v12362_v9, %v6170_v15 }
 0xc4d   : > { %v5764_v34 = vpop.f32.mrb[99].mxu1  ;;  %9336 = vmatprep.subr.bf16.mxu1 %v12343_v60  ;;  %v6526_v52 = vadd.f32 1e-05, %v6518_v57  ;;  %v6527_v62 = vadd.f32 1e-05, %v6519_v61  ;;  %v10082_v32 = vpop.eup %10081  ;;  %v6191_v54 = vmax.f32 %v6183_v0, 0.0 }
 0xc4e   : > { %8790 = vmatprep.mubr.msk.f32.mxu1 %vm1569_vm1, %v5764_v34  ;;  %v6512_v47 = vpop.xlane.xlu1 %6511  ;;  %v10084_v31 = vpop.eup %10083  ;;  %v6159_v35 = vmul.f32 %v10082_v32, %v12253_v3  ;;  %v6172_v50 = vmul.f32 %v12350_v2, %v6158_v41  ;;  %v6185_v3 = vadd.f32 %v12362_v9, %v6171_v43  ;;  %v6192_v30 = vmax.f32 %v6184_v45, 0.0  ;;  %v6715_v32 = vld [vmem:[%s12586_s15 + $0x8] sm:$0xff]  ;;  %v6716_v0 = vld [vmem:[%s12586_s15 + $0x10] sm:$0xff]  ;;  %v6717_v43 = vld [vmem:[%s12586_s15 + $0x18] sm:$0xff] }
 0xc4f   : > { %8791 = vmatmul.mubr.msk.f32.gmra.mrb[82].mxu1 %vm1569_vm1, %v8776_v26  ;;  %v6520_v14 = vmul.f32 0.03125, %v6512_v47  ;;  %10093 = vrsqrt.f32 %v6526_v52  ;;  %v6537_v40 = vmul.f32 %v10084_v31, %v12269_v46 }
 0xc50   : > { %v8779_v37 = vpop.f32.mrb[100].mxu1  ;;  %9338 = vmatpush3.bf16.msra.mxu1 %v12343_v60  ;;  %10095 = vrsqrt.f32 %v6527_v62  ;;  %v6173_v11 = vmul.f32 %v12350_v2, %v6159_v35  ;;  %v6186_v46 = vadd.f32 %v12362_v9, %v6172_v50  ;;  %v9367_v50 = vpack.c.bf16 %v6717_v43, %v6716_v0 }
 0xc51   : > { %v5774_v10 = vpop.f32.mrb[101].mxu1  ;;  %9348 = vmatprep.subr.bf16.mxu1 %v12322_v44  ;;  %v6528_v38 = vadd.f32 1e-05, %v6520_v14  ;;  %v10086_v56 = vpop.eup %10085  ;;  %v6545_v49 = vmul.f32 %v12350_v2, %v6537_v40 }
 0xc52   : > { %8793 = vmatprep.mubr.msk.f32.mxu1 %vm1569_vm1, %v5774_v10  ;;  %v10088_v27 = vpop.eup %10087  ;;  %v6538_v55 = vmul.f32 %v10086_v56, %v12266_v6  ;;  %v6187_v24 = vadd.f32 %v12362_v9, %v6173_v11  ;;  %v6194_v8 = vmax.f32 %v6186_v46, 0.0 }
 0xc53   : > { %8794 = vmatmul.mubr.msk.f32.gmra.mrb[84].mxu1 %vm1569_vm1, %v8779_v37  ;;  %10097 = vrsqrt.f32 %v6528_v38  ;;  %v6539_v34 = vmul.f32 %v10088_v27, %v12280_v16  ;;  %v6553_v7 = vadd.f32 %v12362_v9, %v6545_v49 }
 0xc54   : > { %v8782_v4 = vpop.f32.mrb[102].mxu1  ;;  %v6546_v6 = vmul.f32 %v12350_v2, %v6538_v55  ;;  %v6195_v37 = vmax.f32 %v6187_v24, 0.0 }
 0xc55   : > { %v5784_v23 = vpop.f32.mrb[103].mxu1  ;;  %v10090_v26 = vpop.eup %10089  ;;  %v6547_v16 = vmul.f32 %v12350_v2, %v6539_v34  ;;  %v6561_v47 = vmax.f32 %v6553_v7, 0.0 }
 0xc56   : > { %8796 = vmatprep.mubr.msk.f32.mxu1 %vm1569_vm1, %v5784_v23  ;;  %v10092_v39 = vpop.eup %10091  ;;  %v6540_v20 = vmul.f32 %v10090_v26, %v12277_v51 }
 0xc57   : > { %8797 = vmatmul.mubr.msk.f32.gmra.mrb[86].mxu1 %vm1569_vm1, %v8782_v4  ;;  %v6541_v53 = vmul.f32 %v10092_v39, %v12293_v5  ;;  %v6555_v10 = vadd.f32 %v12362_v9, %v6547_v16 }
 0xc58   : > { %8827 = vmatprep.mubr.msk.f32.mxu1 %vm704_vm0, %v6188_v33  ;;  %v6548_v22 = vmul.f32 %v12350_v2, %v6540_v20 }
 0xc59   : > { %v10094_v18 = vpop.eup %10093  ;;  %v6549_v36 = vmul.f32 %v12350_v2, %v6541_v53 }
 0xc5a   : > { %v10096_v57 = vpop.eup %10095  ;;  %v6542_v51 = vmul.f32 %v10094_v18, %v12290_v58  ;;  %v6556_v63 = vadd.f32 %v12362_v9, %v6548_v22  ;;  %v6563_v58 = vmax.f32 %v6555_v10, 0.0 }
 0xc5b   : > { %8828 = vmatmul.mubr.msk.f32.vlgmr.msra.gmra.mrb[80].mxu1 %vm704_vm0, %v6189_v19  ;;  %v6543_v5 = vmul.f32 %v10096_v57, %v12304_v29  ;;  %v6557_v25 = vadd.f32 %v12362_v9, %v6549_v36 }
 0xc5c   : > { %8830 = vmatprep.mubr.msk.f32.mxu1 %vm704_vm0, %v6190_v1  ;;  %9350 = vmatpush3.bf16.msra.mxu1 %v12322_v44  ;;  %v6193_v44 = vmax.f32 %v6185_v3, 0.0  ;;  %v6550_v13 = vmul.f32 %v12350_v2, %v6542_v51  ;;  %v6564_v29 = vmax.f32 %v6556_v63, 0.0 }
 0xc5d   : > { %9352 = vmatprep.subr.bf16.mxu1 %v12343_v60  ;;  %v10098_v61 = vpop.eup %10097  ;;  %v6551_v48 = vmul.f32 %v12350_v2, %v6543_v5  ;;  %v6565_v4 = vmax.f32 %v6557_v25, 0.0 }
 0xc5e   : > { %v6544_v28 = vmul.f32 %v10098_v61, %v12301_v42  ;;  %v6558_v52 = vadd.f32 %v12362_v9, %v6550_v13  ;;  %v7722_v61 = vld [vmem:[%s12587_s16] ss:$0 sm:$0xff] }
 0xc5f   : > { %8831 = vmatmul.mubr.msk.f32.gmra.mrb[82].mxu1 %vm704_vm0, %v6191_v54  ;;  %v6559_v62 = vadd.f32 %v12362_v9, %v6551_v48 }
 0xc60   : > { %8833 = vmatprep.mubr.msk.f32.mxu1 %vm704_vm0, %v6192_v30  ;;  %9354 = vmatpush3.bf16.msra.mxu1 %v12343_v60  ;;  %v6554_v60 = vadd.f32 %v12362_v9, %v6546_v6  ;;  %v6552_v14 = vmul.f32 %v12350_v2, %v6544_v28  ;;  %v6566_v42 = vmax.f32 %v6558_v52, 0.0  ;;  %v6714_v2 = vld [vmem:[%s12586_s15] sm:$0xff] }
 0xc61   : > { %v6567_v21 = vmax.f32 %v6559_v62, 0.0  ;;  %v9363_v33 = vpack.c.bf16 %v6715_v32, %v6714_v2 }
 0xc62   : > { %v6562_v17 = vmax.f32 %v6554_v60, 0.0  ;;  %v6560_v23 = vadd.f32 %v12362_v9, %v6552_v14  ;;  %v7537_v9 = vld [vmem:[%s12579_s8] ss:$0 sm:$0xff] }
 0xc63   : > { %8834 = vmatmul.mubr.msk.f32.gmra.mrb[84].mxu1 %vm704_vm0, %v6193_v44  ;;  %9364 = vmatprep.subr.bf16.mxu0 %v9363_v33  ;;  %v9381_v19 = vadd.f32 %v7677_v12, %v7537_v9 }
 0xc64   : > { %8836 = vmatprep.mubr.msk.f32.mxu1 %vm704_vm0, %v6194_v8  ;;  %v6568_v59 = vmax.f32 %v6560_v23, 0.0 }
 0xc67   : > { %8837 = vmatmul.mubr.msk.f32.gmra.mrb[86].mxu1 %vm704_vm0, %v6195_v37 }
 0xc68   : > { %8867 = vmatprep.mubr.msk.f32.mxu1 %vm704_vm0, %v6561_v47 }
 0xc6b   : > { %8868 = vmatmul.mubr.msk.f32.vlgmr.msra.gmra.mrb[40].mxu1 %vm704_vm0, %v6562_v17 }
 0xc6c   : > { %8870 = vmatprep.mubr.msk.f32.mxu1 %vm704_vm0, %v6563_v58 }
 0xc6f   : > { %8871 = vmatmul.mubr.msk.f32.gmra.mrb[42].mxu1 %vm704_vm0, %v6564_v29 }
 0xc70   : > { %8873 = vmatprep.mubr.msk.f32.mxu1 %vm704_vm0, %v6565_v4 }
 0xc73   : > { %8874 = vmatmul.mubr.msk.f32.gmra.mrb[44].mxu1 %vm704_vm0, %v6566_v42 }
 0xc74   : > { %8876 = vmatprep.mubr.msk.f32.mxu1 %vm704_vm0, %v6567_v21 }
 0xc77   : > { %8877 = vmatmul.mubr.msk.f32.gmra.mrb[46].mxu1 %vm704_vm0, %v6568_v59 }
 0xd2e   : > { %v8829_v15 = vpop.f32.mrb[80].mxu1 }
 0xd2f   : > { %v9395_v41 = vadd.f32 %v8829_v15, %v7537_v9  ;;  %v6297_v31 = vpop.f32.mrb[81].mxu1 }
 0xd30   : > { %v9397_v38 = vadd.f32 %v7537_v9, %v6297_v31 }
 0xd31   : > { %v9396_v1 = vadd.f32 %v9395_v41, %v7677_v12 }
 0xd32   : > { %v9398_v35 = vadd.f32 %v9397_v38, %v7677_v12  ;;  %v8832_v56 = vpop.f32.mrb[82].mxu1 }
 0xd33   : > { %v6307_v45 = vpop.f32.mrb[83].mxu1  ;;  %v9400_v55 = vadd.f32 %v9381_v19, %v8832_v56 }
 0xd34   : > { %v9402_v40 = vadd.f32 %v9381_v19, %v6307_v45  ;;  %8887 = vmatprep.mubr.msk.f32.mxu0 %vm704_vm0, %v9398_v35 }
 0xd35   : > { %8888 = vmatmul.mubr.msk.f32.vlgmr.msra.gmra.mrb[104].mxu0 %vm704_vm0, %v9396_v1 }
 0xd36   : > { %v8835_v27 = vpop.f32.mrb[84].mxu1  ;;  %8890 = vmatprep.mubr.msk.f32.mxu0 %vm704_vm0, %v9402_v40  ;;  %9366 = vmatpush3.bf16.msra.mxu0 %v9363_v33 }
 0xd37   : > { %v6317_v54 = vpop.f32.mrb[85].mxu1  ;;  %9368 = vmatprep.subr.bf16.mxu0 %v9367_v50  ;;  %v9404_v26 = vadd.f32 %v9381_v19, %v8835_v27 }
 0xd38   : > { %v9406_v3 = vadd.f32 %v9381_v19, %v6317_v54 }
 0xd39   : > { %8891 = vmatmul.mubr.msk.f32.gmra.mrb[106].mxu0 %vm704_vm0, %v9400_v55 }
 0xd3a   : > { %v8838_v11 = vpop.f32.mrb[86].mxu1  ;;  %8893 = vmatprep.mubr.msk.f32.mxu0 %vm704_vm0, %v9406_v3  ;;  %9370 = vmatpush3.bf16.msra.mxu0 %v9367_v50 }
 0xd3b   : > { %v6327_v30 = vpop.f32.mrb[87].mxu1  ;;  %v9408_v34 = vadd.f32 %v9381_v19, %v8838_v11 }
 0xd3c   : > { %v9410_v46 = vadd.f32 %v9381_v19, %v6327_v30 }
 0xd3d   : > { %8894 = vmatmul.mubr.msk.f32.gmra.mrb[108].mxu0 %vm704_vm0, %v9404_v26 }
 0xd3e   : > { %v8869_v49 = vpop.f32.mrb[40].mxu1  ;;  %8896 = vmatprep.mubr.msk.f32.mxu0 %vm704_vm0, %v9410_v46 }
 0xd3f   : > { %v6659_v39 = vpop.f32.mrb[41].mxu1  ;;  %v9380_v24 = vadd.f32 %v9381_v19, %v8869_v49 }
 0xd40   : > { %v9382_v6 = vadd.f32 %v9381_v19, %v6659_v39 }
 0xd41   : > { %8897 = vmatmul.mubr.msk.f32.gmra.mrb[110].mxu0 %vm704_vm0, %v9408_v34 }
 0xd42   : > { %v8872_v44 = vpop.f32.mrb[42].mxu1  ;;  %8907 = vmatprep.mubr.msk.f32.mxu0 %vm704_vm0, %v9382_v6 }
 0xd43   : > { %v6669_v20 = vpop.f32.mrb[43].mxu1  ;;  %v9384_v7 = vadd.f32 %v9381_v19, %v8872_v44 }
 0xd44   : > { %v9386_v18 = vadd.f32 %v9381_v19, %v6669_v20 }
 0xd45   : > { %8908 = vmatmul.mubr.msk.f32.vlgmr.msra.gmra.mrb[104].mxu0 %vm704_vm0, %v9380_v24 }
 0xd46   : > { %v8875_v8 = vpop.f32.mrb[44].mxu1  ;;  %8910 = vmatprep.mubr.msk.f32.mxu0 %vm704_vm0, %v9386_v18 }
 0xd47   : > { %v6679_v16 = vpop.f32.mrb[45].mxu1  ;;  %v9388_v60 = vadd.f32 %v9381_v19, %v8875_v8 }
 0xd48   : > { %v9390_v53 = vadd.f32 %v9381_v19, %v6679_v16 }
 0xd49   : > { %8911 = vmatmul.mubr.msk.f32.gmra.mrb[106].mxu0 %vm704_vm0, %v9384_v7 }
 0xd4a   : > { %v8878_v57 = vpop.f32.mrb[46].mxu1  ;;  %8913 = vmatprep.mubr.msk.f32.mxu0 %vm704_vm0, %v9390_v53 }
 0xd4b   : > { %v6689_v37 = vpop.f32.mrb[47].mxu1  ;;  %v9392_v51 = vadd.f32 %v9381_v19, %v8878_v57 }
 0xd4c   : > { %v9394_v22 = vadd.f32 %v9381_v19, %v6689_v37 }
 0xd4d   : > { %8914 = vmatmul.mubr.msk.f32.gmra.mrb[108].mxu0 %vm704_vm0, %v9388_v60 }
 0xd4e   : > { %8916 = vmatprep.mubr.msk.f32.mxu0 %vm704_vm0, %v9394_v22 }
 0xd51   : > { %8917 = vmatmul.mubr.msk.f32.gmra.mrb[110].mxu0 %vm704_vm0, %v9392_v51 }
 0xe18   : > { %v8909_v47 = vpop.f32.mrb[104].mxu0 }
 0xe19   : > { %v6989_v10 = vadd.f32 %v8909_v47, %v7722_v61  ;;  %v6942_v36 = vpop.f32.mrb[105].mxu0  ;;  %v7138_v47 = vld [vmem:[%s12590_s19] sm:$0xff] }
 0xe1a   : > { %v6988_v5 = vadd.f32 %v7722_v61, %v6942_v36 }
 0xe1b   : > { %v7001_v17 = vsel %vm704_vm0, %v6989_v10, 0.0 }
 0xe1c   : > { %7002 = vadd.xlane.f32.xlu1 %v7001_v17  ;;  %v8912_v63 = vpop.f32.mrb[106].mxu0  ;;  %v6998_v13 = vsel %vm704_vm0, %v6988_v5, 0.0  ;;  %v7141_v17 = vld [vmem:[%s12590_s19 + $0x18] sm:$0xff] }
 0xe1d   : > { %v6991_v28 = vadd.f32 %v8912_v63, %v7722_v61  ;;  %6999 = vadd.xlane.f32.xlu0 %v6998_v13  ;;  %v6952_v58 = vpop.f32.mrb[107].mxu0 }
 0xe1e   : > { %v6990_v25 = vadd.f32 %v7722_v61, %v6952_v58 }
 0xe1f   : > { %v7007_v48 = vsel %vm704_vm0, %v6991_v28, 0.0 }
 0xe20   : > { %7008 = vadd.xlane.f32.xlu1 %v7007_v48  ;;  %v8915_v29 = vpop.f32.mrb[108].mxu0  ;;  %v7004_v52 = vsel %vm704_vm0, %v6990_v25, 0.0 }
 0xe21   : > { %v6993_v14 = vadd.f32 %v8915_v29, %v7722_v61  ;;  %7005 = vadd.xlane.f32.xlu0 %v7004_v52  ;;  %v6962_v4 = vpop.f32.mrb[109].mxu0 }
 0xe22   : > { %v6992_v62 = vadd.f32 %v7722_v61, %v6962_v4 }
 0xe23   : > { %v7013_v42 = vsel %vm704_vm0, %v6993_v14, 0.0 }
 0xe24   : > { %7014 = vadd.xlane.f32.xlu1 %v7013_v42  ;;  %v8918_v23 = vpop.f32.mrb[110].mxu0  ;;  %v7010_v21 = vsel %vm704_vm0, %v6992_v62, 0.0 }
 0xe25   : > { %v6995_v59 = vadd.f32 %v8918_v23, %v7722_v61  ;;  %7011 = vadd.xlane.f32.xlu0 %v7010_v21  ;;  %v6972_v2 = vpop.f32.mrb[111].mxu0 }
 0xe26   : > { %v6994_v32 = vadd.f32 %v7722_v61, %v6972_v2 }
 0xe27   : > { %v7019_v33 = vsel %vm704_vm0, %v6995_v59, 0.0 }
 0xe28   : > { %7020 = vadd.xlane.f32.xlu1 %v7019_v33  ;;  %v7016_v9 = vsel %vm704_vm0, %v6994_v32, 0.0 }
 0xe29   : > { %7017 = vadd.xlane.f32.xlu0 %v7016_v9 }
 0xea9   : > { %v7003_v12 = vpop.xlane.xlu1 %7002 }
 0xeaa   : > { %v7023_v15 = vmul.f32 0.03125, %v7003_v12  ;;  %v7000_v41 = vpop.xlane.xlu0 %6999 }
 0xeab   : > { %v7022_v31 = vmul.f32 0.03125, %v7000_v41 }
 0xeac   : > { %v12479_v19 = vsub.f32 %v6989_v10, %v7023_v15  ;;  %v7139_v10 = vld [vmem:[%s12590_s19 + $0x8] sm:$0xff] }
 0xead   : > { %v12481_v38 = vsub.f32 %v6988_v5, %v7022_v31  ;;  %v7009_v0 = vpop.xlane.xlu1 %7008  ;;  %v9371_v36 = vpack.c.bf16 %v7139_v10, %v7138_v47  ;;  %v7140_v5 = vld [vmem:[%s12590_s19 + $0x10] sm:$0xff] }
 0xeae   : > { %v7025_v43 = vmul.f32 0.03125, %v7009_v0  ;;  %v7006_v35 = vpop.xlane.xlu0 %7005  ;;  %v7039_v56 = vmul.f32 %v12479_v19, %v12479_v19  ;;  %v9375_v63 = vpack.c.bf16 %v7141_v17, %v7140_v5 }
 0xeaf   : > { %v7024_v1 = vmul.f32 0.03125, %v7006_v35  ;;  %v7038_v45 = vmul.f32 %v12481_v38, %v12481_v38  ;;  %9372 = vmatprep.subr.bf16.mxu1 %v9371_v36 }
 0xeb0   : > { %v12487_v50 = vsub.f32 %v6991_v28, %v7025_v43  ;;  %v7049_v40 = vsel %vm704_vm0, %v7039_v56, 0.0  ;;  %9374 = vmatpush3.bf16.msra.mxu1 %v9371_v36  ;;  %v7723_v43 = vld [vmem:[%s12588_s17] ss:$0 sm:$0xff] }
 0xeb1   : > { %v12490_v27 = vsub.f32 %v6990_v25, %v7024_v1  ;;  %v7015_v55 = vpop.xlane.xlu1 %7014  ;;  %7050 = vadd.xlane.f32.xlu1 %v7049_v40  ;;  %v7046_v54 = vsel %vm704_vm0, %v7038_v45, 0.0  ;;  %9376 = vmatprep.subr.bf16.mxu1 %v9375_v63  ;;  %v7724_v40 = vld [vmem:[%s12589_s18] ss:$0 sm:$0xff] }
 0xeb2   : > { %v7027_v3 = vmul.f32 0.03125, %v7015_v55  ;;  %v7012_v11 = vpop.xlane.xlu0 %7011  ;;  %7047 = vadd.xlane.f32.xlu0 %v7046_v54  ;;  %v7041_v26 = vmul.f32 %v12487_v50, %v12487_v50 }
 0xeb3   : > { %v7026_v30 = vmul.f32 0.03125, %v7012_v11  ;;  %v7040_v46 = vmul.f32 %v12490_v27, %v12490_v27 }
 0xeb4   : > { %v12497_v49 = vsub.f32 %v6993_v14, %v7027_v3  ;;  %v7055_v34 = vsel %vm704_vm0, %v7041_v26, 0.0  ;;  %9378 = vmatpush3.bf16.msra.mxu1 %v9375_v63 }
 0xeb5   : > { %v12500_v39 = vsub.f32 %v6992_v62, %v7026_v30  ;;  %7056 = vadd.xlane.f32.xlu1 %v7055_v34  ;;  %v7021_v6 = vpop.xlane.xlu1 %7020  ;;  %v7052_v44 = vsel %vm704_vm0, %v7040_v46, 0.0 }
 0xeb6   : > { %v7029_v24 = vmul.f32 0.03125, %v7021_v6  ;;  %7053 = vadd.xlane.f32.xlu0 %v7052_v44  ;;  %v7018_v20 = vpop.xlane.xlu0 %7017  ;;  %v7043_v18 = vmul.f32 %v12497_v49, %v12497_v49 }
 0xeb7   : > { %v7028_v8 = vmul.f32 0.03125, %v7018_v20  ;;  %v7042_v7 = vmul.f32 %v12500_v39, %v12500_v39 }
 0xeb8   : > { %v12507_v16 = vsub.f32 %v6995_v59, %v7029_v24  ;;  %v7061_v53 = vsel %vm704_vm0, %v7043_v18, 0.0 }
 0xeb9   : > { %v12510_v57 = vsub.f32 %v6994_v32, %v7028_v8  ;;  %7062 = vadd.xlane.f32.xlu1 %v7061_v53  ;;  %v7058_v60 = vsel %vm704_vm0, %v7042_v7, 0.0 }
 0xeba   : > { %7059 = vadd.xlane.f32.xlu0 %v7058_v60  ;;  %v7045_v37 = vmul.f32 %v12507_v16, %v12507_v16 }
 0xebb   : > { %v7044_v22 = vmul.f32 %v12510_v57, %v12510_v57 }
 0xebc   : > { %v7067_v51 = vsel %vm704_vm0, %v7045_v37, 0.0 }
 0xebd   : > { %7068 = vadd.xlane.f32.xlu1 %v7067_v51  ;;  %v7064_v61 = vsel %vm704_vm0, %v7044_v22, 0.0 }
 0xebe   : > { %7065 = vadd.xlane.f32.xlu0 %v7064_v61 }
 0xf3e   : > { %v7051_v13 = vpop.xlane.xlu1 %7050 }
 0xf3f   : > { %v7071_v28 = vmul.f32 0.03125, %v7051_v13  ;;  %v7048_v58 = vpop.xlane.xlu0 %7047 }
 0xf40   : > { %v7070_v25 = vmul.f32 0.03125, %v7048_v58 }
 0xf41   : > { %v7079_v48 = vadd.f32 1e-05, %v7071_v28 }
 0xf42   : > { %v7078_v29 = vadd.f32 1e-05, %v7070_v25  ;;  %v7057_v52 = vpop.xlane.xlu1 %7056 }
 0xf43   : > { %10099 = vrsqrt.f32 %v7079_v48  ;;  %v7073_v14 = vmul.f32 0.03125, %v7057_v52  ;;  %v7054_v4 = vpop.xlane.xlu0 %7053 }
 0xf44   : > { %10101 = vrsqrt.f32 %v7078_v29  ;;  %v7072_v62 = vmul.f32 0.03125, %v7054_v4 }
 0xf45   : > { %v7081_v42 = vadd.f32 1e-05, %v7073_v14 }
 0xf46   : > { %v7080_v23 = vadd.f32 1e-05, %v7072_v62  ;;  %v7063_v21 = vpop.xlane.xlu1 %7062 }
 0xf47   : > { %10103 = vrsqrt.f32 %v7081_v42  ;;  %v7075_v59 = vmul.f32 0.03125, %v7063_v21  ;;  %v7060_v2 = vpop.xlane.xlu0 %7059 }
 0xf48   : > { %10105 = vrsqrt.f32 %v7080_v23  ;;  %v7074_v32 = vmul.f32 0.03125, %v7060_v2 }
 0xf49   : > { %v7083_v33 = vadd.f32 1e-05, %v7075_v59 }
 0xf4a   : > { %v7082_v9 = vadd.f32 1e-05, %v7074_v32  ;;  %v7069_v12 = vpop.xlane.xlu1 %7068 }
 0xf4b   : > { %10107 = vrsqrt.f32 %v7083_v33  ;;  %v7077_v15 = vmul.f32 0.03125, %v7069_v12  ;;  %v7066_v41 = vpop.xlane.xlu0 %7065 }
 0xf4c   : > { %10109 = vrsqrt.f32 %v7082_v9  ;;  %v7076_v31 = vmul.f32 0.03125, %v7066_v41 }
 0xf4d   : > { %v10100_v0 = vpop.eup %10099  ;;  %v7085_v35 = vadd.f32 1e-05, %v7077_v15 }
 0xf4e   : > { %v10102_v56 = vpop.eup %10101  ;;  %v7095_v1 = vmul.f32 %v10100_v0, %v12479_v19  ;;  %v7084_v45 = vadd.f32 1e-05, %v7076_v31 }
 0xf4f   : > { %10111 = vrsqrt.f32 %v7085_v35  ;;  %v7094_v55 = vmul.f32 %v10102_v56, %v12481_v38 }
 0xf50   : > { %v7109_v54 = vmul.f32 %v7723_v43, %v7095_v1  ;;  %10113 = vrsqrt.f32 %v7084_v45 }
 0xf51   : > { %v10104_v3 = vpop.eup %10103  ;;  %v7108_v11 = vmul.f32 %v7723_v43, %v7094_v55 }
 0xf52   : > { %v10106_v26 = vpop.eup %10105  ;;  %v7123_v30 = vadd.f32 %v7724_v40, %v7109_v54  ;;  %v7097_v46 = vmul.f32 %v10104_v3, %v12487_v50 }
 0xf53   : > { %v7122_v34 = vadd.f32 %v7724_v40, %v7108_v11  ;;  %v7096_v6 = vmul.f32 %v10106_v26, %v12490_v27 }
 0xf54   : > { %v7111_v19 = vmul.f32 %v7723_v43, %v7097_v46  ;;  %v7131_v8 = vmax.f32 %v7123_v30, 0.0 }
 0xf55   : > { %v10108_v44 = vpop.eup %10107  ;;  %v7130_v24 = vmax.f32 %v7122_v34, 0.0  ;;  %v7110_v20 = vmul.f32 %v7723_v43, %v7096_v6 }
 0xf56   : > { %v10110_v18 = vpop.eup %10109  ;;  %v7125_v7 = vadd.f32 %v7724_v40, %v7111_v19  ;;  %v7099_v38 = vmul.f32 %v10108_v44, %v12497_v49 }
 0xf57   : > { %8927 = vmatprep.mubr.msk.f32.mxu1 %vm704_vm0, %v7130_v24  ;;  %v7124_v53 = vadd.f32 %v7724_v40, %v7110_v20  ;;  %v7098_v60 = vmul.f32 %v10110_v18, %v12500_v39 }
 0xf58   : > { %8928 = vmatmul.mubr.msk.f32.vlgmr.msra.gmra.mrb[104].mxu1 %vm704_vm0, %v7131_v8  ;;  %v7113_v50 = vmul.f32 %v7723_v43, %v7099_v38  ;;  %v7133_v47 = vmax.f32 %v7125_v7, 0.0 }
 0xf59   : > { %v10112_v37 = vpop.eup %10111  ;;  %v7132_v22 = vmax.f32 %v7124_v53, 0.0  ;;  %v7112_v27 = vmul.f32 %v7723_v43, %v7098_v60 }
 0xf5a   : > { %v10114_v51 = vpop.eup %10113  ;;  %v7101_v61 = vmul.f32 %v10112_v37, %v12507_v16  ;;  %v7127_v10 = vadd.f32 %v7724_v40, %v7113_v50 }
 0xf5b   : > { %v7100_v36 = vmul.f32 %v10114_v51, %v12510_v57  ;;  %8930 = vmatprep.mubr.msk.f32.mxu1 %vm704_vm0, %v7132_v22  ;;  %v7126_v49 = vadd.f32 %v7724_v40, %v7112_v27  ;;  %v7725_v57 = vld [vmem:[%s12591_s20] ss:$0 sm:$0xff] }
 0xf5c   : > { %8931 = vmatmul.mubr.msk.f32.gmra.mrb[106].mxu1 %vm704_vm0, %v7133_v47  ;;  %v7115_v39 = vmul.f32 %v7723_v43, %v7101_v61  ;;  %v7135_v63 = vmax.f32 %v7127_v10, 0.0 }
 0xf5d   : > { %v7134_v5 = vmax.f32 %v7126_v49, 0.0  ;;  %v7114_v17 = vmul.f32 %v7723_v43, %v7100_v36 }
 0xf5e   : > { %v7129_v13 = vadd.f32 %v7724_v40, %v7115_v39 }
 0xf5f   : > { %8933 = vmatprep.mubr.msk.f32.mxu1 %vm704_vm0, %v7134_v5  ;;  %v7128_v28 = vadd.f32 %v7724_v40, %v7114_v17 }
 0xf60   : > { %8934 = vmatmul.mubr.msk.f32.gmra.mrb[108].mxu1 %vm704_vm0, %v7135_v63  ;;  %v7137_v58 = vmax.f32 %v7129_v13, 0.0 }
 0xf61   : > { %v7136_v16 = vmax.f32 %v7128_v28, 0.0 }
 0xf63   : > { %8936 = vmatprep.mubr.msk.f32.mxu1 %vm704_vm0, %v7136_v16 }
 0xf64   : > { %8937 = vmatmul.mubr.msk.f32.gmra.mrb[110].mxu1 %vm704_vm0, %v7137_v58 }
0x102b   : > { %v8929_v25 = vpop.f32.mrb[104].mxu1 }
0x102c   : > { %v7245_v48 = vadd.f32 %v8929_v25, %v7725_v57  ;;  %v7239_v29 = vpop.f32.mrb[105].mxu1 }
0x102d   : > { %v7240_v52 = vadd.f32 %v7725_v57, %v7239_v29 }
0x102e   : > { %7279 = vst.msk [vmem:[%s676_s22 + $0x8] sm:$0xff] %vm704_vm0, %v7245_v48 }
0x102f   : > { %7278 = vst.msk [vmem:[%s676_s22] sm:$0xff] %vm704_vm0, %v7240_v52  ;;  %v8932_v14 = vpop.f32.mrb[106].mxu1 }
0x1030   : > { %v7255_v4 = vadd.f32 %v8932_v14, %v7725_v57  ;;  %v7249_v62 = vpop.f32.mrb[107].mxu1 }
0x1031   : > { %v7250_v42 = vadd.f32 %v7725_v57, %v7249_v62 }
0x1032   : > { %7281 = vst.msk [vmem:[%s676_s22 + $0x18] sm:$0xff] %vm704_vm0, %v7255_v4 }
0x1033   : > { %7280 = vst.msk [vmem:[%s676_s22 + $0x10] sm:$0xff] %vm704_vm0, %v7250_v42  ;;  %v8935_v23 = vpop.f32.mrb[108].mxu1 }
0x1034   : > { %v7265_v21 = vadd.f32 %v8935_v23, %v7725_v57  ;;  %v7259_v59 = vpop.f32.mrb[109].mxu1 }
0x1035   : > { %v7260_v2 = vadd.f32 %v7725_v57, %v7259_v59 }
0x1036   : > { %7283 = vst.msk [vmem:[%s676_s22 + $0x28] sm:$0xff] %vm704_vm0, %v7265_v21 }
0x1037   : > { %7282 = vst.msk [vmem:[%s676_s22 + $0x20] sm:$0xff] %vm704_vm0, %v7260_v2  ;;  %v8938_v32 = vpop.f32.mrb[110].mxu1 }
0x1038   : > { %v7275_v33 = vadd.f32 %v8938_v32, %v7725_v57  ;;  %v7269_v9 = vpop.f32.mrb[111].mxu1 }
0x1039   : > { %v7270_v12 = vadd.f32 %v7725_v57, %v7269_v9 }
0x103a   : > { %7285 = vst.msk [vmem:[%s676_s22 + $0x38] sm:$0xff] %vm704_vm0, %v7275_v33 }
0x103b   : > { %7284 = vst.msk [vmem:[%s676_s22 + $0x30] sm:$0xff] %vm704_vm0, %v7270_v12 }
0x103c PF: > { %s31_s2 = sadd.s32 1, %s10121_s2  }
0x103d   : > { %p28_p4 = scmp.ge.s32.totalorder %s31_s2, 4  }
0x103f   :  { %30 = sbr.rel (!%p28_p4) target bundleno = 7 (0x7), region = 142 }

</bundles_post_ra>
